<compile_context>
chip_gen: v7x
topology: tpu7x:2x2x1
jax: 0.10.0
libtpu: 0.0.40
codegen_flags: <defaults>
</compile_context>

<pallas_src>
import functools

import jax
import jax.numpy as jnp
from jax.experimental import pallas as pl
from jax.experimental.pallas import tpu as pltpu


def _sym_quad_kernel(points_ref, mid_ref, quat_ref, table_ref, o_ref, *,
                     grid_size, num_points, tile_p):
    pt = pl.program_id(1)

    pts = points_ref[0]            # (3, TP)   lane-dense point coordinates
    mid = mid_ref[0]               # (3, 1)    per-batch mean point
    quat = quat_ref[0]             # (Q, 4)    prepared quaternions (w, x, y, z)
    table = table_ref[0]           # (4, G3)   lane-dense [cp_x; cp_y; cp_z; occ]

    num_quads = quat.shape[0]
    g3 = grid_size ** 3

    # ---- center points (quad-invariant), (1, TP) rows ----
    centered = pts - mid
    vx = centered[0:1, :]
    vy = centered[1:2, :]
    vz = centered[2:3, :]

    # ---- quaternion components on the sublane (quad) axis ----
    w = quat[:, 0:1]               # (Q, 1)
    x = quat[:, 1:2]
    y = quat[:, 2:3]
    z = quat[:, 3:4]

    # t = q (x) (0, v): (Q,1) x (1,TP) broadcasts -> (Q, TP)
    tw = -(x * vx) - y * vy - z * vz
    tx = w * vx + y * vz - z * vy
    ty = w * vy - x * vz + z * vx
    tz = w * vz + x * vy - y * vx

    # r = vec(t (x) conj(q))  -> rotated points, (Q, TP) per coordinate
    rx = -tw * x + tx * w - ty * z + tz * y
    ry = -tw * y + tx * z + ty * w - tz * x
    rz = -tw * z - tx * y + ty * x + tz * w

    # ---- voxel index: ceil((p + 0.5) * G - 0.5), flatten, clamp flattened ----
    # (matches torch: per-axis indices are NOT clamped, only the linear index)
    gs_f = float(grid_size)
    ix = jnp.ceil((rx + 0.5) * gs_f - 0.5).astype(jnp.int32)
    iy = jnp.ceil((ry + 0.5) * gs_f - 0.5).astype(jnp.int32)
    iz = jnp.ceil((rz + 0.5) * gs_f - 0.5).astype(jnp.int32)
    lin = ix * (grid_size * grid_size) + iy * grid_size + iz
    lin = jnp.clip(lin, 0, g3 - 1)                                  # (Q, TP) int32

    # Hoisted once per grid step (outside the quad loop).
    g_iota = jax.lax.broadcasted_iota(jnp.int32, (g3, tile_p), 0)   # (G3, TP)

    # ---- per-quad one-hot gather (MXU) + masked squared distance ----
    total = jnp.zeros((1, tile_p), jnp.float32)
    for q in range(num_quads):                      # Q is small & static
        lin_q = lin[q:q + 1, :]                                     # (1, TP)
        one_hot = (g_iota == lin_q).astype(jnp.float32)             # (G3, TP)
        gathered = jax.lax.dot_general(
            table, one_hot,
            dimension_numbers=(((1,), (0,)), ((), ())),             # contract G3
            preferred_element_type=jnp.float32)                     # (4, TP)
        mask = 1.0 - gathered[3:4, :]
        dx = (rx[q:q + 1, :] - gathered[0:1, :]) * mask
        dy = (ry[q:q + 1, :] - gathered[1:2, :]) * mask
        dz = (rz[q:q + 1, :] - gathered[2:3, :]) * mask
        total += dx * dx + dy * dy + dz * dz

    # Mask out padded point lanes (only compiled in when P was padded).
    if num_points % tile_p != 0:
        lane = jax.lax.broadcasted_iota(jnp.int32, (1, tile_p), 1)
        valid = ((pt * tile_p + lane) < num_points).astype(jnp.float32)
        total = total * valid

    o_ref[...] = jnp.zeros_like(o_ref) + jnp.sum(total)


def sym_quad_loss(voxel, points, closest_points, quads, *, tile_p=None):
    """Pallas TPU implementation of SymQuadLoss.forward. Returns a scalar f32."""
    f32 = jnp.float32
    points = points.astype(f32)
    quads = quads.astype(f32)
    voxel = voxel.astype(f32)
    closest_points = closest_points.astype(f32)

    B, P, _ = points.shape
    Q = quads.shape[1]
    G = voxel.shape[1]
    G3 = G * G * G

    # --- tiny prep hoisted out of the kernel ---------------------------------
    mid = jnp.mean(points, axis=1)                                   # (B, 3)
    qs = quads[..., 1:]                                              # (B, Q, 3)
    qs = qs / jnp.sqrt(jnp.sum(qs * qs, axis=2, keepdims=True))
    quat = 0.707 * jnp.concatenate([jnp.ones((B, Q, 1), f32), qs], axis=-1)  # (B,Q,4)

    # --- P tile size: keep the f32 (G3, TP) one-hot within ~8 MiB ------------
    if tile_p is None:
        budget = 8 * 1024 * 1024
        tp = max(128, min(1024, (budget // (4 * G3) // 128) * 128))
        tp = min(tp, ((P + 127) // 128) * 128)       # don't over-pad small P
    else:
        tp = tile_p
    p_pad = ((P + tp - 1) // tp) * tp
    npt = p_pad // tp

    # --- layout plumbing: lane-dense points + lane-dense (4, G3) table -------
    points_t = jnp.transpose(points, (0, 2, 1))                      # (B, 3, P)
    if p_pad != P:
        points_t = jnp.pad(points_t, ((0, 0), (0, 0), (0, p_pad - P)))
    mid_c = mid[..., None]                                           # (B, 3, 1)
    table_t = jnp.concatenate(
        [closest_points, voxel.reshape(B, G3, 1)], axis=-1)          # (B, G3, 4)
    table_t = jnp.transpose(table_t, (0, 2, 1))                      # (B, 4, G3)

    kernel = functools.partial(
        _sym_quad_kernel, grid_size=G, num_points=P, tile_p=tp)

    # quat / mid / table index_maps ignore the P-tile axis, so they are DMA'd
    # only when the batch index changes (no per-step micro-DMAs).
    partial_sums = pl.pallas_call(
        kernel,
        out_shape=jax.ShapeDtypeStruct((B, npt, 1, 1), f32),
        grid_spec=pltpu.PrefetchScalarGridSpec(
            num_scalar_prefetch=0,
            grid=(B, npt),
            in_specs=[
                pl.BlockSpec((1, 3, tp), lambda b, t: (b, 0, t)),    # points tile
                pl.BlockSpec((1, 3, 1), lambda b, t: (b, 0, 0)),     # mid point
                pl.BlockSpec((1, Q, 4), lambda b, t: (b, 0, 0)),     # all quats
                pl.BlockSpec((1, 4, G3), lambda b, t: (b, 0, 0)),    # lane-dense table
            ],
            out_specs=pl.BlockSpec((1, 1, 1, 1), lambda b, t: (b, t, 0, 0)),
        ),
        compiler_params=pltpu.CompilerParams(
            dimension_semantics=("parallel", "parallel"),
            vmem_limit_bytes=32 * 1024 * 1024,
        ),
    )(points_t, mid_c, quat, table_t)

    return jnp.sum(partial_sums) / (B * Q * P)


# --------------------------- pure-JAX reference -------------------------------
def _hamilton(q1, q2):
    w1, x1, y1, z1 = q1[..., 0], q1[..., 1], q1[..., 2], q1[..., 3]
    w2, x2, y2, z2 = q2[..., 0], q2[..., 1], q2[..., 2], q2[..., 3]
    w = w1 * w2 - x1 * x2 - y1 * y2 - z1 * z2
    x = w1 * x2 + x1 * w2 + y1 * z2 - z1 * y2
    y = w1 * y2 - x1 * z2 + y1 * w2 + z1 * x2
    z = w1 * z2 + x1 * y2 - y1 * x2 + z1 * w2
    return jnp.stack([w, x, y, z], axis=-1)


def _sym_quad_loss_reference(voxel, points, closest_points, quads):
    B, Q = quads.shape[0], quads.shape[1]
    P = points.shape[1]
    G = voxel.shape[1]

    qs = quads[..., 1:]
    qs_norm = jnp.sqrt(jnp.sum(qs * qs, axis=2, keepdims=True))
    qs = qs / qs_norm
    qs = jnp.concatenate([jnp.ones((B, Q, 1), jnp.float32), qs], axis=-1)
    qs = 0.707 * qs
    qs = jnp.broadcast_to(qs[:, :, None, :], (B, Q, P, 4))

    mid = jnp.mean(points, axis=1)                                   # (B, 3)
    pts = jnp.broadcast_to(points[:, None, :, :], (B, Q, P, 3))
    pts = pts - mid[:, None, None, :]

    qv = jnp.concatenate([jnp.zeros_like(pts[..., :1]), pts], axis=-1)
    qconj = jnp.concatenate([qs[..., :1], -qs[..., 1:]], axis=-1)
    rot = _hamilton(_hamilton(qs, qv), qconj)[..., 1:]               # (B, Q, P, 3)

    idx = jnp.ceil((rot + 0.5) * G - 0.5).astype(jnp.int32)
    lin = idx[..., 0] * G * G + idx[..., 1] * G + idx[..., 2]
    lin = jnp.clip(lin, 0, G ** 3 - 1)                               # (B, Q, P)

    cp = jax.vmap(lambda t, i: t[i])(closest_points, lin.reshape(B, -1)).reshape(B, Q, P, 3)
    occ = jax.vmap(lambda t, i: t[i])(voxel.reshape(B, -1), lin.reshape(B, -1)).reshape(B, Q, P)

    mask = 1.0 - occ
    dist = (rot - cp) * mask[..., None]
    return jnp.mean(jnp.sum(dist ** 2, axis=3))


if __name__ == "__main__":
    key = jax.random.PRNGKey(0)
    B, P, Q, G = 2, 384, 6, 8
    k1, k2, k3, k4 = jax.random.split(key, 4)

    points = jax.random.uniform(k1, (B, P, 3), jnp.float32, minval=-0.5, maxval=0.5)
    quads = jax.random.normal(k2, (B, Q, 4), dtype=jnp.float32)
    voxel = (jax.random.uniform(k3, (B, G, G, G)) > 0.5).astype(jnp.float32)
    closest_points = jax.random.uniform(k4, (B, G ** 3, 3), jnp.float32,
                                        minval=-0.5, maxval=0.5)

    ref = jax.block_until_ready(
        _sym_quad_loss_reference(voxel, points, closest_points, quads))

    # Default tile (single P tile at this size) and an explicit smaller tile
    # that exercises the multi-tile grid plus padded-lane masking path.
    out_default = jax.block_until_ready(
        sym_quad_loss(voxel, points, closest_points, quads))
    out_tiled = jax.block_until_ready(
        sym_quad_loss(voxel, points, closest_points, quads, tile_p=256))

    assert jnp.allclose(out_default, ref, rtol=1e-4, atol=1e-4), (out_default, ref)
    assert jnp.allclose(out_tiled, ref, rtol=1e-4, atol=1e-4), (out_tiled, ref)
    print("KERNEL_OK")
</pallas_src>

<mosaic_0001>
module attributes {stable_mosaic.version = 11 : i64} {
  func.func @_sym_quad_kernel(%arg0: i32, %arg1: i32, %arg2: memref<1x3x384xf32, #tpu.memory_space<vmem>>, %arg3: memref<1x3x1xf32, #tpu.memory_space<vmem>>, %arg4: memref<1x6x4xf32, #tpu.memory_space<vmem>>, %arg5: memref<1x4x512xf32, #tpu.memory_space<vmem>>, %arg6: memref<1x1x1x1xf32, #tpu.memory_space<vmem>>) attributes {dimension_semantics = [#tpu.dimension_semantics<parallel>, #tpu.dimension_semantics<parallel>], iteration_bounds = array<i64: 2, 1>, scalar_prefetch = 0 : i64, scratch_operands = 0 : i64, tpu.core_type = #tpu.core_type<tc>, window_params = [{transform_indices = @transform_0, window_bounds = array<i64: 1, 3, 384>}, {transform_indices = @transform_1, window_bounds = array<i64: 1, 3, 1>}, {transform_indices = @transform_2, window_bounds = array<i64: 1, 6, 4>}, {transform_indices = @transform_3, window_bounds = array<i64: 1, 4, 512>}, {transform_indices = @transform_4, window_bounds = array<i64: 1, 1, 1, 1>}]} {
    %c0 = arith.constant 0 : index
    %c0_0 = arith.constant 0 : index
    %c0_1 = arith.constant 0 : index
    %0 = vector.load %arg2[%c0, %c0_0, %c0_1] : memref<1x3x384xf32, #tpu.memory_space<vmem>>, vector<1x3x384xf32>
    %1 = vector.shape_cast %0 : vector<1x3x384xf32> to vector<3x384xf32>
    %c0_2 = arith.constant 0 : index
    %c0_3 = arith.constant 0 : index
    %c0_4 = arith.constant 0 : index
    %2 = vector.load %arg3[%c0_2, %c0_3, %c0_4] : memref<1x3x1xf32, #tpu.memory_space<vmem>>, vector<1x3x1xf32>
    %3 = vector.shape_cast %2 : vector<1x3x1xf32> to vector<3x1xf32>
    %c0_5 = arith.constant 0 : index
    %c0_6 = arith.constant 0 : index
    %c0_7 = arith.constant 0 : index
    %4 = vector.load %arg4[%c0_5, %c0_6, %c0_7] : memref<1x6x4xf32, #tpu.memory_space<vmem>>, vector<1x6x4xf32>
    %5 = vector.shape_cast %4 : vector<1x6x4xf32> to vector<6x4xf32>
    %c0_8 = arith.constant 0 : index
    %c0_9 = arith.constant 0 : index
    %c0_10 = arith.constant 0 : index
    %6 = vector.load %arg5[%c0_8, %c0_9, %c0_10] : memref<1x4x512xf32, #tpu.memory_space<vmem>>, vector<1x4x512xf32>
    %7 = vector.shape_cast %6 : vector<1x4x512xf32> to vector<4x512xf32>
    %8 = vector.broadcast %3 : vector<3x1xf32> to vector<3x384xf32>
    %9 = arith.subf %1, %8 : vector<3x384xf32>
    %10 = vector.extract_strided_slice %9 {offsets = [0, 0], sizes = [1, 384], strides = [1, 1]} : vector<3x384xf32> to vector<1x384xf32>
    %11 = vector.extract_strided_slice %9 {offsets = [1, 0], sizes = [1, 384], strides = [1, 1]} : vector<3x384xf32> to vector<1x384xf32>
    %12 = vector.extract_strided_slice %9 {offsets = [2, 0], sizes = [1, 384], strides = [1, 1]} : vector<3x384xf32> to vector<1x384xf32>
    %13 = vector.extract_strided_slice %5 {offsets = [0, 0], sizes = [6, 1], strides = [1, 1]} : vector<6x4xf32> to vector<6x1xf32>
    %14 = vector.extract_strided_slice %5 {offsets = [0, 1], sizes = [6, 1], strides = [1, 1]} : vector<6x4xf32> to vector<6x1xf32>
    %15 = vector.extract_strided_slice %5 {offsets = [0, 2], sizes = [6, 1], strides = [1, 1]} : vector<6x4xf32> to vector<6x1xf32>
    %16 = vector.extract_strided_slice %5 {offsets = [0, 3], sizes = [6, 1], strides = [1, 1]} : vector<6x4xf32> to vector<6x1xf32>
    %17 = vector.broadcast %14 : vector<6x1xf32> to vector<6x384xf32>
    %18 = vector.broadcast %10 : vector<1x384xf32> to vector<6x384xf32>
    %19 = arith.mulf %17, %18 : vector<6x384xf32>
    %cst = arith.constant 0.000000e+00 : f32
    %20 = vector.broadcast %cst : f32 to vector<6x384xf32>
    %21 = arith.subf %20, %19 : vector<6x384xf32>
    %22 = vector.broadcast %15 : vector<6x1xf32> to vector<6x384xf32>
    %23 = vector.broadcast %11 : vector<1x384xf32> to vector<6x384xf32>
    %24 = arith.mulf %22, %23 : vector<6x384xf32>
    %25 = arith.subf %21, %24 : vector<6x384xf32>
    %26 = vector.broadcast %16 : vector<6x1xf32> to vector<6x384xf32>
    %27 = vector.broadcast %12 : vector<1x384xf32> to vector<6x384xf32>
    %28 = arith.mulf %26, %27 : vector<6x384xf32>
    %29 = arith.subf %25, %28 : vector<6x384xf32>
    %30 = vector.broadcast %13 : vector<6x1xf32> to vector<6x384xf32>
    %31 = vector.broadcast %10 : vector<1x384xf32> to vector<6x384xf32>
    %32 = arith.mulf %30, %31 : vector<6x384xf32>
    %33 = vector.broadcast %15 : vector<6x1xf32> to vector<6x384xf32>
    %34 = vector.broadcast %12 : vector<1x384xf32> to vector<6x384xf32>
    %35 = arith.mulf %33, %34 : vector<6x384xf32>
    %36 = arith.addf %32, %35 : vector<6x384xf32>
    %37 = vector.broadcast %16 : vector<6x1xf32> to vector<6x384xf32>
    %38 = vector.broadcast %11 : vector<1x384xf32> to vector<6x384xf32>
    %39 = arith.mulf %37, %38 : vector<6x384xf32>
    %40 = arith.subf %36, %39 : vector<6x384xf32>
    %41 = vector.broadcast %13 : vector<6x1xf32> to vector<6x384xf32>
    %42 = vector.broadcast %11 : vector<1x384xf32> to vector<6x384xf32>
    %43 = arith.mulf %41, %42 : vector<6x384xf32>
    %44 = vector.broadcast %14 : vector<6x1xf32> to vector<6x384xf32>
    %45 = vector.broadcast %12 : vector<1x384xf32> to vector<6x384xf32>
    %46 = arith.mulf %44, %45 : vector<6x384xf32>
    %47 = arith.subf %43, %46 : vector<6x384xf32>
    %48 = vector.broadcast %16 : vector<6x1xf32> to vector<6x384xf32>
    %49 = vector.broadcast %10 : vector<1x384xf32> to vector<6x384xf32>
    %50 = arith.mulf %48, %49 : vector<6x384xf32>
    %51 = arith.addf %47, %50 : vector<6x384xf32>
    %52 = vector.broadcast %13 : vector<6x1xf32> to vector<6x384xf32>
    %53 = vector.broadcast %12 : vector<1x384xf32> to vector<6x384xf32>
    %54 = arith.mulf %52, %53 : vector<6x384xf32>
    %55 = vector.broadcast %14 : vector<6x1xf32> to vector<6x384xf32>
    %56 = vector.broadcast %11 : vector<1x384xf32> to vector<6x384xf32>
    %57 = arith.mulf %55, %56 : vector<6x384xf32>
    %58 = arith.addf %54, %57 : vector<6x384xf32>
    %59 = vector.broadcast %15 : vector<6x1xf32> to vector<6x384xf32>
    %60 = vector.broadcast %10 : vector<1x384xf32> to vector<6x384xf32>
    %61 = arith.mulf %59, %60 : vector<6x384xf32>
    %62 = arith.subf %58, %61 : vector<6x384xf32>
    %cst_11 = arith.constant 0.000000e+00 : f32
    %63 = vector.broadcast %cst_11 : f32 to vector<6x384xf32>
    %64 = arith.subf %63, %29 : vector<6x384xf32>
    %65 = vector.broadcast %14 : vector<6x1xf32> to vector<6x384xf32>
    %66 = arith.mulf %64, %65 : vector<6x384xf32>
    %67 = vector.broadcast %13 : vector<6x1xf32> to vector<6x384xf32>
    %68 = arith.mulf %40, %67 : vector<6x384xf32>
    %69 = arith.addf %66, %68 : vector<6x384xf32>
    %70 = vector.broadcast %16 : vector<6x1xf32> to vector<6x384xf32>
    %71 = arith.mulf %51, %70 : vector<6x384xf32>
    %72 = arith.subf %69, %71 : vector<6x384xf32>
    %73 = vector.broadcast %15 : vector<6x1xf32> to vector<6x384xf32>
    %74 = arith.mulf %62, %73 : vector<6x384xf32>
    %75 = arith.addf %72, %74 : vector<6x384xf32>
    %cst_12 = arith.constant 0.000000e+00 : f32
    %76 = vector.broadcast %cst_12 : f32 to vector<6x384xf32>
    %77 = arith.subf %76, %29 : vector<6x384xf32>
    %78 = vector.broadcast %15 : vector<6x1xf32> to vector<6x384xf32>
    %79 = arith.mulf %77, %78 : vector<6x384xf32>
    %80 = vector.broadcast %16 : vector<6x1xf32> to vector<6x384xf32>
    %81 = arith.mulf %40, %80 : vector<6x384xf32>
    %82 = arith.addf %79, %81 : vector<6x384xf32>
    %83 = vector.broadcast %13 : vector<6x1xf32> to vector<6x384xf32>
    %84 = arith.mulf %51, %83 : vector<6x384xf32>
    %85 = arith.addf %82, %84 : vector<6x384xf32>
    %86 = vector.broadcast %14 : vector<6x1xf32> to vector<6x384xf32>
    %87 = arith.mulf %62, %86 : vector<6x384xf32>
    %88 = arith.subf %85, %87 : vector<6x384xf32>
    %cst_13 = arith.constant 0.000000e+00 : f32
    %89 = vector.broadcast %cst_13 : f32 to vector<6x384xf32>
    %90 = arith.subf %89, %29 : vector<6x384xf32>
    %91 = vector.broadcast %16 : vector<6x1xf32> to vector<6x384xf32>
    %92 = arith.mulf %90, %91 : vector<6x384xf32>
    %93 = vector.broadcast %15 : vector<6x1xf32> to vector<6x384xf32>
    %94 = arith.mulf %40, %93 : vector<6x384xf32>
    %95 = arith.subf %92, %94 : vector<6x384xf32>
    %96 = vector.broadcast %14 : vector<6x1xf32> to vector<6x384xf32>
    %97 = arith.mulf %51, %96 : vector<6x384xf32>
    %98 = arith.addf %95, %97 : vector<6x384xf32>
    %99 = vector.broadcast %13 : vector<6x1xf32> to vector<6x384xf32>
    %100 = arith.mulf %62, %99 : vector<6x384xf32>
    %101 = arith.addf %98, %100 : vector<6x384xf32>
    %cst_14 = arith.constant 5.000000e-01 : f32
    %102 = vector.broadcast %cst_14 : f32 to vector<6x384xf32>
    %103 = arith.addf %75, %102 : vector<6x384xf32>
    %cst_15 = arith.constant 8.000000e+00 : f32
    %104 = vector.broadcast %cst_15 : f32 to vector<6x384xf32>
    %105 = arith.mulf %103, %104 : vector<6x384xf32>
    %cst_16 = arith.constant 5.000000e-01 : f32
    %106 = vector.broadcast %cst_16 : f32 to vector<6x384xf32>
    %107 = arith.subf %105, %106 : vector<6x384xf32>
    %108 = math.ceil %107 : vector<6x384xf32>
    %109 = arith.fptosi %108 : vector<6x384xf32> to vector<6x384xi32>
    %cst_17 = arith.constant 5.000000e-01 : f32
    %110 = vector.broadcast %cst_17 : f32 to vector<6x384xf32>
    %111 = arith.addf %88, %110 : vector<6x384xf32>
    %cst_18 = arith.constant 8.000000e+00 : f32
    %112 = vector.broadcast %cst_18 : f32 to vector<6x384xf32>
    %113 = arith.mulf %111, %112 : vector<6x384xf32>
    %cst_19 = arith.constant 5.000000e-01 : f32
    %114 = vector.broadcast %cst_19 : f32 to vector<6x384xf32>
    %115 = arith.subf %113, %114 : vector<6x384xf32>
    %116 = math.ceil %115 : vector<6x384xf32>
    %117 = arith.fptosi %116 : vector<6x384xf32> to vector<6x384xi32>
    %cst_20 = arith.constant 5.000000e-01 : f32
    %118 = vector.broadcast %cst_20 : f32 to vector<6x384xf32>
    %119 = arith.addf %101, %118 : vector<6x384xf32>
    %cst_21 = arith.constant 8.000000e+00 : f32
    %120 = vector.broadcast %cst_21 : f32 to vector<6x384xf32>
    %121 = arith.mulf %119, %120 : vector<6x384xf32>
    %cst_22 = arith.constant 5.000000e-01 : f32
    %122 = vector.broadcast %cst_22 : f32 to vector<6x384xf32>
    %123 = arith.subf %121, %122 : vector<6x384xf32>
    %124 = math.ceil %123 : vector<6x384xf32>
    %125 = arith.fptosi %124 : vector<6x384xf32> to vector<6x384xi32>
    %c64_i32 = arith.constant 64 : i32
    %126 = vector.broadcast %c64_i32 : i32 to vector<6x384xi32>
    %127 = arith.muli %109, %126 : vector<6x384xi32>
    %c8_i32 = arith.constant 8 : i32
    %128 = vector.broadcast %c8_i32 : i32 to vector<6x384xi32>
    %129 = arith.muli %117, %128 : vector<6x384xi32>
    %130 = arith.addi %127, %129 : vector<6x384xi32>
    %131 = arith.addi %130, %125 : vector<6x384xi32>
    %c0_i32 = arith.constant 0 : i32
    %c511_i32 = arith.constant 511 : i32
    %132 = vector.broadcast %c0_i32 : i32 to vector<6x384xi32>
    %133 = arith.maxsi %132, %131 : vector<6x384xi32>
    %134 = vector.broadcast %c511_i32 : i32 to vector<6x384xi32>
    %135 = arith.minsi %134, %133 : vector<6x384xi32>
    %136 = tpu.iota {dimensions = array<i32: 0>} : vector<512x384xi32>
    %cst_23 = arith.constant 0.000000e+00 : f32
    %137 = vector.broadcast %cst_23 : f32 to vector<1x384xf32>
    %138 = vector.extract_strided_slice %135 {offsets = [0, 0], sizes = [1, 384], strides = [1, 1]} : vector<6x384xi32> to vector<1x384xi32>
    %139 = vector.broadcast %138 : vector<1x384xi32> to vector<512x384xi32>
    %140 = arith.cmpi eq, %136, %139 : vector<512x384xi32>
    %141 = arith.extui %140 : vector<512x384xi1> to vector<512x384xi32>
    %142 = arith.sitofp %141 : vector<512x384xi32> to vector<512x384xf32>
    %cst_24 = arith.constant dense<0.000000e+00> : vector<4x384xf32>
    %143 = tpu.matmul %7, %142, %cst_24 {dimension_numbers = #tpu.dot_dimension_numbers<[1], [0], [0], [1], [0, 0, 1, 1], [], []>} : vector<4x512xf32>, vector<512x384xf32>, vector<4x384xf32> -> vector<4x384xf32>
    %144 = vector.extract_strided_slice %143 {offsets = [3, 0], sizes = [1, 384], strides = [1, 1]} : vector<4x384xf32> to vector<1x384xf32>
    %cst_25 = arith.constant 1.000000e+00 : f32
    %145 = vector.broadcast %cst_25 : f32 to vector<1x384xf32>
    %146 = arith.subf %145, %144 : vector<1x384xf32>
    %147 = vector.extract_strided_slice %75 {offsets = [0, 0], sizes = [1, 384], strides = [1, 1]} : vector<6x384xf32> to vector<1x384xf32>
    %148 = vector.extract_strided_slice %143 {offsets = [0, 0], sizes = [1, 384], strides = [1, 1]} : vector<4x384xf32> to vector<1x384xf32>
    %149 = arith.subf %147, %148 : vector<1x384xf32>
    %150 = arith.mulf %149, %146 : vector<1x384xf32>
    %151 = vector.extract_strided_slice %88 {offsets = [0, 0], sizes = [1, 384], strides = [1, 1]} : vector<6x384xf32> to vector<1x384xf32>
    %152 = vector.extract_strided_slice %143 {offsets = [1, 0], sizes = [1, 384], strides = [1, 1]} : vector<4x384xf32> to vector<1x384xf32>
    %153 = arith.subf %151, %152 : vector<1x384xf32>
    %154 = arith.mulf %153, %146 : vector<1x384xf32>
    %155 = vector.extract_strided_slice %101 {offsets = [0, 0], sizes = [1, 384], strides = [1, 1]} : vector<6x384xf32> to vector<1x384xf32>
    %156 = vector.extract_strided_slice %143 {offsets = [2, 0], sizes = [1, 384], strides = [1, 1]} : vector<4x384xf32> to vector<1x384xf32>
    %157 = arith.subf %155, %156 : vector<1x384xf32>
    %158 = arith.mulf %157, %146 : vector<1x384xf32>
    %159 = arith.mulf %150, %150 : vector<1x384xf32>
    %160 = arith.mulf %154, %154 : vector<1x384xf32>
    %161 = arith.addf %159, %160 : vector<1x384xf32>
    %162 = arith.mulf %158, %158 : vector<1x384xf32>
    %163 = arith.addf %161, %162 : vector<1x384xf32>
    %164 = arith.addf %137, %163 : vector<1x384xf32>
    %165 = vector.extract_strided_slice %135 {offsets = [1, 0], sizes = [1, 384], strides = [1, 1]} : vector<6x384xi32> to vector<1x384xi32>
    %166 = vector.broadcast %165 : vector<1x384xi32> to vector<512x384xi32>
    %167 = arith.cmpi eq, %136, %166 : vector<512x384xi32>
    %168 = arith.extui %167 : vector<512x384xi1> to vector<512x384xi32>
    %169 = arith.sitofp %168 : vector<512x384xi32> to vector<512x384xf32>
    %cst_26 = arith.constant dense<0.000000e+00> : vector<4x384xf32>
    %170 = tpu.matmul %7, %169, %cst_26 {dimension_numbers = #tpu.dot_dimension_numbers<[1], [0], [0], [1], [0, 0, 1, 1], [], []>} : vector<4x512xf32>, vector<512x384xf32>, vector<4x384xf32> -> vector<4x384xf32>
    %171 = vector.extract_strided_slice %170 {offsets = [3, 0], sizes = [1, 384], strides = [1, 1]} : vector<4x384xf32> to vector<1x384xf32>
    %cst_27 = arith.constant 1.000000e+00 : f32
    %172 = vector.broadcast %cst_27 : f32 to vector<1x384xf32>
    %173 = arith.subf %172, %171 : vector<1x384xf32>
    %174 = vector.extract_strided_slice %75 {offsets = [1, 0], sizes = [1, 384], strides = [1, 1]} : vector<6x384xf32> to vector<1x384xf32>
    %175 = vector.extract_strided_slice %170 {offsets = [0, 0], sizes = [1, 384], strides = [1, 1]} : vector<4x384xf32> to vector<1x384xf32>
    %176 = arith.subf %174, %175 : vector<1x384xf32>
    %177 = arith.mulf %176, %173 : vector<1x384xf32>
    %178 = vector.extract_strided_slice %88 {offsets = [1, 0], sizes = [1, 384], strides = [1, 1]} : vector<6x384xf32> to vector<1x384xf32>
    %179 = vector.extract_strided_slice %170 {offsets = [1, 0], sizes = [1, 384], strides = [1, 1]} : vector<4x384xf32> to vector<1x384xf32>
    %180 = arith.subf %178, %179 : vector<1x384xf32>
    %181 = arith.mulf %180, %173 : vector<1x384xf32>
    %182 = vector.extract_strided_slice %101 {offsets = [1, 0], sizes = [1, 384], strides = [1, 1]} : vector<6x384xf32> to vector<1x384xf32>
    %183 = vector.extract_strided_slice %170 {offsets = [2, 0], sizes = [1, 384], strides = [1, 1]} : vector<4x384xf32> to vector<1x384xf32>
    %184 = arith.subf %182, %183 : vector<1x384xf32>
    %185 = arith.mulf %184, %173 : vector<1x384xf32>
    %186 = arith.mulf %177, %177 : vector<1x384xf32>
    %187 = arith.mulf %181, %181 : vector<1x384xf32>
    %188 = arith.addf %186, %187 : vector<1x384xf32>
    %189 = arith.mulf %185, %185 : vector<1x384xf32>
    %190 = arith.addf %188, %189 : vector<1x384xf32>
    %191 = arith.addf %164, %190 : vector<1x384xf32>
    %192 = vector.extract_strided_slice %135 {offsets = [2, 0], sizes = [1, 384], strides = [1, 1]} : vector<6x384xi32> to vector<1x384xi32>
    %193 = vector.broadcast %192 : vector<1x384xi32> to vector<512x384xi32>
    %194 = arith.cmpi eq, %136, %193 : vector<512x384xi32>
    %195 = arith.extui %194 : vector<512x384xi1> to vector<512x384xi32>
    %196 = arith.sitofp %195 : vector<512x384xi32> to vector<512x384xf32>
    %cst_28 = arith.constant dense<0.000000e+00> : vector<4x384xf32>
    %197 = tpu.matmul %7, %196, %cst_28 {dimension_numbers = #tpu.dot_dimension_numbers<[1], [0], [0], [1], [0, 0, 1, 1], [], []>} : vector<4x512xf32>, vector<512x384xf32>, vector<4x384xf32> -> vector<4x384xf32>
    %198 = vector.extract_strided_slice %197 {offsets = [3, 0], sizes = [1, 384], strides = [1, 1]} : vector<4x384xf32> to vector<1x384xf32>
    %cst_29 = arith.constant 1.000000e+00 : f32
    %199 = vector.broadcast %cst_29 : f32 to vector<1x384xf32>
    %200 = arith.subf %199, %198 : vector<1x384xf32>
    %201 = vector.extract_strided_slice %75 {offsets = [2, 0], sizes = [1, 384], strides = [1, 1]} : vector<6x384xf32> to vector<1x384xf32>
    %202 = vector.extract_strided_slice %197 {offsets = [0, 0], sizes = [1, 384], strides = [1, 1]} : vector<4x384xf32> to vector<1x384xf32>
    %203 = arith.subf %201, %202 : vector<1x384xf32>
    %204 = arith.mulf %203, %200 : vector<1x384xf32>
    %205 = vector.extract_strided_slice %88 {offsets = [2, 0], sizes = [1, 384], strides = [1, 1]} : vector<6x384xf32> to vector<1x384xf32>
    %206 = vector.extract_strided_slice %197 {offsets = [1, 0], sizes = [1, 384], strides = [1, 1]} : vector<4x384xf32> to vector<1x384xf32>
    %207 = arith.subf %205, %206 : vector<1x384xf32>
    %208 = arith.mulf %207, %200 : vector<1x384xf32>
    %209 = vector.extract_strided_slice %101 {offsets = [2, 0], sizes = [1, 384], strides = [1, 1]} : vector<6x384xf32> to vector<1x384xf32>
    %210 = vector.extract_strided_slice %197 {offsets = [2, 0], sizes = [1, 384], strides = [1, 1]} : vector<4x384xf32> to vector<1x384xf32>
    %211 = arith.subf %209, %210 : vector<1x384xf32>
    %212 = arith.mulf %211, %200 : vector<1x384xf32>
    %213 = arith.mulf %204, %204 : vector<1x384xf32>
    %214 = arith.mulf %208, %208 : vector<1x384xf32>
    %215 = arith.addf %213, %214 : vector<1x384xf32>
    %216 = arith.mulf %212, %212 : vector<1x384xf32>
    %217 = arith.addf %215, %216 : vector<1x384xf32>
    %218 = arith.addf %191, %217 : vector<1x384xf32>
    %219 = vector.extract_strided_slice %135 {offsets = [3, 0], sizes = [1, 384], strides = [1, 1]} : vector<6x384xi32> to vector<1x384xi32>
    %220 = vector.broadcast %219 : vector<1x384xi32> to vector<512x384xi32>
    %221 = arith.cmpi eq, %136, %220 : vector<512x384xi32>
    %222 = arith.extui %221 : vector<512x384xi1> to vector<512x384xi32>
    %223 = arith.sitofp %222 : vector<512x384xi32> to vector<512x384xf32>
    %cst_30 = arith.constant dense<0.000000e+00> : vector<4x384xf32>
    %224 = tpu.matmul %7, %223, %cst_30 {dimension_numbers = #tpu.dot_dimension_numbers<[1], [0], [0], [1], [0, 0, 1, 1], [], []>} : vector<4x512xf32>, vector<512x384xf32>, vector<4x384xf32> -> vector<4x384xf32>
    %225 = vector.extract_strided_slice %224 {offsets = [3, 0], sizes = [1, 384], strides = [1, 1]} : vector<4x384xf32> to vector<1x384xf32>
    %cst_31 = arith.constant 1.000000e+00 : f32
    %226 = vector.broadcast %cst_31 : f32 to vector<1x384xf32>
    %227 = arith.subf %226, %225 : vector<1x384xf32>
    %228 = vector.extract_strided_slice %75 {offsets = [3, 0], sizes = [1, 384], strides = [1, 1]} : vector<6x384xf32> to vector<1x384xf32>
    %229 = vector.extract_strided_slice %224 {offsets = [0, 0], sizes = [1, 384], strides = [1, 1]} : vector<4x384xf32> to vector<1x384xf32>
    %230 = arith.subf %228, %229 : vector<1x384xf32>
    %231 = arith.mulf %230, %227 : vector<1x384xf32>
    %232 = vector.extract_strided_slice %88 {offsets = [3, 0], sizes = [1, 384], strides = [1, 1]} : vector<6x384xf32> to vector<1x384xf32>
    %233 = vector.extract_strided_slice %224 {offsets = [1, 0], sizes = [1, 384], strides = [1, 1]} : vector<4x384xf32> to vector<1x384xf32>
    %234 = arith.subf %232, %233 : vector<1x384xf32>
    %235 = arith.mulf %234, %227 : vector<1x384xf32>
    %236 = vector.extract_strided_slice %101 {offsets = [3, 0], sizes = [1, 384], strides = [1, 1]} : vector<6x384xf32> to vector<1x384xf32>
    %237 = vector.extract_strided_slice %224 {offsets = [2, 0], sizes = [1, 384], strides = [1, 1]} : vector<4x384xf32> to vector<1x384xf32>
    %238 = arith.subf %236, %237 : vector<1x384xf32>
    %239 = arith.mulf %238, %227 : vector<1x384xf32>
    %240 = arith.mulf %231, %231 : vector<1x384xf32>
    %241 = arith.mulf %235, %235 : vector<1x384xf32>
    %242 = arith.addf %240, %241 : vector<1x384xf32>
    %243 = arith.mulf %239, %239 : vector<1x384xf32>
    %244 = arith.addf %242, %243 : vector<1x384xf32>
    %245 = arith.addf %218, %244 : vector<1x384xf32>
    %246 = vector.extract_strided_slice %135 {offsets = [4, 0], sizes = [1, 384], strides = [1, 1]} : vector<6x384xi32> to vector<1x384xi32>
    %247 = vector.broadcast %246 : vector<1x384xi32> to vector<512x384xi32>
    %248 = arith.cmpi eq, %136, %247 : vector<512x384xi32>
    %249 = arith.extui %248 : vector<512x384xi1> to vector<512x384xi32>
    %250 = arith.sitofp %249 : vector<512x384xi32> to vector<512x384xf32>
    %cst_32 = arith.constant dense<0.000000e+00> : vector<4x384xf32>
    %251 = tpu.matmul %7, %250, %cst_32 {dimension_numbers = #tpu.dot_dimension_numbers<[1], [0], [0], [1], [0, 0, 1, 1], [], []>} : vector<4x512xf32>, vector<512x384xf32>, vector<4x384xf32> -> vector<4x384xf32>
    %252 = vector.extract_strided_slice %251 {offsets = [3, 0], sizes = [1, 384], strides = [1, 1]} : vector<4x384xf32> to vector<1x384xf32>
    %cst_33 = arith.constant 1.000000e+00 : f32
    %253 = vector.broadcast %cst_33 : f32 to vector<1x384xf32>
    %254 = arith.subf %253, %252 : vector<1x384xf32>
    %255 = vector.extract_strided_slice %75 {offsets = [4, 0], sizes = [1, 384], strides = [1, 1]} : vector<6x384xf32> to vector<1x384xf32>
    %256 = vector.extract_strided_slice %251 {offsets = [0, 0], sizes = [1, 384], strides = [1, 1]} : vector<4x384xf32> to vector<1x384xf32>
    %257 = arith.subf %255, %256 : vector<1x384xf32>
    %258 = arith.mulf %257, %254 : vector<1x384xf32>
    %259 = vector.extract_strided_slice %88 {offsets = [4, 0], sizes = [1, 384], strides = [1, 1]} : vector<6x384xf32> to vector<1x384xf32>
    %260 = vector.extract_strided_slice %251 {offsets = [1, 0], sizes = [1, 384], strides = [1, 1]} : vector<4x384xf32> to vector<1x384xf32>
    %261 = arith.subf %259, %260 : vector<1x384xf32>
    %262 = arith.mulf %261, %254 : vector<1x384xf32>
    %263 = vector.extract_strided_slice %101 {offsets = [4, 0], sizes = [1, 384], strides = [1, 1]} : vector<6x384xf32> to vector<1x384xf32>
    %264 = vector.extract_strided_slice %251 {offsets = [2, 0], sizes = [1, 384], strides = [1, 1]} : vector<4x384xf32> to vector<1x384xf32>
    %265 = arith.subf %263, %264 : vector<1x384xf32>
    %266 = arith.mulf %265, %254 : vector<1x384xf32>
    %267 = arith.mulf %258, %258 : vector<1x384xf32>
    %268 = arith.mulf %262, %262 : vector<1x384xf32>
    %269 = arith.addf %267, %268 : vector<1x384xf32>
    %270 = arith.mulf %266, %266 : vector<1x384xf32>
    %271 = arith.addf %269, %270 : vector<1x384xf32>
    %272 = arith.addf %245, %271 : vector<1x384xf32>
    %273 = vector.extract_strided_slice %135 {offsets = [5, 0], sizes = [1, 384], strides = [1, 1]} : vector<6x384xi32> to vector<1x384xi32>
    %274 = vector.broadcast %273 : vector<1x384xi32> to vector<512x384xi32>
    %275 = arith.cmpi eq, %136, %274 : vector<512x384xi32>
    %276 = arith.extui %275 : vector<512x384xi1> to vector<512x384xi32>
    %277 = arith.sitofp %276 : vector<512x384xi32> to vector<512x384xf32>
    %cst_34 = arith.constant dense<0.000000e+00> : vector<4x384xf32>
    %278 = tpu.matmul %7, %277, %cst_34 {dimension_numbers = #tpu.dot_dimension_numbers<[1], [0], [0], [1], [0, 0, 1, 1], [], []>} : vector<4x512xf32>, vector<512x384xf32>, vector<4x384xf32> -> vector<4x384xf32>
    %279 = vector.extract_strided_slice %278 {offsets = [3, 0], sizes = [1, 384], strides = [1, 1]} : vector<4x384xf32> to vector<1x384xf32>
    %cst_35 = arith.constant 1.000000e+00 : f32
    %280 = vector.broadcast %cst_35 : f32 to vector<1x384xf32>
    %281 = arith.subf %280, %279 : vector<1x384xf32>
    %282 = vector.extract_strided_slice %75 {offsets = [5, 0], sizes = [1, 384], strides = [1, 1]} : vector<6x384xf32> to vector<1x384xf32>
    %283 = vector.extract_strided_slice %278 {offsets = [0, 0], sizes = [1, 384], strides = [1, 1]} : vector<4x384xf32> to vector<1x384xf32>
    %284 = arith.subf %282, %283 : vector<1x384xf32>
    %285 = arith.mulf %284, %281 : vector<1x384xf32>
    %286 = vector.extract_strided_slice %88 {offsets = [5, 0], sizes = [1, 384], strides = [1, 1]} : vector<6x384xf32> to vector<1x384xf32>
    %287 = vector.extract_strided_slice %278 {offsets = [1, 0], sizes = [1, 384], strides = [1, 1]} : vector<4x384xf32> to vector<1x384xf32>
    %288 = arith.subf %286, %287 : vector<1x384xf32>
    %289 = arith.mulf %288, %281 : vector<1x384xf32>
    %290 = vector.extract_strided_slice %101 {offsets = [5, 0], sizes = [1, 384], strides = [1, 1]} : vector<6x384xf32> to vector<1x384xf32>
    %291 = vector.extract_strided_slice %278 {offsets = [2, 0], sizes = [1, 384], strides = [1, 1]} : vector<4x384xf32> to vector<1x384xf32>
    %292 = arith.subf %290, %291 : vector<1x384xf32>
    %293 = arith.mulf %292, %281 : vector<1x384xf32>
    %294 = arith.mulf %285, %285 : vector<1x384xf32>
    %295 = arith.mulf %289, %289 : vector<1x384xf32>
    %296 = arith.addf %294, %295 : vector<1x384xf32>
    %297 = arith.mulf %293, %293 : vector<1x384xf32>
    %298 = arith.addf %296, %297 : vector<1x384xf32>
    %299 = arith.addf %272, %298 : vector<1x384xf32>
    %cst_36 = arith.constant 0.000000e+00 : f32
    %300 = vector.broadcast %cst_36 : f32 to vector<1x1x1x1xf32>
    %301 = vector.shape_cast %299 : vector<1x384xf32> to vector<1x1x384xf32>
    %cst_37 = arith.constant dense<0.000000e+00> : vector<1xf32>
    %302 = vector.multi_reduction <add>, %301, %cst_37 [1, 2] : vector<1x1x384xf32> to vector<1xf32>
    %303 = vector.shape_cast %302 : vector<1xf32> to vector<1x1x1xf32>
    %304 = vector.extract %303[0, 0, 0] : f32 from vector<1x1x1xf32>
    %305 = vector.broadcast %304 : f32 to vector<1x1x1x1xf32>
    %306 = arith.addf %300, %305 : vector<1x1x1x1xf32>
    %c0_38 = arith.constant 0 : index
    %c0_39 = arith.constant 0 : index
    %c0_40 = arith.constant 0 : index
    %c0_41 = arith.constant 0 : index
    %307 = vector.load %arg6[%c0_38, %c0_39, %c0_40, %c0_41] : memref<1x1x1x1xf32, #tpu.memory_space<vmem>>, vector<1x1x1x1xf32>
    tpu.vector_store %arg6[%c0_38, %c0_39, %c0_40, %c0_41], %306 {strides = array<i32>} : memref<1x1x1x1xf32, #tpu.memory_space<vmem>>, vector<1x1x1x1xf32>,
    return
  }
  func.func @transform_0(%arg0: i32, %arg1: i32) -> (i32, i32, i32) {
    %c0_i32 = arith.constant 0 : i32
    %c0_i32_0 = arith.constant 0 : i32
    return %arg0, %c0_i32, %arg1 : i32, i32, i32
  }
  func.func @transform_1(%arg0: i32, %arg1: i32) -> (i32, i32, i32) {
    %c0_i32 = arith.constant 0 : i32
    %c0_i32_0 = arith.constant 0 : i32
    %c0_i32_1 = arith.constant 0 : i32
    return %arg0, %c0_i32, %c0_i32_0 : i32, i32, i32
  }
  func.func @transform_2(%arg0: i32, %arg1: i32) -> (i32, i32, i32) {
    %c0_i32 = arith.constant 0 : i32
    %c0_i32_0 = arith.constant 0 : i32
    %c0_i32_1 = arith.constant 0 : i32
    return %arg0, %c0_i32, %c0_i32_0 : i32, i32, i32
  }
  func.func @transform_3(%arg0: i32, %arg1: i32) -> (i32, i32, i32) {
    %c0_i32 = arith.constant 0 : i32
    %c0_i32_0 = arith.constant 0 : i32
    %c0_i32_1 = arith.constant 0 : i32
    return %arg0, %c0_i32, %c0_i32_0 : i32, i32, i32
  }
  func.func @transform_4(%arg0: i32, %arg1: i32) -> (i32, i32, i32, i32) {
    %c0_i32 = arith.constant 0 : i32
    %c0_i32_0 = arith.constant 0 : i32
    %c0_i32_1 = arith.constant 0 : i32
    return %arg0, %arg1, %c0_i32, %c0_i32_0 : i32, i32, i32, i32
  }
}

</mosaic_0001>

<bundles_post_ra>
// kernel: tpu_custom_call.1
= control target key start
LH: loop header
LB: loop body
LE: loop exit
PB: predicated region body
PF: predicated region fallthrough
CT: control target
= control target key end

     0   :  { %s10483_s15 = smov 0   ;;  %s10485_s16 = smov 0   ;;  %s14217_s0 = inlined_call_operand.vmem [shape: f32[2,3,384], index: 0, kind: input, shape index: {}]   ;;  %s14218_s1 = inlined_call_operand.vmem [shape: f32[2,3,1], index: 1, kind: input, shape index: {}]   ;;  %s14219_s2 = inlined_call_operand.vmem [shape: f32[2,6,4], index: 2, kind: input, shape index: {}]   ;;  %s14220_s3 = inlined_call_operand.vmem [shape: f32[2,4,512], index: 3, kind: input, shape index: {}]   ;;  %s14221_s4 = inlined_call_operand.vmem [shape: f32[2,1,1,1], index: 4, kind: output, shape index: {}]  }
   0x1   :  { %s10487_s17 = smov 0  }
   0x2 LB: > { %s26_s18 = sadd.s32 1, %s10446_s16  ;;  %p6455_p0 = scmp.ge.s32.totalorder %s10450_s17, 1  ;;  %s10450_s17 = sphi %s10487_s17, %s14_s17   ;;  %s10446_s16 = sphi %s10485_s16, %s14536_s16   ;;  %s10442_s15 = sphi %s10483_s15, %s14535_s15  }
   0x3   : > { %p28_p1 = scmp.ge.s32.totalorder %s26_s18, 2  ;;  %p211_p2 = scmp.lt.s32.totalorder %s10450_s17, 3 }
   0x5   : > { %s14538_s18 = smov (%p28_p1, %s26_s18), 0  ;;  %p212_p3 = pnand %p6455_p0, %p211_p2 }
   0x7   : > { %215 = sbr.rel (%p212_p3) target bundleno = 1245 (0x4dd), region = 36 }
   0xe   : > { %p256_p4 = scmp.lt.s32.totalorder %s10442_s15, 1  ;;  %v10452_v0 = vmov 2   ;;  %v10453_v1 = vmov 0   ;;  %v10454_v4 = vmov 3   ;;  %v10455_v5 = vmov 1  }
   0xf   : > { %10414 = vset.pattern.permute.xlu1 %v10452_v0  ;;  %10412 = vset.pattern.permute.xlu0 %v10453_v1  ;;  %v10456_v8 = vmov 839922192   ;;  %v297_v10 = vlaneseq }
  0x10   : > { %s14540_s15 = smov (!%p256_p4, %s10442_s15), 1  ;;  %v295_v9 = vunpack.c.l.s4 %v10456_v8 }
  0x11   : > { %s6458_s19 = sshll.u32 %s14540_s15, 3  ;;  %s6457_s23 = sshll.u32 %s14540_s15, 2  ;;  %v10526_v12 = vshrl.u32 %v297_v10, 7 }
  0x12   : > { %s272_s22 = scalar_lea.vmem %s14219_s2, %s6458_s19  ;;  %s268_s26 = scalar_lea.vmem %s14218_s1, %s6457_s23  ;;  %v296_v11 = vunpack.c.0.s8 %v295_v9 }
  0x13   : > { %v287_v2 = vld [vmem:[%s272_s22] sm:$0x3f]  ;;  %s8776_s27 = sshll.u32 %s14540_s15, 4  ;;  %14366 = vst [vmem:[#allocation2_spill] sm:$0xff] %v10526_v12  ;;  %s10361_s5 = smul.u32 12, %s14540_s15  ;;  %v10536_v18 = vsub.s32 0, %v10526_v12 }
  0x14   : > { %345 = vperm.xlu1 %10414, %v287_v2   ;;  %v286_v3 = vld [vmem:[%s268_s26] sm:$0x7]  ;;  %s10515_s30 = scalar_lea.vmem %s14220_s3, %s8776_s27  ;;  %v299_v13 = vsub.s32 %v296_v11, %v10526_v12  ;;  %v10539_v19 = vsub.s32 4, %v10526_v12  ;;  %v10542_v20 = vsub.s32 1, %v10526_v12  ;;  %v10545_v22 = vsub.s32 5, %v10526_v12  ;;  %s283_s11 = scalar_lea.vmem %s14221_s4, %s14540_s15 }
  0x15   : > { %292 = vperm.xlu0 %10412, %v286_v3   ;;  %v10518_v6 = vld [vmem:[%s10515_s30] sm:$0xff]  ;;  %s263_s8 = scalar_lea.vmem %s14217_s0, %s10361_s5  ;;  %v10548_v23 = vsub.s32 2, %v10526_v12  ;;  %v391_v24 = vsub.s32 6, %v10526_v12 }
  0x16   : > { %v10522_v7 = vcombine.high %v10518_v6, %v10518_v6  ;;  %v284_v16 = vld [vmem:[%s263_s8] sm:$0x77]  ;;  %v285_v17 = vld [vmem:[%s263_s8 + $0x8] sm:$0x7] }
  0x18   : > { %10415 = vset.pattern.permute.xlu1 %v10454_v4  ;;  %1467 = vmatprep.mubr.f32.mxu1 %v10522_v7 }
  0x19   : > { %382 = vperm.xlu1 %10415, %v287_v2   ;;  %10413 = vset.pattern.permute.xlu0 %v10455_v5 }
  0x1a   : > { %306 = vperm.xlu0 %10413, %v287_v2   ;;  %1325 = vmatprep.mubr.f32.mxu0 %v10522_v7 }
  0x1d   : > { %10416 = vset.pattern.permute.xlu1 %v10453_v1 }
  0x1e   : > { %419 = vperm.xlu1 %10416, %v287_v2   ;;  %10417 = vset.pattern.permute.xlu0 %v10453_v1 }
  0x93   : > { %v10533_v14 = vpop.permute.xlu1 %345 }
  0x94   : > { %v293_v15 = vpop.permute.xlu0 %292 }
  0x95   : > { %v300_v21 = vrot.slane %v293_v15, %v299_v13 }
  0x97   : > { %v302_v25 = vsub.f32 %v284_v16, %v300_v21  ;;  %v303_v26 = vsub.f32 %v285_v17, %v300_v21 }
  0x98   : > { %v10551_v27 = vpop.permute.xlu1 %382 }
  0x99   : > { %v314_v28 = vrot.slane %v302_v25, %v10536_v18  ;;  %v318_v29 = vrot.slane %v302_v25, %v10539_v19  ;;  %v322_v30 = vrot.slane %v303_v26, %v10536_v18  ;;  %v351_v31 = vrot.slane %v302_v25, %v10542_v20  ;;  %v10560_v36 = vpop.permute.xlu0 %306 }
  0x9a   : > { %v355_v32 = vrot.slane %v302_v25, %v10545_v22  ;;  %v359_v33 = vrot.slane %v303_v26, %v10542_v20  ;;  %v388_v34 = vrot.slane %v302_v25, %v10548_v23  ;;  %v392_v35 = vrot.slane %v302_v25, %v391_v24 }
  0x9b   : > { %v10563_v37 = vrot.slane %v314_v28, %v10536_v18  ;;  %v10566_v38 = vrot.slane %v318_v29, %v10536_v18  ;;  %v10569_v39 = vrot.slane %v322_v30, %v10536_v18  ;;  %v366_v40 = vrot.slane %v351_v31, %v10542_v20 }
  0x9c   : > { %v370_v41 = vrot.slane %v355_v32, %v10542_v20  ;;  %v374_v42 = vrot.slane %v359_v33, %v10542_v20  ;;  %v396_v43 = vrot.slane %v303_v26, %v10548_v23  ;;  %v403_v44 = vrot.slane %v388_v34, %v10548_v23 }
  0x9d   : > { %v407_v45 = vrot.slane %v392_v35, %v10548_v23  ;;  %v375_v46 = vmul.f32 %v366_v40, %v10533_v14  ;;  %v338_v47 = vmul.f32 %v10563_v37, %v10560_v36  ;;  %v339_v48 = vmul.f32 %v10566_v38, %v10560_v36  ;;  %v10582_v49 = vpop.permute.xlu1 %419 }
  0x9e   : > { %v411_v50 = vrot.slane %v396_v43, %v10548_v23  ;;  %v376_v51 = vmul.f32 %v370_v41, %v10533_v14  ;;  %v377_v52 = vmul.f32 %v374_v42, %v10533_v14  ;;  %v412_v53 = vmul.f32 %v403_v44, %v10551_v27 }
  0x9f   : > { %v413_v54 = vmul.f32 %v407_v45, %v10551_v27  ;;  %v340_v55 = vmul.f32 %v10569_v39, %v10560_v36  ;;  %v341_v56 = vsub.f32 0.0, %v338_v47  ;;  %v342_v57 = vsub.f32 0.0, %v339_v48 }
  0xa0   : > { %v414_v58 = vmul.f32 %v411_v50, %v10551_v27  ;;  %v422_v59 = vmul.f32 %v10582_v49, %v10563_v37  ;;  %v423_v60 = vmul.f32 %v10582_v49, %v10566_v38  ;;  %v424_v61 = vmul.f32 %v10582_v49, %v10569_v39 }
  0xa1   : > { %v343_v62 = vsub.f32 0.0, %v340_v55  ;;  %v378_v63 = vsub.f32 %v341_v56, %v375_v46  ;;  %v379_v0 = vsub.f32 %v342_v57, %v376_v51  ;;  %v425_v1 = vmul.f32 %v403_v44, %v10533_v14 }
  0xa2   : > { %v426_v2 = vmul.f32 %v407_v45, %v10533_v14  ;;  %v427_v3 = vmul.f32 %v411_v50, %v10533_v14  ;;  %v431_v4 = vmul.f32 %v10551_v27, %v366_v40  ;;  %v432_v5 = vmul.f32 %v10551_v27, %v370_v41 }
  0xa3   : > { %v380_v8 = vsub.f32 %v343_v62, %v377_v52  ;;  %v415_v9 = vsub.f32 %v378_v63, %v412_v53  ;;  %v416_v10 = vsub.f32 %v379_v0, %v413_v54  ;;  %v428_v11 = vadd.f32 %v425_v1, %v422_v59 }
  0xa4   : > { %v429_v13 = vadd.f32 %v426_v2, %v423_v60  ;;  %v430_v15 = vadd.f32 %v427_v3, %v424_v61  ;;  %v433_v16 = vmul.f32 %v10551_v27, %v374_v42  ;;  %v437_v17 = vmul.f32 %v10582_v49, %v366_v40 }
  0xa5   : > { %v417_v21 = vsub.f32 %v380_v8, %v414_v58  ;;  %v10605_v24 = vsub.f32 %v428_v11, %v431_v4  ;;  %v438_v25 = vmul.f32 %v10582_v49, %v370_v41  ;;  %v439_v26 = vmul.f32 %v10582_v49, %v374_v42 }
  0xa6   : > { %v10609_v28 = vsub.f32 %v429_v13, %v432_v5  ;;  %v10611_v29 = vsub.f32 %v430_v15, %v433_v16  ;;  %v440_v30 = vmul.f32 %v403_v44, %v10560_v36  ;;  %v441_v31 = vmul.f32 %v407_v45, %v10560_v36 }
  0xa7   : > { %v442_v32 = vmul.f32 %v411_v50, %v10560_v36  ;;  %v446_v33 = vmul.f32 %v10551_v27, %v10563_v37  ;;  %v447_v34 = vmul.f32 %v10551_v27, %v10566_v38  ;;  %v448_v35 = vmul.f32 %v10551_v27, %v10569_v39 }
  0xa8   : > { %v443_v43 = vsub.f32 %v437_v17, %v440_v30  ;;  %v444_v46 = vsub.f32 %v438_v25, %v441_v31  ;;  %v452_v47 = vmul.f32 %v10582_v49, %v403_v44  ;;  %v453_v48 = vmul.f32 %v10582_v49, %v407_v45 }
  0xa9   : > { %v445_v51 = vsub.f32 %v439_v26, %v442_v32  ;;  %v454_v52 = vmul.f32 %v10582_v49, %v411_v50  ;;  %v455_v53 = vmul.f32 %v366_v40, %v10560_v36  ;;  %v456_v54 = vmul.f32 %v370_v41, %v10560_v36 }
  0xaa   : > { %v10627_v55 = vadd.f32 %v446_v33, %v443_v43  ;;  %v10629_v56 = vadd.f32 %v447_v34, %v444_v46  ;;  %v457_v57 = vmul.f32 %v374_v42, %v10560_v36  ;;  %v461_v58 = vmul.f32 %v10533_v14, %v10563_v37 }
  0xab   : > { %v10634_v59 = vadd.f32 %v448_v35, %v445_v51  ;;  %v458_v44 = vadd.f32 %v455_v53, %v452_v47  ;;  %v459_v45 = vadd.f32 %v456_v54, %v453_v48  ;;  %v462_v50 = vmul.f32 %v10533_v14, %v10566_v38 }
  0xac   : > { %v460_v60 = vadd.f32 %v457_v57, %v454_v52  ;;  %v463_v40 = vmul.f32 %v10533_v14, %v10569_v39  ;;  %v467_v41 = vsub.f32 0.0, %v415_v9  ;;  %v468_v61 = vsub.f32 0.0, %v416_v10 }
  0xad   : > { %v464_v62 = vsub.f32 %v458_v44, %v461_v58  ;;  %v465_v63 = vsub.f32 %v459_v45, %v462_v50  ;;  %v469_v0 = vsub.f32 0.0, %v417_v21  ;;  %v473_v42 = vmul.f32 %v10605_v24, %v10582_v49 }
  0xae   : > { %v466_v37 = vsub.f32 %v460_v60, %v463_v40  ;;  %v470_v1 = vmul.f32 %v467_v41, %v10560_v36  ;;  %v471_v2 = vmul.f32 %v468_v61, %v10560_v36  ;;  %v474_v38 = vmul.f32 %v10609_v28, %v10582_v49 }
  0xaf   : > { %v472_v3 = vmul.f32 %v469_v0, %v10560_v36  ;;  %v475_v39 = vmul.f32 %v10611_v29, %v10582_v49  ;;  %v479_v4 = vmul.f32 %v10627_v55, %v10551_v27  ;;  %v480_v5 = vmul.f32 %v10629_v56, %v10551_v27 }
  0xb0   : > { %v476_v8 = vadd.f32 %v473_v42, %v470_v1  ;;  %v477_v9 = vadd.f32 %v474_v38, %v471_v2  ;;  %v481_v10 = vmul.f32 %v10634_v59, %v10551_v27  ;;  %v485_v11 = vmul.f32 %v464_v62, %v10533_v14 }
  0xb1   : > { %v478_v13 = vadd.f32 %v475_v39, %v472_v3  ;;  %v486_v15 = vmul.f32 %v465_v63, %v10533_v14  ;;  %v487_v16 = vmul.f32 %v466_v37, %v10533_v14  ;;  %v491_v17 = vmul.f32 %v467_v41, %v10533_v14 }
  0xb2   : > { %v482_v21 = vsub.f32 %v476_v8, %v479_v4  ;;  %v483_v25 = vsub.f32 %v477_v9, %v480_v5  ;;  %v492_v26 = vmul.f32 %v468_v61, %v10533_v14  ;;  %v493_v30 = vmul.f32 %v469_v0, %v10533_v14 }
  0xb3   : > { %v484_v31 = vsub.f32 %v478_v13, %v481_v10  ;;  %v494_v32 = vmul.f32 %v10605_v24, %v10551_v27  ;;  %v495_v33 = vmul.f32 %v10609_v28, %v10551_v27  ;;  %v496_v34 = vmul.f32 %v10611_v29, %v10551_v27 }
  0xb4   : > { %v10667_v35 = vadd.f32 %v485_v11, %v482_v21  ;;  %v10669_v43 = vadd.f32 %v486_v15, %v483_v25  ;;  %v500_v46 = vmul.f32 %v10627_v55, %v10582_v49  ;;  %v501_v47 = vmul.f32 %v10629_v56, %v10582_v49 }
  0xb5   : > { %v10675_v48 = vadd.f32 %v487_v16, %v484_v31  ;;  %v497_v51 = vadd.f32 %v494_v32, %v491_v17  ;;  %v498_v52 = vadd.f32 %v495_v33, %v492_v26  ;;  %v499_v53 = vadd.f32 %v496_v34, %v493_v30 }
  0xb6   : > { %14367 = vst [vmem:[#allocation3_spill] sm:$0xff] %v10667_v35  ;;  %14368 = vst [vmem:[#allocation4_spill] sm:$0xff] %v10669_v43  ;;  %v502_v54 = vmul.f32 %v10634_v59, %v10582_v49  ;;  %v506_v57 = vmul.f32 %v464_v62, %v10560_v36  ;;  %v507_v58 = vmul.f32 %v465_v63, %v10560_v36  ;;  %v534_v13 = vadd.f32 0.5, %v10669_v43 }
  0xb7   : > { %14369 = vst [vmem:[#allocation5_spill] sm:$0xff] %v10675_v48  ;;  %v508_v44 = vmul.f32 %v466_v37, %v10560_v36  ;;  %v503_v45 = vadd.f32 %v500_v46, %v497_v51  ;;  %v504_v50 = vadd.f32 %v501_v47, %v498_v52  ;;  %v512_v60 = vmul.f32 %v467_v41, %v10551_v27 }
  0xb8   : > { %v513_v40 = vmul.f32 %v468_v61, %v10551_v27  ;;  %v505_v42 = vadd.f32 %v502_v54, %v499_v53  ;;  %v514_v1 = vmul.f32 %v469_v0, %v10551_v27  ;;  %v515_v2 = vmul.f32 %v10605_v24, %v10533_v14 }
  0xb9   : > { %v516_v38 = vmul.f32 %v10609_v28, %v10533_v14  ;;  %v10689_v3 = vsub.f32 %v503_v45, %v506_v57  ;;  %v10691_v39 = vsub.f32 %v504_v50, %v507_v58  ;;  %v517_v4 = vmul.f32 %v10611_v29, %v10533_v14 }
  0xba   : > { %v521_v41 = vmul.f32 %v10627_v55, %v10560_v36  ;;  %v10697_v61 = vsub.f32 %v505_v42, %v508_v44  ;;  %v518_v5 = vsub.f32 %v512_v60, %v515_v2  ;;  %v522_v24 = vmul.f32 %v10629_v56, %v10560_v36 }
  0xbb   : > { %14370 = vst [vmem:[#allocation6_spill] sm:$0xff] %v10689_v3  ;;  %14371 = vst [vmem:[#allocation7_spill] sm:$0xff] %v10691_v39  ;;  %v519_v27 = vsub.f32 %v513_v40, %v516_v38  ;;  %v520_v0 = vsub.f32 %v514_v1, %v517_v4  ;;  %v523_v28 = vmul.f32 %v10634_v59, %v10560_v36  ;;  %v533_v55 = vadd.f32 0.5, %v10667_v35 }
  0xbc   : > { %14372 = vst [vmem:[#allocation8_spill] sm:$0xff] %v10697_v61  ;;  %v527_v8 = vmul.f32 %v464_v62, %v10582_v49  ;;  %v528_v9 = vmul.f32 %v465_v63, %v10582_v49  ;;  %v524_v10 = vadd.f32 %v521_v41, %v518_v5  ;;  %v529_v29 = vmul.f32 %v466_v37, %v10582_v49 }
  0xbd   : > { %v525_v14 = vadd.f32 %v522_v24, %v519_v27  ;;  %v526_v11 = vadd.f32 %v523_v28, %v520_v0  ;;  %v535_v15 = vadd.f32 0.5, %v10675_v48  ;;  %v548_v56 = vadd.f32 0.5, %v10689_v3  ;;  %v11081_v3 = vld [vmem:[%s10515_s30 + $0x8] sm:$0xff] }
  0xbe   : > { %v10710_v16 = vadd.f32 %v527_v8, %v524_v10  ;;  %v536_v59 = vmul.f32 8.0, %v533_v55  ;;  %v549_v62 = vadd.f32 0.5, %v10691_v39  ;;  %v537_v17 = vmul.f32 8.0, %v534_v13 }
  0xbf   : > { %v10712_v36 = vadd.f32 %v528_v9, %v525_v14  ;;  %v10715_v63 = vadd.f32 %v529_v29, %v526_v11  ;;  %v538_v49 = vmul.f32 8.0, %v535_v15  ;;  %v550_v37 = vadd.f32 0.5, %v10697_v61 }
  0xc0   : > { %14373 = vst [vmem:[#allocation9_spill] sm:$0xff] %v10710_v16  ;;  %v6461_v21 = vadd.f32 -0.5, %v536_v59  ;;  %v551_v25 = vmul.f32 8.0, %v548_v56  ;;  %v552_v26 = vmul.f32 8.0, %v549_v62  ;;  %v563_v30 = vadd.f32 0.5, %v10710_v16 }
  0xc1   : > { %14374 = vst [vmem:[#allocation10_spill] sm:$0xff] %v10712_v36  ;;  %14375 = vst [vmem:[#allocation11_spill] sm:$0xff] %v10715_v63  ;;  %v6462_v31 = vadd.f32 -0.5, %v537_v17  ;;  %v6463_v32 = vadd.f32 -0.5, %v538_v49  ;;  %v553_v33 = vmul.f32 8.0, %v550_v37  ;;  %v564_v34 = vadd.f32 0.5, %v10712_v36 }
  0xc2   : > { %v542_v46 = vceil.f32 %v6461_v21  ;;  %v6464_v47 = vadd.f32 -0.5, %v551_v25  ;;  %v6465_v51 = vadd.f32 -0.5, %v552_v26  ;;  %v565_v52 = vadd.f32 0.5, %v10715_v63 }
  0xc3   : > { %v543_v53 = vceil.f32 %v6462_v31  ;;  %v544_v54 = vceil.f32 %v6463_v32  ;;  %v6466_v57 = vadd.f32 -0.5, %v553_v33  ;;  %v566_v58 = vmul.f32 8.0, %v563_v30 }
  0xc4   : > { %v10362_v44 = vtrunc.f32 %v542_v46  ;;  %v557_v45 = vceil.f32 %v6464_v47  ;;  %v558_v50 = vceil.f32 %v6465_v51  ;;  %v567_v60 = vmul.f32 8.0, %v564_v34 }
  0xc5   : > { %v10364_v40 = vtrunc.f32 %v543_v53  ;;  %v10366_v42 = vtrunc.f32 %v544_v54  ;;  %v559_v1 = vceil.f32 %v6466_v57  ;;  %v568_v2 = vmul.f32 8.0, %v565_v52 }
  0xc6   : > { %v10363_v38 = vcvt.f32.s32 %v10362_v44  ;;  %v10368_v4 = vtrunc.f32 %v557_v45  ;;  %v10370_v41 = vtrunc.f32 %v558_v50  ;;  %v6467_v5 = vadd.f32 -0.5, %v566_v58 }
  0xc7   : > { %v10365_v27 = vcvt.f32.s32 %v10364_v40  ;;  %v10367_v24 = vcvt.f32.s32 %v10366_v42  ;;  %v10372_v0 = vtrunc.f32 %v559_v1  ;;  %v6468_v28 = vadd.f32 -0.5, %v567_v60 }
  0xc8   : > { %v10369_v8 = vcvt.f32.s32 %v10368_v4  ;;  %v10371_v9 = vcvt.f32.s32 %v10370_v41  ;;  %v6469_v10 = vadd.f32 -0.5, %v568_v2  ;;  %v572_v14 = vceil.f32 %v6467_v5 }
  0xc9   : > { %v10373_v29 = vcvt.f32.s32 %v10372_v0  ;;  %v573_v55 = vceil.f32 %v6468_v28  ;;  %v578_v11 = vmul.u32 64, %v10363_v38  ;;  %v579_v13 = vmul.u32 64, %v10365_v27 }
  0xca   : > { %v574_v15 = vceil.f32 %v6469_v10  ;;  %v10374_v56 = vtrunc.f32 %v572_v14  ;;  %v580_v59 = vmul.u32 64, %v10367_v24  ;;  %v581_v62 = vmul.u32 8, %v10369_v8 }
  0xcb   : > { %v10376_v17 = vtrunc.f32 %v573_v55  ;;  %v582_v49 = vmul.u32 8, %v10371_v9  ;;  %v583_v37 = vmul.u32 8, %v10373_v29  ;;  %v10722_v46 = vsub.s32 3, %v10526_v12 }
  0xcc   : > { %v10375_v21 = vcvt.f32.s32 %v10374_v56  ;;  %v10378_v25 = vtrunc.f32 %v574_v15  ;;  %v584_v26 = vadd.s32 %v581_v62, %v578_v11  ;;  %v10725_v51 = vadd.s32 8, %v10526_v12 }
  0xcd   : > { %v10377_v30 = vcvt.f32.s32 %v10376_v17  ;;  %v585_v31 = vadd.s32 %v582_v49, %v579_v13  ;;  %v586_v32 = vadd.s32 %v583_v37, %v580_v59  ;;  %14376 = vst [vmem:[#allocation12_spill] sm:$0xff] %v10722_v46  ;;  %v10728_v53 = vadd.s32 128, %v10526_v12 }
  0xce   : > { %v10379_v33 = vcvt.f32.s32 %v10378_v25  ;;  %v587_v34 = vadd.s32 %v10375_v21, %v584_v26  ;;  %v10731_v57 = vadd.s32 136, %v10526_v12  ;;  %v10734_v58 = vadd.s32 16, %v10526_v12 }
  0xcf   : > { %v588_v47 = vadd.s32 %v10377_v30, %v585_v31  ;;  %14377 = vst [vmem:[#allocation13_spill] sm:$0xff] %v10728_v53  ;;  %v10737_v45 = vadd.s32 24, %v10526_v12  ;;  %v10742_v40 = vadd.s32 144, %v10526_v12  ;;  %v10840_v11 = vadd.s32 160, %v10526_v12 }
  0xd0   : > { %v589_v52 = vadd.s32 %v10379_v33, %v586_v32  ;;  %vm590_vm0 = vcmp.gt.s32.totalorder %v587_v34, 0  ;;  %14378 = vst [vmem:[#allocation14_spill] sm:$0xff] %v10731_v57  ;;  %v10843_v13 = vadd.s32 168, %v10526_v12  ;;  %v10864_v15 = vadd.s32 48, %v10526_v12 }
  0xd1   : > { %v591_v54 = vsel %vm590_vm0, %v587_v34, 0  ;;  %vm592_vm1 = vcmp.gt.s32.totalorder %v588_v47, 0  ;;  %14380 = vst [vmem:[#allocation16_spill] sm:$0xff] %v10742_v40  ;;  %v10867_v56 = vadd.s32 56, %v10526_v12  ;;  %v10875_v59 = vadd.s32 176, %v10526_v12 }
  0xd2   : > { %v593_v44 = vsel %vm592_vm1, %v588_v47, 0  ;;  %vm594_vm2 = vcmp.gt.s32.totalorder %v589_v52, 0  ;;  %vm596_vm3 = vcmp.lt.s32.totalorder %v591_v54, 511  ;;  %14394 = vst [vmem:[#allocation30_spill] sm:$0xff] %v10843_v13  ;;  %v10878_v62 = vadd.s32 184, %v10526_v12 }
  0xd3   : > { %v595_v50 = vsel %vm594_vm2, %v589_v52, 0  ;;  %v10739_v60 = vsel %vm596_vm3, %v591_v54, 511  ;;  %vm598_vm4 = vcmp.lt.s32.totalorder %v593_v44, 511  ;;  %v10902_v17 = vadd.s32 64, %v10526_v12 }
  0xd4   : > { %14379 = vst [vmem:[#allocation15_spill] sm:$0xff] %v10739_v60  ;;  %v10744_v42 = vsel %vm598_vm4, %v593_v44, 511  ;;  %vm600_vm5 = vcmp.lt.s32.totalorder %v595_v50, 511  ;;  %v10748_v1 = vrot.slane %v10739_v60, %v10536_v18  ;;  %v10752_v2 = vrot.slane %v10739_v60, %v10542_v20  ;;  %14395 = vst [vmem:[#allocation31_spill] sm:$0xff] %v10878_v62 }
  0xd5   : > { %14381 = vst [vmem:[#allocation17_spill] sm:$0xff] %v10744_v42  ;;  %v601_v38 = vsel %vm600_vm5, %v595_v50, 511  ;;  %v10756_v4 = vrot.slane %v10744_v42, %v10536_v18  ;;  %v10760_v41 = vrot.slane %v10744_v42, %v10542_v20  ;;  %v10764_v5 = vrot.slane %v10739_v60, %v10548_v23  ;;  %14396 = vst [vmem:[#allocation32_spill] sm:$0xff] %v10902_v17 }
  0xd6   : > { %v10767_v27 = vrot.slane %v601_v38, %v10536_v18  ;;  %v10770_v24 = vrot.slane %v601_v38, %v10542_v20  ;;  %v10774_v0 = vrot.slane %v10744_v42, %v10548_v23  ;;  %v10777_v28 = vrot.slane %v601_v38, %v10548_v23 }
  0xd7   : > { %14382 = vst [vmem:[#allocation18_spill] sm:$0xff] %v10764_v5  ;;  %v10780_v8 = vrot.slane %v601_v38, %v10722_v46  ;;  %v10784_v9 = vrot.slane %v10739_v60, %v10539_v19  ;;  %v10787_v18 = vadd.s32 152, %v10526_v12  ;;  %v10790_v20 = vadd.s32 32, %v10526_v12 }
  0xd8   : > { %14383 = vst [vmem:[#allocation19_spill] sm:$0xff] %v10770_v24  ;;  %14384 = vst [vmem:[#allocation20_spill] sm:$0xff] %v10774_v0  ;;  %v10794_v10 = vrot.slane %v10744_v42, %v10539_v19  ;;  %v10797_v23 = vrot.slane %v601_v38, %v10539_v19  ;;  %v10801_v14 = vrot.slane %v10739_v60, %v10545_v22  ;;  %v10457_v19 = vmov 1.0|1.0  }
  0xd9   : > { %14385 = vst [vmem:[#allocation21_spill] sm:$0xff] %v10777_v28  ;;  %14386 = vst [vmem:[#allocation22_spill] sm:$0xff] %v10780_v8  ;;  %v10805_v29 = vrot.slane %v10744_v42, %v10545_v22  ;;  %v10808_v55 = vrot.slane %v601_v38, %v10545_v22  ;;  %vm680_vm6 = vcmp.eq.s32.totalorder %v10526_v12, %v10756_v4  ;;  %v10832_v22 = vadd.s32 40, %v10526_v12 }
  0xda   : > { %14387 = vst [vmem:[#allocation23_spill] sm:$0xff] %v10784_v9  ;;  %14388 = vst [vmem:[#allocation24_spill] sm:$0xff] %v10787_v18  ;;  %vm683_vm7 = vcmp.eq.s32.totalorder %v10725_v51, %v10756_v4  ;;  %vm729_vm8 = vcmp.eq.s32.totalorder %v10728_v53, %v10767_v27  ;;  %vm732_vm10 = vcmp.eq.s32.totalorder %v10731_v57, %v10767_v27  ;;  %v10905_v49 = vadd.s32 72, %v10526_v12 }
  0xdb   : > { %14389 = vst [vmem:[#allocation25_spill] sm:$0xff] %v10794_v10  ;;  %14390 = vst [vmem:[#allocation26_spill] sm:$0xff] %v10797_v23  ;;  %vm679_vm11 = vcmp.eq.s32.totalorder %v10526_v12, %v10748_v1  ;;  %vm682_vm12 = vcmp.eq.s32.totalorder %v10725_v51, %v10748_v1  ;;  %vm681_vm13 = vcmp.eq.s32.totalorder %v10526_v12, %v10767_v27  ;;  %v10913_v37 = vadd.s32 192, %v10526_v12 }
  0xdc   : > { %14391 = vst [vmem:[#allocation27_spill] sm:$0xff] %v10801_v14  ;;  %14392 = vst [vmem:[#allocation28_spill] sm:$0xff] %v10805_v29  ;;  %vm684_vm15 = vcmp.eq.s32.totalorder %v10725_v51, %v10767_v27  ;;  %vm686_vm0 = vcmp.eq.s32.totalorder %v10734_v58, %v10756_v4  ;;  %vm689_vm1 = vcmp.eq.s32.totalorder %v10737_v45, %v10756_v4  ;;  %v10916_v21 = vadd.s32 200, %v10526_v12 }
  0xdd   : > { %14393 = vst [vmem:[#allocation29_spill] sm:$0xff] %v10808_v55  ;;  %vm9197_vm9 = vmpackc.low %vm683_vm7, %vm680_vm6  ;;  %vm735_vm3 = vcmp.eq.s32.totalorder %v10742_v40, %v10767_v27  ;;  %vm738_vm4 = vcmp.eq.s32.totalorder %v10787_v18, %v10767_v27  ;;  %vm685_vm6 = vcmp.eq.s32.totalorder %v10734_v58, %v10748_v1  ;;  %vm688_vm7 = vcmp.eq.s32.totalorder %v10737_v45, %v10748_v1 }
  0xde   : > { %9198 = vmatprep.subr.msk.bf16.mxu0 %vm9197_vm9, %v10457_v19  ;;  %vm9325_vm14 = vmpackc.low %vm732_vm10, %vm729_vm8  ;;  %vm687_vm9 = vcmp.eq.s32.totalorder %v10734_v58, %v10767_v27  ;;  %vm690_vm10 = vcmp.eq.s32.totalorder %v10737_v45, %v10767_v27  ;;  %14397 = vst [vmem:[#allocation33_spill] sm:$0xff] %v10913_v37  ;;  %v10940_v25 = vadd.s32 80, %v10526_v12  ;;  %v10943_v26 = vadd.s32 88, %v10526_v12 }
  0xdf   : > { %9326 = vmatprep.subr.msk.bf16.mxu1 %vm9325_vm14, %v10457_v19  ;;  %vm9199_vm2 = vmpackc.low %vm682_vm12, %vm679_vm11  ;;  %vm692_vm12 = vcmp.eq.s32.totalorder %v10790_v20, %v10756_v4  ;;  %14398 = vst [vmem:[#allocation34_spill] sm:$0xff] %v10916_v21  ;;  %v10951_v30 = vadd.s32 208, %v10526_v12  ;;  %v10954_v31 = vadd.s32 216, %v10526_v12  ;;  %v10978_v32 = vadd.s32 96, %v10526_v12 }
  0xe0   : > { %9200 = vmatpush1.bf16.msk.msra.mxu0 %vm9199_vm2, %v10457_v19  ;;  %vm9327_vm5 = vmpackc.low %vm684_vm15, %vm681_vm13  ;;  %vm695_vm13 = vcmp.eq.s32.totalorder %v10832_v22, %v10756_v4  ;;  %vm741_vm15 = vcmp.eq.s32.totalorder %v10840_v11, %v10767_v27  ;;  %vm691_vm2 = vcmp.eq.s32.totalorder %v10790_v20, %v10748_v1  ;;  %14399 = vst [vmem:[#allocation35_spill] sm:$0xff] %v10940_v25  ;;  %v10981_v33 = vadd.s32 104, %v10526_v12 }
  0xe1   : > { %9328 = vmatpush3.bf16.msk.msra.mxu1 %vm9327_vm5, %v10457_v19  ;;  %vm9201_vm8 = vmpackc.low %vm689_vm1, %vm686_vm0  ;;  %vm744_vm0 = vcmp.eq.s32.totalorder %v10843_v13, %v10767_v27  ;;  %vm693_vm5 = vcmp.eq.s32.totalorder %v10790_v20, %v10767_v27  ;;  %14400 = vst [vmem:[#allocation36_spill] sm:$0xff] %v10943_v26  ;;  %v10989_v34 = vadd.s32 224, %v10526_v12  ;;  %v10992_v47 = vadd.s32 232, %v10526_v12 }
  0xe2   : > { %9202 = vmatprep.subr.msk.bf16.mxu0 %vm9201_vm8, %v10457_v19  ;;  %vm9329_vm11 = vmpackc.low %vm738_vm4, %vm735_vm3  ;;  %vm694_vm3 = vcmp.eq.s32.totalorder %v10832_v22, %v10748_v1  ;;  %vm698_vm8 = vcmp.eq.s32.totalorder %v10864_v15, %v10756_v4  ;;  %14401 = vst [vmem:[#allocation37_spill] sm:$0xff] %v10951_v30  ;;  %v11016_v52 = vadd.s32 112, %v10526_v12  ;;  %v11019_v54 = vadd.s32 120, %v10526_v12 }
  0xe3   : > { %9330 = vmatprep.subr.msk.bf16.mxu1 %vm9329_vm11, %v10457_v19  ;;  %vm9203_vm14 = vmpackc.low %vm688_vm7, %vm685_vm6  ;;  %vm696_vm6 = vcmp.eq.s32.totalorder %v10832_v22, %v10767_v27  ;;  %vm747_vm11 = vcmp.eq.s32.totalorder %v10875_v59, %v10767_v27  ;;  %14402 = vst [vmem:[#allocation38_spill] sm:$0xff] %v10954_v31  ;;  %v11027_v44 = vadd.s32 240, %v10526_v12  ;;  %v11030_v50 = vadd.s32 248, %v10526_v12 }
  0xe4   : > { %9204 = vmatpush1.bf16.msk.msra.mxu0 %vm9203_vm14, %v10457_v19  ;;  %vm9331_vm1 = vmpackc.low %vm690_vm10, %vm687_vm9  ;;  %vm701_vm9 = vcmp.eq.s32.totalorder %v10867_v56, %v10756_v4  ;;  %vm697_vm14 = vcmp.eq.s32.totalorder %v10864_v15, %v10748_v1  ;;  %14403 = vst [vmem:[#allocation39_spill] sm:$0xff] %v10989_v34  ;;  %v11059_v38 = vadd.s32 384, %v10526_v12  ;;  %v11062_v36 = vadd.s32 392, %v10526_v12 }
  0xe5   : > { %9332 = vmatpush3.bf16.msk.msra.mxu1 %vm9331_vm1, %v10457_v19  ;;  %vm9205_vm4 = vmpackc.low %vm695_vm13, %vm692_vm12  ;;  %vm750_vm12 = vcmp.eq.s32.totalorder %v10878_v62, %v10767_v27  ;;  %vm699_vm1 = vcmp.eq.s32.totalorder %v10864_v15, %v10767_v27  ;;  %14404 = vst [vmem:[#allocation40_spill] sm:$0xff] %v10992_v47  ;;  %v11075_v16 = vadd.s32 256, %v10526_v12  ;;  %v11078_v39 = vadd.s32 264, %v10526_v12 }
  0xe6   : > { %9206 = vmatprep.subr.msk.bf16.mxu0 %vm9205_vm4, %v10457_v19  ;;  %vm9333_vm7 = vmpackc.low %vm744_vm0, %vm741_vm15  ;;  %vm700_vm15 = vcmp.eq.s32.totalorder %v10867_v56, %v10748_v1  ;;  %vm704_vm4 = vcmp.eq.s32.totalorder %v10902_v17, %v10756_v4  ;;  %14405 = vst [vmem:[#allocation41_spill] sm:$0xff] %v11059_v38  ;;  %v11100_v43 = vadd.s32 400, %v10526_v12  ;;  %v11103_v35 = vadd.s32 408, %v10526_v12 }
  0xe7   : > { %9334 = vmatprep.subr.msk.bf16.mxu1 %vm9333_vm7, %v10457_v19  ;;  %vm9207_vm10 = vmpackc.low %vm694_vm3, %vm691_vm2  ;;  %vm702_vm2 = vcmp.eq.s32.totalorder %v10867_v56, %v10767_v27  ;;  %vm753_vm7 = vcmp.eq.s32.totalorder %v10913_v37, %v10767_v27  ;;  %14406 = vst [vmem:[#allocation42_spill] sm:$0xff] %v11062_v36  ;;  %v11117_v63 = vadd.s32 272, %v10526_v12  ;;  %v11125_v61 = vadd.s32 280, %v10526_v12 }
  0xe8   : > { %9208 = vmatpush1.bf16.msk.msra.mxu0 %vm9207_vm10, %v10457_v19  ;;  %vm9335_vm13 = vmpackc.low %vm696_vm6, %vm693_vm5  ;;  %vm707_vm5 = vcmp.eq.s32.totalorder %v10905_v49, %v10756_v4  ;;  %vm703_vm10 = vcmp.eq.s32.totalorder %v10902_v17, %v10748_v1  ;;  %14407 = vst [vmem:[#allocation43_spill] sm:$0xff] %v11075_v16  ;;  %v11129_v48 = vcombine.high %v11081_v3, %v11081_v3  ;;  %v11148_v55 = vadd.s32 416, %v10526_v12 }
  0xe9   : > { %9336 = vmatpush3.bf16.msk.msra.mxu1 %vm9335_vm13, %v10457_v19  ;;  %vm9209_vm0 = vmpackc.low %vm701_vm9, %vm698_vm8  ;;  %vm756_vm8 = vcmp.eq.s32.totalorder %v10916_v21, %v10767_v27  ;;  %vm705_vm13 = vcmp.eq.s32.totalorder %v10902_v17, %v10767_v27  ;;  %14408 = vst [vmem:[#allocation44_spill] sm:$0xff] %v11100_v43  ;;  %v11151_v14 = vadd.s32 424, %v10526_v12  ;;  %v11174_v29 = vadd.s32 296, %v10526_v12 }
  0xea   : > { %9210 = vmatprep.subr.msk.bf16.mxu0 %vm9209_vm0, %v10457_v19  ;;  %vm9337_vm3 = vmpackc.low %vm750_vm12, %vm747_vm11  ;;  %vm706_vm11 = vcmp.eq.s32.totalorder %v10905_v49, %v10748_v1  ;;  %vm710_vm0 = vcmp.eq.s32.totalorder %v10940_v25, %v10756_v4  ;;  %14409 = vst [vmem:[#allocation45_spill] sm:$0xff] %v11103_v35  ;;  %v11194_v9 = vadd.s32 432, %v10526_v12  ;;  %v11197_v23 = vadd.s32 440, %v10526_v12 }
  0xeb   : > { %9338 = vmatprep.subr.msk.bf16.mxu1 %vm9337_vm3, %v10457_v19  ;;  %vm9211_vm6 = vmpackc.low %vm700_vm15, %vm697_vm14  ;;  %vm708_vm14 = vcmp.eq.s32.totalorder %v10905_v49, %v10767_v27  ;;  %vm759_vm3 = vcmp.eq.s32.totalorder %v10951_v30, %v10767_v27  ;;  %14410 = vst [vmem:[#allocation46_spill] sm:$0xff] %v11129_v48  ;;  %v11216_v10 = vadd.s32 304, %v10526_v12  ;;  %v11219_v8 = vadd.s32 312, %v10526_v12 }
  0xec   : > { %9212 = vmatpush1.bf16.msk.msra.mxu0 %vm9211_vm6, %v10457_v19  ;;  %vm9339_vm9 = vmpackc.low %vm702_vm2, %vm699_vm1  ;;  %vm713_vm1 = vcmp.eq.s32.totalorder %v10943_v26, %v10756_v4  ;;  %vm709_vm6 = vcmp.eq.s32.totalorder %v10940_v25, %v10748_v1  ;;  %14411 = vst [vmem:[#allocation47_spill] sm:$0xff] %v11148_v55  ;;  %v11235_v60 = vadd.s32 448, %v10526_v12  ;;  %v11238_v42 = vadd.s32 456, %v10526_v12 }
  0xed   : > { %9340 = vmatpush3.bf16.msk.msra.mxu1 %vm9339_vm9, %v10457_v19  ;;  %vm9213_vm12 = vmpackc.low %vm707_vm5, %vm704_vm4  ;;  %vm762_vm4 = vcmp.eq.s32.totalorder %v10954_v31, %v10767_v27  ;;  %vm711_vm9 = vcmp.eq.s32.totalorder %v10940_v25, %v10767_v27  ;;  %14412 = vst [vmem:[#allocation48_spill] sm:$0xff] %v11151_v14  ;;  %v11254_v46 = vadd.s32 320, %v10526_v12  ;;  %v11257_v5 = vadd.s32 328, %v10526_v12 }
  0xee   : > { %9214 = vmatprep.subr.msk.bf16.mxu0 %vm9213_vm12, %v10457_v19  ;;  %vm9341_vm15 = vmpackc.low %vm756_vm8, %vm753_vm7  ;;  %vm712_vm7 = vcmp.eq.s32.totalorder %v10943_v26, %v10748_v1  ;;  %vm716_vm12 = vcmp.eq.s32.totalorder %v10978_v32, %v10756_v4  ;;  %14413 = vst [vmem:[#allocation49_spill] sm:$0xff] %v11174_v29  ;;  %v11273_v28 = vadd.s32 464, %v10526_v12  ;;  %v11276_v0 = vadd.s32 472, %v10526_v12 }
  0xef   : > { %9342 = vmatprep.subr.msk.bf16.mxu1 %vm9341_vm15, %v10457_v19  ;;  %vm9215_vm2 = vmpackc.low %vm706_vm11, %vm703_vm10  ;;  %vm714_vm10 = vcmp.eq.s32.totalorder %v10943_v26, %v10767_v27  ;;  %vm765_vm15 = vcmp.eq.s32.totalorder %v10989_v34, %v10767_v27  ;;  %14414 = vst [vmem:[#allocation50_spill] sm:$0xff] %v11194_v9  ;;  %v11292_v24 = vadd.s32 336, %v10526_v12 }
  0xf0   : > { %9216 = vmatpush1.bf16.msk.msra.mxu0 %vm9215_vm2, %v10457_v19  ;;  %vm9343_vm5 = vmpackc.low %vm708_vm14, %vm705_vm13  ;;  %vm719_vm13 = vcmp.eq.s32.totalorder %v10981_v33, %v10756_v4  ;;  %vm715_vm2 = vcmp.eq.s32.totalorder %v10978_v32, %v10748_v1  ;;  %14415 = vst [vmem:[#allocation51_spill] sm:$0xff] %v11197_v23 }
  0xf1   : > { %9344 = vmatpush3.bf16.msk.msra.mxu1 %vm9343_vm5, %v10457_v19  ;;  %vm9217_vm8 = vmpackc.low %vm713_vm1, %vm710_vm0  ;;  %vm768_vm0 = vcmp.eq.s32.totalorder %v10992_v47, %v10767_v27  ;;  %vm717_vm5 = vcmp.eq.s32.totalorder %v10978_v32, %v10767_v27  ;;  %14416 = vst [vmem:[#allocation52_spill] sm:$0xff] %v11219_v8 }
  0xf2   : > { %9218 = vmatprep.subr.msk.bf16.mxu0 %vm9217_vm8, %v10457_v19  ;;  %vm9345_vm11 = vmpackc.low %vm762_vm4, %vm759_vm3  ;;  %vm718_vm3 = vcmp.eq.s32.totalorder %v10981_v33, %v10748_v1  ;;  %vm722_vm8 = vcmp.eq.s32.totalorder %v11016_v52, %v10756_v4  ;;  %14417 = vst [vmem:[#allocation53_spill] sm:$0xff] %v11235_v60 }
  0xf3   : > { %9346 = vmatprep.subr.msk.bf16.mxu1 %vm9345_vm11, %v10457_v19  ;;  %vm9219_vm14 = vmpackc.low %vm712_vm7, %vm709_vm6  ;;  %vm720_vm6 = vcmp.eq.s32.totalorder %v10981_v33, %v10767_v27  ;;  %vm771_vm11 = vcmp.eq.s32.totalorder %v11027_v44, %v10767_v27  ;;  %14418 = vst [vmem:[#allocation54_spill] sm:$0xff] %v11238_v42 }
  0xf4   : > { %9220 = vmatpush1.bf16.msk.msra.mxu0 %vm9219_vm14, %v10457_v19  ;;  %vm9347_vm1 = vmpackc.low %vm714_vm10, %vm711_vm9  ;;  %vm725_vm9 = vcmp.eq.s32.totalorder %v11019_v54, %v10756_v4  ;;  %vm721_vm14 = vcmp.eq.s32.totalorder %v11016_v52, %v10748_v1  ;;  %14419 = vst [vmem:[#allocation55_spill] sm:$0xff] %v11273_v28 }
  0xf5   : > { %9348 = vmatpush3.bf16.msk.msra.mxu1 %vm9347_vm1, %v10457_v19  ;;  %vm9221_vm4 = vmpackc.low %vm719_vm13, %vm716_vm12  ;;  %vm774_vm12 = vcmp.eq.s32.totalorder %v11030_v50, %v10767_v27  ;;  %vm723_vm1 = vcmp.eq.s32.totalorder %v11016_v52, %v10767_v27  ;;  %14420 = vst [vmem:[#allocation56_spill] sm:$0xff] %v11276_v0 }
  0xf6   : > { %9222 = vmatprep.subr.msk.bf16.mxu0 %vm9221_vm4, %v10457_v19  ;;  %vm9349_vm7 = vmpackc.low %vm768_vm0, %vm765_vm15  ;;  %vm724_vm15 = vcmp.eq.s32.totalorder %v11019_v54, %v10748_v1  ;;  %vm728_vm4 = vcmp.eq.s32.totalorder %v10728_v53, %v10756_v4  ;;  %14421 = vst [vmem:[#allocation57_spill] sm:$0xff] %v11292_v24 }
  0xf7   : > { %9350 = vmatprep.subr.msk.bf16.mxu1 %vm9349_vm7, %v10457_v19  ;;  %vm9223_vm10 = vmpackc.low %vm718_vm3, %vm715_vm2  ;;  %vm726_vm2 = vcmp.eq.s32.totalorder %v11019_v54, %v10767_v27  ;;  %vm825_vm7 = vcmp.eq.s32.totalorder %v11059_v38, %v10767_v27 }
  0xf8   : > { %9224 = vmatpush1.bf16.msk.msra.mxu0 %vm9223_vm10, %v10457_v19  ;;  %vm9351_vm13 = vmpackc.low %vm720_vm6, %vm717_vm5  ;;  %vm731_vm5 = vcmp.eq.s32.totalorder %v10731_v57, %v10756_v4  ;;  %vm727_vm10 = vcmp.eq.s32.totalorder %v10728_v53, %v10748_v1 }
  0xf9   : > { %9352 = vmatpush3.bf16.msk.msra.mxu1 %vm9351_vm13, %v10457_v19  ;;  %vm9225_vm0 = vmpackc.low %vm725_vm9, %vm722_vm8  ;;  %vm828_vm8 = vcmp.eq.s32.totalorder %v11062_v36, %v10767_v27  ;;  %vm777_vm13 = vcmp.eq.s32.totalorder %v11075_v16, %v10767_v27 }
  0xfa   : > { %9226 = vmatprep.subr.msk.bf16.mxu0 %vm9225_vm0, %v10457_v19  ;;  %vm9353_vm3 = vmpackc.low %vm774_vm12, %vm771_vm11  ;;  %vm730_vm11 = vcmp.eq.s32.totalorder %v10731_v57, %v10748_v1  ;;  %vm734_vm0 = vcmp.eq.s32.totalorder %v10742_v40, %v10756_v4 }
  0xfb   : > { %9354 = vmatprep.subr.msk.bf16.mxu1 %vm9353_vm3, %v10457_v19  ;;  %vm9227_vm6 = vmpackc.low %vm724_vm15, %vm721_vm14  ;;  %vm780_vm14 = vcmp.eq.s32.totalorder %v11078_v39, %v10767_v27  ;;  %vm831_vm3 = vcmp.eq.s32.totalorder %v11100_v43, %v10767_v27 }
  0xfc   : > { %9228 = vmatpush1.bf16.msk.msra.mxu0 %vm9227_vm6, %v10457_v19  ;;  %vm9355_vm9 = vmpackc.low %vm726_vm2, %vm723_vm1  ;;  %vm737_vm1 = vcmp.eq.s32.totalorder %v10787_v18, %v10756_v4  ;;  %vm733_vm6 = vcmp.eq.s32.totalorder %v10742_v40, %v10748_v1 }
  0xfd   : > { %9356 = vmatpush3.bf16.msk.msra.mxu1 %vm9355_vm9, %v10457_v19  ;;  %vm9229_vm12 = vmpackc.low %vm731_vm5, %vm728_vm4  ;;  %vm834_vm4 = vcmp.eq.s32.totalorder %v11103_v35, %v10767_v27  ;;  %vm783_vm9 = vcmp.eq.s32.totalorder %v11117_v63, %v10767_v27 }
  0xfe   : > { %9230 = vmatprep.subr.msk.bf16.mxu0 %vm9229_vm12, %v10457_v19  ;;  %vm9357_vm15 = vmpackc.low %vm828_vm8, %vm825_vm7  ;;  %vm736_vm7 = vcmp.eq.s32.totalorder %v10787_v18, %v10748_v1  ;;  %vm740_vm12 = vcmp.eq.s32.totalorder %v10840_v11, %v10756_v4 }
  0xff   : > { %9358 = vmatprep.subr.msk.bf16.mxu1 %vm9357_vm15, %v10457_v19  ;;  %vm9231_vm2 = vmpackc.low %vm730_vm11, %vm727_vm10  ;;  %vm786_vm10 = vcmp.eq.s32.totalorder %v11125_v61, %v10767_v27  ;;  %vm837_vm15 = vcmp.eq.s32.totalorder %v11148_v55, %v10767_v27 }
 0x100   : > { %9232 = vmatpush1.bf16.msk.msra.mxu0 %vm9231_vm2, %v10457_v19  ;;  %1468 = vmatmul.mubr.f32.vlgmr.msra.gmra.mrb[0].mxu1 %v10518_v6  ;;  %vm9359_vm5 = vmpackc.low %vm780_vm14, %vm777_vm13  ;;  %v11171_v6 = vadd.s32 288, %v10526_v12  ;;  %vm743_vm13 = vcmp.eq.s32.totalorder %v10843_v13, %v10756_v4  ;;  %vm739_vm2 = vcmp.eq.s32.totalorder %v10840_v11, %v10748_v1 }
 0x101   : > { %9360 = vmatpush3.bf16.msk.msra.mxu1 %vm9359_vm5, %v10457_v19  ;;  %vm9233_vm8 = vmpackc.low %vm737_vm1, %vm734_vm0  ;;  %1537 = vmatprep.mubr.f32.mxu1 %v11129_v48  ;;  %vm840_vm0 = vcmp.eq.s32.totalorder %v11151_v14, %v10767_v27 }
 0x102   : > { %9234 = vmatprep.subr.msk.bf16.mxu0 %vm9233_vm8, %v10457_v19  ;;  %vm9361_vm11 = vmpackc.low %vm834_vm4, %vm831_vm3  ;;  %vm742_vm3 = vcmp.eq.s32.totalorder %v10843_v13, %v10748_v1  ;;  %vm789_vm5 = vcmp.eq.s32.totalorder %v11171_v6, %v10767_v27  ;;  %vm746_vm8 = vcmp.eq.s32.totalorder %v10875_v59, %v10756_v4 }
 0x103   : > { %9362 = vmatprep.subr.msk.bf16.mxu1 %vm9361_vm11, %v10457_v19  ;;  %vm9235_vm14 = vmpackc.low %vm736_vm7, %vm733_vm6  ;;  %vm792_vm6 = vcmp.eq.s32.totalorder %v11174_v29, %v10767_v27  ;;  %vm843_vm11 = vcmp.eq.s32.totalorder %v11194_v9, %v10767_v27 }
 0x104   : > { %9236 = vmatpush1.bf16.msk.msra.mxu0 %vm9235_vm14, %v10457_v19  ;;  %vm9363_vm1 = vmpackc.low %vm786_vm10, %vm783_vm9  ;;  %vm749_vm9 = vcmp.eq.s32.totalorder %v10878_v62, %v10756_v4  ;;  %vm745_vm14 = vcmp.eq.s32.totalorder %v10875_v59, %v10748_v1 }
 0x105   : > { %9364 = vmatpush3.bf16.msk.msra.mxu1 %vm9363_vm1, %v10457_v19  ;;  %vm9237_vm4 = vmpackc.low %vm743_vm13, %vm740_vm12  ;;  %vm846_vm12 = vcmp.eq.s32.totalorder %v11197_v23, %v10767_v27  ;;  %vm795_vm1 = vcmp.eq.s32.totalorder %v11216_v10, %v10767_v27 }
 0x106   : > { %9238 = vmatprep.subr.msk.bf16.mxu0 %vm9237_vm4, %v10457_v19  ;;  %vm9365_vm7 = vmpackc.low %vm840_vm0, %vm837_vm15  ;;  %vm748_vm15 = vcmp.eq.s32.totalorder %v10878_v62, %v10748_v1  ;;  %vm752_vm4 = vcmp.eq.s32.totalorder %v10913_v37, %v10756_v4 }
 0x107   : > { %9366 = vmatprep.subr.msk.bf16.mxu1 %vm9365_vm7, %v10457_v19  ;;  %vm9239_vm10 = vmpackc.low %vm742_vm3, %vm739_vm2  ;;  %vm798_vm2 = vcmp.eq.s32.totalorder %v11219_v8, %v10767_v27  ;;  %vm849_vm7 = vcmp.eq.s32.totalorder %v11235_v60, %v10767_v27  ;;  %v11333_v60 = vadd.s32 360, %v10526_v12 }
 0x108   : > { %9240 = vmatpush1.bf16.msk.msra.mxu0 %vm9239_vm10, %v10457_v19  ;;  %vm9367_vm13 = vmpackc.low %vm792_vm6, %vm789_vm5  ;;  %vm755_vm5 = vcmp.eq.s32.totalorder %v10916_v21, %v10756_v4  ;;  %vm751_vm10 = vcmp.eq.s32.totalorder %v10913_v37, %v10748_v1  ;;  %v11314_v37 = vadd.s32 488, %v10526_v12 }
 0x109   : > { %9368 = vmatpush3.bf16.msk.msra.mxu1 %vm9367_vm13, %v10457_v19  ;;  %vm9241_vm0 = vmpackc.low %vm749_vm9, %vm746_vm8  ;;  %vm852_vm8 = vcmp.eq.s32.totalorder %v11238_v42, %v10767_v27  ;;  %vm801_vm13 = vcmp.eq.s32.totalorder %v11254_v46, %v10767_v27  ;;  %v11295_v42 = vadd.s32 344, %v10526_v12 }
 0x10a   : > { %9242 = vmatprep.subr.msk.bf16.mxu0 %vm9241_vm0, %v10457_v19  ;;  %vm9369_vm3 = vmpackc.low %vm846_vm12, %vm843_vm11  ;;  %vm754_vm11 = vcmp.eq.s32.totalorder %v10916_v21, %v10748_v1  ;;  %vm758_vm0 = vcmp.eq.s32.totalorder %v10951_v30, %v10756_v4  ;;  %v11311_v21 = vadd.s32 480, %v10526_v12  ;;  %14423 = vst [vmem:[#allocation59_spill] sm:$0xff] %v11314_v37 }
 0x10b   : > { %9370 = vmatprep.subr.msk.bf16.mxu1 %vm9369_vm3, %v10457_v19  ;;  %vm9243_vm6 = vmpackc.low %vm748_vm15, %vm745_vm14  ;;  %vm804_vm14 = vcmp.eq.s32.totalorder %v11257_v5, %v10767_v27  ;;  %14422 = vst [vmem:[#allocation58_spill] sm:$0xff] %v11295_v42  ;;  %vm855_vm3 = vcmp.eq.s32.totalorder %v11273_v28, %v10767_v27  ;;  %v11371_v28 = vadd.s32 376, %v10526_v12 }
 0x10c   : > { %9244 = vmatpush1.bf16.msk.msra.mxu0 %vm9243_vm6, %v10457_v19  ;;  %vm9371_vm9 = vmpackc.low %vm798_vm2, %vm795_vm1  ;;  %vm761_vm1 = vcmp.eq.s32.totalorder %v10954_v31, %v10756_v4  ;;  %vm757_vm6 = vcmp.eq.s32.totalorder %v10951_v30, %v10748_v1  ;;  %v11352_v30 = vadd.s32 504, %v10526_v12 }
 0x10d   : > { %9372 = vmatpush3.bf16.msk.msra.mxu1 %vm9371_vm9, %v10457_v19  ;;  %vm9245_vm12 = vmpackc.low %vm755_vm5, %vm752_vm4  ;;  %vm858_vm4 = vcmp.eq.s32.totalorder %v11276_v0, %v10767_v27  ;;  %vm807_vm9 = vcmp.eq.s32.totalorder %v11292_v24, %v10767_v27  ;;  %v11330_v0 = vadd.s32 352, %v10526_v12 }
 0x10e   : > { %9246 = vmatprep.subr.msk.bf16.mxu0 %vm9245_vm12, %v10457_v19  ;;  %vm9373_vm15 = vmpackc.low %vm852_vm8, %vm849_vm7  ;;  %vm760_vm7 = vcmp.eq.s32.totalorder %v10954_v31, %v10748_v1  ;;  %vm764_vm12 = vcmp.eq.s32.totalorder %v10989_v34, %v10756_v4  ;;  %v11349_v31 = vadd.s32 496, %v10526_v12 }
 0x10f   : > { %9374 = vmatprep.subr.msk.bf16.mxu1 %vm9373_vm15, %v10457_v19  ;;  %vm9247_vm2 = vmpackc.low %vm754_vm11, %vm751_vm10  ;;  %vm810_vm10 = vcmp.eq.s32.totalorder %v11295_v42, %v10767_v27  ;;  %vm861_vm15 = vcmp.eq.s32.totalorder %v11311_v21, %v10767_v27 }
 0x110   : > { %9248 = vmatpush1.bf16.msk.msra.mxu0 %vm9247_vm2, %v10457_v19  ;;  %vm9375_vm5 = vmpackc.low %vm804_vm14, %vm801_vm13  ;;  %vm767_vm13 = vcmp.eq.s32.totalorder %v10992_v47, %v10756_v4  ;;  %vm763_vm2 = vcmp.eq.s32.totalorder %v10989_v34, %v10748_v1 }
 0x111   : > { %9376 = vmatpush3.bf16.msk.msra.mxu1 %vm9375_vm5, %v10457_v19  ;;  %vm9249_vm8 = vmpackc.low %vm761_vm1, %vm758_vm0  ;;  %vm864_vm0 = vcmp.eq.s32.totalorder %v11314_v37, %v10767_v27  ;;  %vm813_vm5 = vcmp.eq.s32.totalorder %v11330_v0, %v10767_v27  ;;  %v11368_v37 = vadd.s32 368, %v10526_v12 }
 0x112   : > { %9250 = vmatprep.subr.msk.bf16.mxu0 %vm9249_vm8, %v10457_v19  ;;  %vm9377_vm11 = vmpackc.low %vm858_vm4, %vm855_vm3  ;;  %vm766_vm3 = vcmp.eq.s32.totalorder %v10992_v47, %v10748_v1  ;;  %vm770_vm8 = vcmp.eq.s32.totalorder %v11027_v44, %v10756_v4 }
 0x113   : > { %9378 = vmatprep.subr.msk.bf16.mxu1 %vm9377_vm11, %v10457_v19  ;;  %vm9251_vm14 = vmpackc.low %vm760_vm7, %vm757_vm6  ;;  %vm816_vm6 = vcmp.eq.s32.totalorder %v11333_v60, %v10767_v27  ;;  %vm867_vm11 = vcmp.eq.s32.totalorder %v11349_v31, %v10767_v27 }
 0x114   : > { %9252 = vmatpush1.bf16.msk.msra.mxu0 %vm9251_vm14, %v10457_v19  ;;  %vm9379_vm1 = vmpackc.low %vm810_vm10, %vm807_vm9  ;;  %vm773_vm9 = vcmp.eq.s32.totalorder %v11030_v50, %v10756_v4  ;;  %vm769_vm14 = vcmp.eq.s32.totalorder %v11027_v44, %v10748_v1 }
 0x115   : > { %9380 = vmatpush3.bf16.msk.msra.mxu1 %vm9379_vm1, %v10457_v19  ;;  %vm9253_vm4 = vmpackc.low %vm767_vm13, %vm764_vm12  ;;  %vm870_vm12 = vcmp.eq.s32.totalorder %v11352_v30, %v10767_v27  ;;  %vm819_vm1 = vcmp.eq.s32.totalorder %v11368_v37, %v10767_v27 }
 0x116   : > { %9254 = vmatprep.subr.msk.bf16.mxu0 %vm9253_vm4, %v10457_v19  ;;  %vm9381_vm7 = vmpackc.low %vm864_vm0, %vm861_vm15  ;;  %vm772_vm15 = vcmp.eq.s32.totalorder %v11030_v50, %v10748_v1  ;;  %vm776_vm4 = vcmp.eq.s32.totalorder %v11075_v16, %v10756_v4 }
 0x117   : > { %9382 = vmatprep.subr.msk.bf16.mxu1 %vm9381_vm7, %v10457_v19  ;;  %vm9255_vm10 = vmpackc.low %vm766_vm3, %vm763_vm2  ;;  %vm822_vm2 = vcmp.eq.s32.totalorder %v11371_v28, %v10767_v27  ;;  %vm1619_vm7 = vcmp.eq.s32.totalorder %v10526_v12, %v10760_v41  ;;  %v11423_v27 = vld [vmem:[%s10515_s30] sm:$0xff] }
 0x118   : > { %9256 = vmatpush1.bf16.msk.msra.mxu0 %vm9255_vm10, %v10457_v19  ;;  %vm9383_vm13 = vmpackc.low %vm816_vm6, %vm813_vm5  ;;  %vm779_vm5 = vcmp.eq.s32.totalorder %v11078_v39, %v10756_v4  ;;  %vm775_vm10 = vcmp.eq.s32.totalorder %v11075_v16, %v10748_v1 }
 0x119   : > { %9384 = vmatpush3.bf16.msk.msra.mxu1 %vm9383_vm13, %v10457_v19  ;;  %vm9257_vm0 = vmpackc.low %vm773_vm9, %vm770_vm8  ;;  %vm1622_vm8 = vcmp.eq.s32.totalorder %v10725_v51, %v10760_v41  ;;  %vm1618_vm13 = vcmp.eq.s32.totalorder %v10526_v12, %v10752_v2 }
 0x11a   : > { %9258 = vmatprep.subr.msk.bf16.mxu0 %vm9257_vm0, %v10457_v19  ;;  %vm9385_vm3 = vmpackc.low %vm870_vm12, %vm867_vm11  ;;  %vm778_vm11 = vcmp.eq.s32.totalorder %v11078_v39, %v10748_v1  ;;  %vm782_vm0 = vcmp.eq.s32.totalorder %v11117_v63, %v10756_v4 }
 0x11b   : > { %9386 = vmatprep.subr.msk.bf16.mxu1 %vm9385_vm3, %v10457_v19  ;;  %vm9259_vm6 = vmpackc.low %vm772_vm15, %vm769_vm14  ;;  %vm1621_vm14 = vcmp.eq.s32.totalorder %v10725_v51, %v10752_v2  ;;  %vm1625_vm3 = vcmp.eq.s32.totalorder %v10734_v58, %v10760_v41 }
 0x11c   : > { %9260 = vmatpush1.bf16.msk.msra.mxu0 %vm9259_vm6, %v10457_v19  ;;  %vm9387_vm9 = vmpackc.low %vm822_vm2, %vm819_vm1  ;;  %vm785_vm1 = vcmp.eq.s32.totalorder %v11125_v61, %v10756_v4  ;;  %vm781_vm6 = vcmp.eq.s32.totalorder %v11117_v63, %v10748_v1 }
 0x11d   : > { %9388 = vmatpush3.bf16.msk.msra.mxu1 %vm9387_vm9, %v10457_v19  ;;  %vm9261_vm12 = vmpackc.low %vm779_vm5, %vm776_vm4  ;;  %vm1628_vm4 = vcmp.eq.s32.totalorder %v10737_v45, %v10760_v41  ;;  %vm1624_vm9 = vcmp.eq.s32.totalorder %v10734_v58, %v10752_v2 }
 0x11e   : > { %9262 = vmatprep.subr.msk.bf16.mxu0 %vm9261_vm12, %v10457_v19  ;;  %vm9389_vm15 = vmpackc.low %vm1622_vm8, %vm1619_vm7  ;;  %vm784_vm7 = vcmp.eq.s32.totalorder %v11125_v61, %v10748_v1  ;;  %vm788_vm12 = vcmp.eq.s32.totalorder %v11171_v6, %v10756_v4 }
 0x11f   : > { %9390 = vmatprep.subr.msk.bf16.mxu1 %vm9389_vm15, %v10457_v19  ;;  %1326 = vmatmul.mubr.f32.vlgmr.msra.gmra.mrb[0].mxu0 %v11423_v27  ;;  %vm9263_vm2 = vmpackc.low %vm778_vm11, %vm775_vm10  ;;  %vm1627_vm10 = vcmp.eq.s32.totalorder %v10737_v45, %v10752_v2  ;;  %vm1631_vm15 = vcmp.eq.s32.totalorder %v10790_v20, %v10760_v41 }
 0x120   : > { %1538 = vmatmul.mubr.f32.vlgmr.msra.gmra.mrb[2].mxu1 %v11081_v3  ;;  %9264 = vmatpush1.bf16.msk.msra.mxu0 %vm9263_vm2, %v10457_v19  ;;  %vm9391_vm5 = vmpackc.low %vm1621_vm14, %vm1618_vm13  ;;  %vm791_vm13 = vcmp.eq.s32.totalorder %v11174_v29, %v10756_v4  ;;  %vm787_vm2 = vcmp.eq.s32.totalorder %v11171_v6, %v10748_v1 }
 0x121   : > { %9392 = vmatpush1.bf16.msk.msra.mxu1 %vm9391_vm5, %v10457_v19  ;;  %vm9265_vm8 = vmpackc.low %vm785_vm1, %vm782_vm0  ;;  %1396 = vmatprep.mubr.f32.mxu0 %v11129_v48  ;;  %vm1634_vm0 = vcmp.eq.s32.totalorder %v10832_v22, %v10760_v41  ;;  %vm1630_vm5 = vcmp.eq.s32.totalorder %v10790_v20, %v10752_v2 }
 0x122   : > { %9266 = vmatprep.subr.msk.bf16.mxu0 %vm9265_vm8, %v10457_v19  ;;  %vm9393_vm11 = vmpackc.low %vm1628_vm4, %vm1625_vm3  ;;  %2258 = vmatprep.mubr.f32.mxu1 %v10522_v7  ;;  %vm790_vm3 = vcmp.eq.s32.totalorder %v11174_v29, %v10748_v1  ;;  %vm794_vm8 = vcmp.eq.s32.totalorder %v11216_v10, %v10756_v4 }
 0x123   : > { %9394 = vmatprep.subr.msk.bf16.mxu1 %vm9393_vm11, %v10457_v19  ;;  %vm9267_vm14 = vmpackc.low %vm784_vm7, %vm781_vm6  ;;  %vm1633_vm6 = vcmp.eq.s32.totalorder %v10832_v22, %v10752_v2  ;;  %vm1637_vm11 = vcmp.eq.s32.totalorder %v10864_v15, %v10760_v41 }
 0x124   : > { %9268 = vmatpush1.bf16.msk.msra.mxu0 %vm9267_vm14, %v10457_v19  ;;  %vm9395_vm1 = vmpackc.low %vm1627_vm10, %vm1624_vm9  ;;  %vm797_vm9 = vcmp.eq.s32.totalorder %v11219_v8, %v10756_v4  ;;  %vm793_vm14 = vcmp.eq.s32.totalorder %v11216_v10, %v10748_v1 }
 0x125   : > { %9396 = vmatpush1.bf16.msk.msra.mxu1 %vm9395_vm1, %v10457_v19  ;;  %vm9269_vm4 = vmpackc.low %vm791_vm13, %vm788_vm12  ;;  %vm1640_vm12 = vcmp.eq.s32.totalorder %v10867_v56, %v10760_v41  ;;  %vm1636_vm1 = vcmp.eq.s32.totalorder %v10864_v15, %v10752_v2 }
 0x126   : > { %9270 = vmatprep.subr.msk.bf16.mxu0 %vm9269_vm4, %v10457_v19  ;;  %vm9397_vm7 = vmpackc.low %vm1634_vm0, %vm1631_vm15  ;;  %vm796_vm15 = vcmp.eq.s32.totalorder %v11219_v8, %v10748_v1  ;;  %vm800_vm4 = vcmp.eq.s32.totalorder %v11254_v46, %v10756_v4 }
 0x127   : > { %9398 = vmatprep.subr.msk.bf16.mxu1 %vm9397_vm7, %v10457_v19  ;;  %vm9271_vm10 = vmpackc.low %vm790_vm3, %vm787_vm2  ;;  %vm1639_vm2 = vcmp.eq.s32.totalorder %v10867_v56, %v10752_v2  ;;  %vm1643_vm7 = vcmp.eq.s32.totalorder %v10902_v17, %v10760_v41 }
 0x128   : > { %9272 = vmatpush1.bf16.msk.msra.mxu0 %vm9271_vm10, %v10457_v19  ;;  %vm9399_vm13 = vmpackc.low %vm1633_vm6, %vm1630_vm5  ;;  %vm803_vm5 = vcmp.eq.s32.totalorder %v11257_v5, %v10756_v4  ;;  %vm799_vm10 = vcmp.eq.s32.totalorder %v11254_v46, %v10748_v1 }
 0x129   : > { %9400 = vmatpush1.bf16.msk.msra.mxu1 %vm9399_vm13, %v10457_v19  ;;  %vm9273_vm0 = vmpackc.low %vm797_vm9, %vm794_vm8  ;;  %vm1646_vm8 = vcmp.eq.s32.totalorder %v10905_v49, %v10760_v41  ;;  %vm1642_vm13 = vcmp.eq.s32.totalorder %v10902_v17, %v10752_v2 }
 0x12a   : > { %9274 = vmatprep.subr.msk.bf16.mxu0 %vm9273_vm0, %v10457_v19  ;;  %vm9401_vm3 = vmpackc.low %vm1640_vm12, %vm1637_vm11  ;;  %vm802_vm11 = vcmp.eq.s32.totalorder %v11257_v5, %v10748_v1  ;;  %vm806_vm0 = vcmp.eq.s32.totalorder %v11292_v24, %v10756_v4 }
 0x12b   : > { %9402 = vmatprep.subr.msk.bf16.mxu1 %vm9401_vm3, %v10457_v19  ;;  %vm9275_vm6 = vmpackc.low %vm796_vm15, %vm793_vm14  ;;  %vm1645_vm14 = vcmp.eq.s32.totalorder %v10905_v49, %v10752_v2  ;;  %vm1649_vm3 = vcmp.eq.s32.totalorder %v10940_v25, %v10760_v41 }
 0x12c   : > { %9276 = vmatpush1.bf16.msk.msra.mxu0 %vm9275_vm6, %v10457_v19  ;;  %vm9403_vm9 = vmpackc.low %vm1639_vm2, %vm1636_vm1  ;;  %vm809_vm1 = vcmp.eq.s32.totalorder %v11295_v42, %v10756_v4  ;;  %vm805_vm6 = vcmp.eq.s32.totalorder %v11292_v24, %v10748_v1 }
 0x12d   : > { %9404 = vmatpush1.bf16.msk.msra.mxu1 %vm9403_vm9, %v10457_v19  ;;  %vm9277_vm12 = vmpackc.low %vm803_vm5, %vm800_vm4  ;;  %vm1652_vm4 = vcmp.eq.s32.totalorder %v10943_v26, %v10760_v41  ;;  %vm1648_vm9 = vcmp.eq.s32.totalorder %v10940_v25, %v10752_v2 }
 0x12e   : > { %9278 = vmatprep.subr.msk.bf16.mxu0 %vm9277_vm12, %v10457_v19  ;;  %vm9405_vm15 = vmpackc.low %vm1646_vm8, %vm1643_vm7  ;;  %vm808_vm7 = vcmp.eq.s32.totalorder %v11295_v42, %v10748_v1  ;;  %vm812_vm12 = vcmp.eq.s32.totalorder %v11330_v0, %v10756_v4 }
 0x12f   : > { %9406 = vmatprep.subr.msk.bf16.mxu1 %vm9405_vm15, %v10457_v19  ;;  %vm9279_vm2 = vmpackc.low %vm802_vm11, %vm799_vm10  ;;  %vm1651_vm10 = vcmp.eq.s32.totalorder %v10943_v26, %v10752_v2  ;;  %vm1655_vm15 = vcmp.eq.s32.totalorder %v10978_v32, %v10760_v41 }
 0x130   : > { %9280 = vmatpush1.bf16.msk.msra.mxu0 %vm9279_vm2, %v10457_v19  ;;  %vm9407_vm5 = vmpackc.low %vm1645_vm14, %vm1642_vm13  ;;  %vm815_vm13 = vcmp.eq.s32.totalorder %v11333_v60, %v10756_v4  ;;  %vm811_vm2 = vcmp.eq.s32.totalorder %v11330_v0, %v10748_v1 }
 0x131   : > { %9408 = vmatpush1.bf16.msk.msra.mxu1 %vm9407_vm5, %v10457_v19  ;;  %vm9281_vm8 = vmpackc.low %vm809_vm1, %vm806_vm0  ;;  %vm1658_vm0 = vcmp.eq.s32.totalorder %v10981_v33, %v10760_v41  ;;  %vm1654_vm5 = vcmp.eq.s32.totalorder %v10978_v32, %v10752_v2 }
 0x132   : > { %9282 = vmatprep.subr.msk.bf16.mxu0 %vm9281_vm8, %v10457_v19  ;;  %vm9409_vm11 = vmpackc.low %vm1652_vm4, %vm1649_vm3  ;;  %vm814_vm3 = vcmp.eq.s32.totalorder %v11333_v60, %v10748_v1  ;;  %vm818_vm8 = vcmp.eq.s32.totalorder %v11368_v37, %v10756_v4 }
 0x133   : > { %9410 = vmatprep.subr.msk.bf16.mxu1 %vm9409_vm11, %v10457_v19  ;;  %vm9283_vm14 = vmpackc.low %vm808_vm7, %vm805_vm6  ;;  %vm1657_vm6 = vcmp.eq.s32.totalorder %v10981_v33, %v10752_v2  ;;  %vm1661_vm11 = vcmp.eq.s32.totalorder %v11016_v52, %v10760_v41 }
 0x134   : > { %9284 = vmatpush1.bf16.msk.msra.mxu0 %vm9283_vm14, %v10457_v19  ;;  %vm9411_vm1 = vmpackc.low %vm1651_vm10, %vm1648_vm9  ;;  %vm821_vm9 = vcmp.eq.s32.totalorder %v11371_v28, %v10756_v4  ;;  %vm817_vm14 = vcmp.eq.s32.totalorder %v11368_v37, %v10748_v1 }
 0x135   : > { %9412 = vmatpush1.bf16.msk.msra.mxu1 %vm9411_vm1, %v10457_v19  ;;  %vm9285_vm4 = vmpackc.low %vm815_vm13, %vm812_vm12  ;;  %vm1664_vm12 = vcmp.eq.s32.totalorder %v11019_v54, %v10760_v41  ;;  %vm1660_vm1 = vcmp.eq.s32.totalorder %v11016_v52, %v10752_v2 }
 0x136   : > { %9286 = vmatprep.subr.msk.bf16.mxu0 %vm9285_vm4, %v10457_v19  ;;  %vm9413_vm7 = vmpackc.low %vm1658_vm0, %vm1655_vm15  ;;  %vm820_vm15 = vcmp.eq.s32.totalorder %v11371_v28, %v10748_v1  ;;  %vm824_vm4 = vcmp.eq.s32.totalorder %v11059_v38, %v10756_v4 }
 0x137   : > { %9414 = vmatprep.subr.msk.bf16.mxu1 %vm9413_vm7, %v10457_v19  ;;  %vm9287_vm10 = vmpackc.low %vm814_vm3, %vm811_vm2  ;;  %vm1663_vm2 = vcmp.eq.s32.totalorder %v11019_v54, %v10752_v2  ;;  %vm1667_vm7 = vcmp.eq.s32.totalorder %v10728_v53, %v10760_v41 }
 0x138   : > { %9288 = vmatpush1.bf16.msk.msra.mxu0 %vm9287_vm10, %v10457_v19  ;;  %vm9415_vm13 = vmpackc.low %vm1657_vm6, %vm1654_vm5  ;;  %vm827_vm5 = vcmp.eq.s32.totalorder %v11062_v36, %v10756_v4  ;;  %vm823_vm10 = vcmp.eq.s32.totalorder %v11059_v38, %v10748_v1 }
 0x139   : > { %9416 = vmatpush1.bf16.msk.msra.mxu1 %vm9415_vm13, %v10457_v19  ;;  %vm9289_vm0 = vmpackc.low %vm821_vm9, %vm818_vm8  ;;  %vm1670_vm8 = vcmp.eq.s32.totalorder %v10731_v57, %v10760_v41  ;;  %vm1666_vm13 = vcmp.eq.s32.totalorder %v10728_v53, %v10752_v2 }
 0x13a   : > { %9290 = vmatprep.subr.msk.bf16.mxu0 %vm9289_vm0, %v10457_v19  ;;  %vm9417_vm3 = vmpackc.low %vm1664_vm12, %vm1661_vm11  ;;  %vm826_vm11 = vcmp.eq.s32.totalorder %v11062_v36, %v10748_v1  ;;  %vm830_vm0 = vcmp.eq.s32.totalorder %v11100_v43, %v10756_v4 }
 0x13b   : > { %9418 = vmatprep.subr.msk.bf16.mxu1 %vm9417_vm3, %v10457_v19  ;;  %vm9291_vm6 = vmpackc.low %vm820_vm15, %vm817_vm14  ;;  %vm1669_vm14 = vcmp.eq.s32.totalorder %v10731_v57, %v10752_v2  ;;  %vm1673_vm3 = vcmp.eq.s32.totalorder %v10742_v40, %v10760_v41 }
 0x13c   : > { %9292 = vmatpush1.bf16.msk.msra.mxu0 %vm9291_vm6, %v10457_v19  ;;  %vm9419_vm9 = vmpackc.low %vm1663_vm2, %vm1660_vm1  ;;  %vm833_vm1 = vcmp.eq.s32.totalorder %v11103_v35, %v10756_v4  ;;  %vm829_vm6 = vcmp.eq.s32.totalorder %v11100_v43, %v10748_v1  ;;  %v14431_v43 = vld [vmem:[#allocation38_spill] sm:$0xff] }
 0x13d   : > { %9420 = vmatpush1.bf16.msk.msra.mxu1 %vm9419_vm9, %v10457_v19  ;;  %vm9293_vm12 = vmpackc.low %vm827_vm5, %vm824_vm4  ;;  %vm1676_vm4 = vcmp.eq.s32.totalorder %v10787_v18, %v10760_v41  ;;  %vm1672_vm9 = vcmp.eq.s32.totalorder %v10742_v40, %v10752_v2 }
 0x13e   : > { %9294 = vmatprep.subr.msk.bf16.mxu0 %vm9293_vm12, %v10457_v19  ;;  %vm9421_vm15 = vmpackc.low %vm1670_vm8, %vm1667_vm7  ;;  %vm832_vm7 = vcmp.eq.s32.totalorder %v11103_v35, %v10748_v1  ;;  %vm836_vm12 = vcmp.eq.s32.totalorder %v11148_v55, %v10756_v4  ;;  %v14428_v35 = vld [vmem:[#allocation55_spill] sm:$0xff] }
 0x13f   : > { %9422 = vmatprep.subr.msk.bf16.mxu1 %vm9421_vm15, %v10457_v19  ;;  %vm9295_vm2 = vmpackc.low %vm826_vm11, %vm823_vm10  ;;  %vm1675_vm10 = vcmp.eq.s32.totalorder %v10787_v18, %v10752_v2  ;;  %vm1679_vm15 = vcmp.eq.s32.totalorder %v10840_v11, %v10760_v41 }
 0x140   : > { %9296 = vmatpush1.bf16.msk.msra.mxu0 %vm9295_vm2, %v10457_v19  ;;  %vm9423_vm5 = vmpackc.low %vm1669_vm14, %vm1666_vm13  ;;  %vm839_vm13 = vcmp.eq.s32.totalorder %v11151_v14, %v10756_v4  ;;  %vm835_vm2 = vcmp.eq.s32.totalorder %v11148_v55, %v10748_v1  ;;  %v14427_v55 = vld [vmem:[#allocation34_spill] sm:$0xff] }
 0x141   : > { %9424 = vmatpush1.bf16.msk.msra.mxu1 %vm9423_vm5, %v10457_v19  ;;  %vm9297_vm8 = vmpackc.low %vm833_vm1, %vm830_vm0  ;;  %vm1682_vm0 = vcmp.eq.s32.totalorder %v10843_v13, %v10760_v41  ;;  %vm1678_vm5 = vcmp.eq.s32.totalorder %v10840_v11, %v10752_v2 }
 0x142   : > { %9298 = vmatprep.subr.msk.bf16.mxu0 %vm9297_vm8, %v10457_v19  ;;  %vm9425_vm11 = vmpackc.low %vm1676_vm4, %vm1673_vm3  ;;  %vm838_vm3 = vcmp.eq.s32.totalorder %v11151_v14, %v10748_v1  ;;  %vm842_vm8 = vcmp.eq.s32.totalorder %v11194_v9, %v10756_v4  ;;  %v14424_v14 = vld [vmem:[#allocation53_spill] sm:$0xff] }
 0x143   : > { %9426 = vmatprep.subr.msk.bf16.mxu1 %vm9425_vm11, %v10457_v19  ;;  %vm9299_vm14 = vmpackc.low %vm832_vm7, %vm829_vm6  ;;  %vm1681_vm6 = vcmp.eq.s32.totalorder %v10843_v13, %v10752_v2  ;;  %vm1685_vm11 = vcmp.eq.s32.totalorder %v10875_v59, %v10760_v41 }
 0x144   : > { %9300 = vmatpush1.bf16.msk.msra.mxu0 %vm9299_vm14, %v10457_v19  ;;  %vm9427_vm1 = vmpackc.low %vm1675_vm10, %vm1672_vm9  ;;  %vm845_vm9 = vcmp.eq.s32.totalorder %v11197_v23, %v10756_v4  ;;  %vm841_vm14 = vcmp.eq.s32.totalorder %v11194_v9, %v10748_v1  ;;  %v14425_v9 = vld [vmem:[#allocation54_spill] sm:$0xff] }
 0x145   : > { %9428 = vmatpush1.bf16.msk.msra.mxu1 %vm9427_vm1, %v10457_v19  ;;  %vm9301_vm4 = vmpackc.low %vm839_vm13, %vm836_vm12  ;;  %vm1688_vm12 = vcmp.eq.s32.totalorder %v10878_v62, %v10760_v41  ;;  %vm1684_vm1 = vcmp.eq.s32.totalorder %v10875_v59, %v10752_v2 }
 0x146   : > { %9302 = vmatprep.subr.msk.bf16.mxu0 %vm9301_vm4, %v10457_v19  ;;  %vm9429_vm7 = vmpackc.low %vm1682_vm0, %vm1679_vm15  ;;  %vm844_vm15 = vcmp.eq.s32.totalorder %v11197_v23, %v10748_v1  ;;  %vm848_vm4 = vcmp.eq.s32.totalorder %v14424_v14, %v10756_v4  ;;  %v14426_v23 = vld [vmem:[#allocation33_spill] sm:$0xff] }
 0x147   : > { %9430 = vmatprep.subr.msk.bf16.mxu1 %vm9429_vm7, %v10457_v19  ;;  %vm9303_vm10 = vmpackc.low %vm838_vm3, %vm835_vm2  ;;  %vm1687_vm2 = vcmp.eq.s32.totalorder %v10878_v62, %v10752_v2  ;;  %vm1691_vm7 = vcmp.eq.s32.totalorder %v14426_v23, %v10760_v41 }
 0x148   : > { %9304 = vmatpush1.bf16.msk.msra.mxu0 %vm9303_vm10, %v10457_v19  ;;  %vm9431_vm13 = vmpackc.low %vm1681_vm6, %vm1678_vm5  ;;  %vm851_vm5 = vcmp.eq.s32.totalorder %v14425_v9, %v10756_v4  ;;  %vm847_vm10 = vcmp.eq.s32.totalorder %v14424_v14, %v10748_v1  ;;  %v14429_v14 = vld [vmem:[#allocation56_spill] sm:$0xff] }
 0x149   : > { %9432 = vmatpush1.bf16.msk.msra.mxu1 %vm9431_vm13, %v10457_v19  ;;  %vm9305_vm0 = vmpackc.low %vm845_vm9, %vm842_vm8  ;;  %vm1694_vm8 = vcmp.eq.s32.totalorder %v14427_v55, %v10760_v41  ;;  %vm1690_vm13 = vcmp.eq.s32.totalorder %v14426_v23, %v10752_v2 }
 0x14a   : > { %9306 = vmatprep.subr.msk.bf16.mxu0 %vm9305_vm0, %v10457_v19  ;;  %vm9433_vm3 = vmpackc.low %vm1688_vm12, %vm1685_vm11  ;;  %vm850_vm11 = vcmp.eq.s32.totalorder %v14425_v9, %v10748_v1  ;;  %vm854_vm0 = vcmp.eq.s32.totalorder %v14428_v35, %v10756_v4  ;;  %v14430_v9 = vld [vmem:[#allocation37_spill] sm:$0xff] }
 0x14b   : > { %9434 = vmatprep.subr.msk.bf16.mxu1 %vm9433_vm3, %v10457_v19  ;;  %vm9307_vm6 = vmpackc.low %vm844_vm15, %vm841_vm14  ;;  %vm1693_vm14 = vcmp.eq.s32.totalorder %v14427_v55, %v10752_v2  ;;  %vm1697_vm3 = vcmp.eq.s32.totalorder %v14430_v9, %v10760_v41 }
 0x14c   : > { %9308 = vmatpush1.bf16.msk.msra.mxu0 %vm9307_vm6, %v10457_v19  ;;  %vm9435_vm9 = vmpackc.low %vm1687_vm2, %vm1684_vm1  ;;  %vm857_vm1 = vcmp.eq.s32.totalorder %v14429_v14, %v10756_v4  ;;  %vm853_vm6 = vcmp.eq.s32.totalorder %v14428_v35, %v10748_v1  ;;  %v14432_v35 = vld [vmem:[#allocation59_spill] sm:$0xff] }
 0x14d   : > { %9436 = vmatpush1.bf16.msk.msra.mxu1 %vm9435_vm9, %v10457_v19  ;;  %vm9309_vm12 = vmpackc.low %vm851_vm5, %vm848_vm4  ;;  %vm1700_vm4 = vcmp.eq.s32.totalorder %v14431_v43, %v10760_v41  ;;  %vm1696_vm9 = vcmp.eq.s32.totalorder %v14430_v9, %v10752_v2 }
 0x14e   : > { %9310 = vmatprep.subr.msk.bf16.mxu0 %vm9309_vm12, %v10457_v19  ;;  %vm9437_vm15 = vmpackc.low %vm1694_vm8, %vm1691_vm7  ;;  %vm856_vm7 = vcmp.eq.s32.totalorder %v14429_v14, %v10748_v1  ;;  %vm860_vm12 = vcmp.eq.s32.totalorder %v11311_v21, %v10756_v4 }
 0x14f   : > { %9438 = vmatprep.subr.msk.bf16.mxu1 %vm9437_vm15, %v10457_v19  ;;  %vm9311_vm2 = vmpackc.low %vm850_vm11, %vm847_vm10  ;;  %vm1699_vm10 = vcmp.eq.s32.totalorder %v14431_v43, %v10752_v2  ;;  %vm1703_vm15 = vcmp.eq.s32.totalorder %v10989_v34, %v10760_v41 }
 0x150   : > { %9312 = vmatpush1.bf16.msk.msra.mxu0 %vm9311_vm2, %v10457_v19  ;;  %vm9439_vm5 = vmpackc.low %vm1693_vm14, %vm1690_vm13  ;;  %vm863_vm13 = vcmp.eq.s32.totalorder %v14432_v35, %v10756_v4  ;;  %vm859_vm2 = vcmp.eq.s32.totalorder %v11311_v21, %v10748_v1 }
 0x151   : > { %9440 = vmatpush1.bf16.msk.msra.mxu1 %vm9439_vm5, %v10457_v19  ;;  %vm9313_vm8 = vmpackc.low %vm857_vm1, %vm854_vm0  ;;  %vm1706_vm0 = vcmp.eq.s32.totalorder %v10992_v47, %v10760_v41  ;;  %vm1702_vm5 = vcmp.eq.s32.totalorder %v10989_v34, %v10752_v2 }
 0x152   : > { %9314 = vmatprep.subr.msk.bf16.mxu0 %vm9313_vm8, %v10457_v19  ;;  %vm9441_vm11 = vmpackc.low %vm1700_vm4, %vm1697_vm3  ;;  %vm862_vm3 = vcmp.eq.s32.totalorder %v14432_v35, %v10748_v1  ;;  %vm866_vm8 = vcmp.eq.s32.totalorder %v11349_v31, %v10756_v4 }
 0x153   : > { %9442 = vmatprep.subr.msk.bf16.mxu1 %vm9441_vm11, %v10457_v19  ;;  %vm9315_vm14 = vmpackc.low %vm856_vm7, %vm853_vm6  ;;  %vm1705_vm6 = vcmp.eq.s32.totalorder %v10992_v47, %v10752_v2  ;;  %vm1709_vm11 = vcmp.eq.s32.totalorder %v11027_v44, %v10760_v41 }
 0x154   : > { %9316 = vmatpush1.bf16.msk.msra.mxu0 %vm9315_vm14, %v10457_v19  ;;  %vm9443_vm1 = vmpackc.low %vm1699_vm10, %vm1696_vm9  ;;  %vm869_vm9 = vcmp.eq.s32.totalorder %v11352_v30, %v10756_v4  ;;  %vm865_vm14 = vcmp.eq.s32.totalorder %v11349_v31, %v10748_v1  ;;  %v14435_v4 = vld [vmem:[#allocation45_spill] sm:$0xff] }
 0x155   : > { %9444 = vmatpush1.bf16.msk.msra.mxu1 %vm9443_vm1, %v10457_v19  ;;  %vm9317_vm4 = vmpackc.low %vm863_vm13, %vm860_vm12  ;;  %vm1712_vm12 = vcmp.eq.s32.totalorder %v11030_v50, %v10760_v41  ;;  %vm1708_vm1 = vcmp.eq.s32.totalorder %v11027_v44, %v10752_v2 }
 0x156   : > { %9318 = vmatprep.subr.msk.bf16.mxu0 %vm9317_vm4, %v10457_v19  ;;  %vm9445_vm7 = vmpackc.low %vm1706_vm0, %vm1703_vm15  ;;  %vm868_vm15 = vcmp.eq.s32.totalorder %v11352_v30, %v10748_v1  ;;  %vm1715_vm4 = vcmp.eq.s32.totalorder %v11075_v16, %v10760_v41  ;;  %v14433_v1 = vld [vmem:[#allocation19_spill] sm:$0xff] }
 0x157   : > { %9446 = vmatprep.subr.msk.bf16.mxu1 %vm9445_vm7, %v10457_v19  ;;  %vm9319_vm10 = vmpackc.low %vm862_vm3, %vm859_vm2  ;;  %vm1711_vm2 = vcmp.eq.s32.totalorder %v11030_v50, %v10752_v2  ;;  %vm1668_vm7 = vcmp.eq.s32.totalorder %v10728_v53, %v14433_v1 }
 0x158   : > { %9320 = vmatpush1.bf16.msk.msra.mxu0 %vm9319_vm10, %v10457_v19  ;;  %vm9447_vm13 = vmpackc.low %vm1705_vm6, %vm1702_vm5  ;;  %vm1718_vm5 = vcmp.eq.s32.totalorder %v11078_v39, %v10760_v41  ;;  %vm1714_vm10 = vcmp.eq.s32.totalorder %v11075_v16, %v10752_v2 }
 0x159   : > { %9448 = vmatpush1.bf16.msk.msra.mxu1 %vm9447_vm13, %v10457_v19  ;;  %vm9321_vm0 = vmpackc.low %vm869_vm9, %vm866_vm8  ;;  %vm1671_vm8 = vcmp.eq.s32.totalorder %v10731_v57, %v14433_v1  ;;  %vm1620_vm13 = vcmp.eq.s32.totalorder %v10526_v12, %v14433_v1 }
 0x15a   : > { %9322 = vmatprep.subr.msk.bf16.mxu0 %vm9321_vm0, %v10457_v19  ;;  %vm9449_vm3 = vmpackc.low %vm1712_vm12, %vm1709_vm11  ;;  %vm1717_vm11 = vcmp.eq.s32.totalorder %v11078_v39, %v10752_v2  ;;  %vm1721_vm0 = vcmp.eq.s32.totalorder %v11117_v63, %v10760_v41 }
 0x15b   : > { %9450 = vmatprep.subr.msk.bf16.mxu1 %vm9449_vm3, %v10457_v19  ;;  %vm9323_vm6 = vmpackc.low %vm868_vm15, %vm865_vm14  ;;  %vm1623_vm14 = vcmp.eq.s32.totalorder %v10725_v51, %v14433_v1  ;;  %vm1674_vm3 = vcmp.eq.s32.totalorder %v10742_v40, %v14433_v1 }
 0x15c   : > { %9324 = vmatpush1.bf16.msk.msra.mxu0 %vm9323_vm6, %v10457_v19  ;;  %vm9451_vm9 = vmpackc.low %vm1711_vm2, %vm1708_vm1  ;;  %vm1724_vm1 = vcmp.eq.s32.totalorder %v11125_v61, %v10760_v41  ;;  %vm1720_vm6 = vcmp.eq.s32.totalorder %v11117_v63, %v10752_v2 }
 0x15d   : > { %9452 = vmatpush1.bf16.msk.msra.mxu1 %vm9451_vm9, %v10457_v19  ;;  %vm9453_vm12 = vmpackc.low %vm1718_vm5, %vm1715_vm4  ;;  %vm1677_vm4 = vcmp.eq.s32.totalorder %v10787_v18, %v14433_v1  ;;  %vm1626_vm9 = vcmp.eq.s32.totalorder %v10734_v58, %v14433_v1 }
 0x15e   : > { %9454 = vmatprep.subr.msk.bf16.mxu1 %vm9453_vm12, %v10457_v19  ;;  %vm9517_vm15 = vmpackc.low %vm1671_vm8, %vm1668_vm7  ;;  %vm1723_vm7 = vcmp.eq.s32.totalorder %v11125_v61, %v10752_v2  ;;  %vm1727_vm12 = vcmp.eq.s32.totalorder %v11171_v6, %v10760_v41 }
 0x15f   : > { %9518 = vmatprep.subr.msk.bf16.mxu0 %vm9517_vm15, %v10457_v19  ;;  %1397 = vmatmul.mubr.f32.vlgmr.msra.gmra.mrb[0].mxu0 %v11081_v3  ;;  %vm9455_vm2 = vmpackc.low %vm1717_vm11, %vm1714_vm10  ;;  %vm1629_vm10 = vcmp.eq.s32.totalorder %v10737_v45, %v14433_v1  ;;  %vm1680_vm15 = vcmp.eq.s32.totalorder %v10840_v11, %v14433_v1  ;;  %v14434_v3 = vld [vmem:[#allocation44_spill] sm:$0xff] }
 0x160   : > { %2259 = vmatmul.mubr.f32.vlgmr.msra.gmra.mrb[4].mxu1 %v11423_v27  ;;  %vm9519_vm5 = vmpackc.low %vm1623_vm14, %vm1620_vm13  ;;  %2400 = vmatprep.mubr.f32.mxu0 %v10522_v7  ;;  %vm1730_vm13 = vcmp.eq.s32.totalorder %v11174_v29, %v10760_v41 }
 0x161   : > { %9456 = vmatpush1.bf16.msk.msra.mxu1 %vm9455_vm2, %v10457_v19  ;;  %9520 = vmatpush3.bf16.msk.msra.mxu0 %vm9519_vm5, %v10457_v19  ;;  %vm9457_vm8 = vmpackc.low %vm1724_vm1, %vm1721_vm0  ;;  %vm1683_vm0 = vcmp.eq.s32.totalorder %v10843_v13, %v14433_v1  ;;  %vm1726_vm2 = vcmp.eq.s32.totalorder %v11171_v6, %v10752_v2  ;;  %vm1632_vm5 = vcmp.eq.s32.totalorder %v10790_v20, %v14433_v1 }
 0x162   : > { %9458 = vmatprep.subr.msk.bf16.mxu1 %vm9457_vm8, %v10457_v19  ;;  %vm9521_vm11 = vmpackc.low %vm1677_vm4, %vm1674_vm3  ;;  %2329 = vmatprep.mubr.f32.mxu1 %v11129_v48  ;;  %vm1729_vm3 = vcmp.eq.s32.totalorder %v11174_v29, %v10752_v2  ;;  %vm1733_vm8 = vcmp.eq.s32.totalorder %v11216_v10, %v10760_v41 }
 0x163   : > { %9522 = vmatprep.subr.msk.bf16.mxu0 %vm9521_vm11, %v10457_v19  ;;  %vm9459_vm14 = vmpackc.low %vm1723_vm7, %vm1720_vm6  ;;  %vm1635_vm6 = vcmp.eq.s32.totalorder %v10832_v22, %v14433_v1  ;;  %vm1686_vm11 = vcmp.eq.s32.totalorder %v10875_v59, %v14433_v1 }
 0x164   : > { %vm9523_vm1 = vmpackc.low %vm1629_vm10, %vm1626_vm9  ;;  %vm1736_vm9 = vcmp.eq.s32.totalorder %v11219_v8, %v10760_v41 }
 0x165   : > { %9460 = vmatpush1.bf16.msk.msra.mxu1 %vm9459_vm14, %v10457_v19  ;;  %9524 = vmatpush3.bf16.msk.msra.mxu0 %vm9523_vm1, %v10457_v19  ;;  %vm9461_vm4 = vmpackc.low %vm1730_vm13, %vm1727_vm12  ;;  %vm1689_vm12 = vcmp.eq.s32.totalorder %v10878_v62, %v14433_v1  ;;  %vm1732_vm14 = vcmp.eq.s32.totalorder %v11216_v10, %v10752_v2  ;;  %vm1638_vm1 = vcmp.eq.s32.totalorder %v10864_v15, %v14433_v1 }
 0x166   : > { %9462 = vmatprep.subr.msk.bf16.mxu1 %vm9461_vm4, %v10457_v19  ;;  %vm9525_vm7 = vmpackc.low %vm1683_vm0, %vm1680_vm15  ;;  %vm1735_vm15 = vcmp.eq.s32.totalorder %v11219_v8, %v10752_v2  ;;  %vm1739_vm4 = vcmp.eq.s32.totalorder %v11254_v46, %v10760_v41 }
 0x167   : > { %9526 = vmatprep.subr.msk.bf16.mxu0 %vm9525_vm7, %v10457_v19  ;;  %vm9463_vm10 = vmpackc.low %vm1729_vm3, %vm1726_vm2  ;;  %vm1641_vm2 = vcmp.eq.s32.totalorder %v10867_v56, %v14433_v1  ;;  %vm1692_vm7 = vcmp.eq.s32.totalorder %v14426_v23, %v14433_v1 }
 0x168   : > { %vm9527_vm13 = vmpackc.low %vm1635_vm6, %vm1632_vm5  ;;  %vm1742_vm5 = vcmp.eq.s32.totalorder %v11257_v5, %v10760_v41 }
 0x169   : > { %9464 = vmatpush1.bf16.msk.msra.mxu1 %vm9463_vm10, %v10457_v19  ;;  %9528 = vmatpush3.bf16.msk.msra.mxu0 %vm9527_vm13, %v10457_v19  ;;  %vm9465_vm0 = vmpackc.low %vm1736_vm9, %vm1733_vm8  ;;  %vm1695_vm8 = vcmp.eq.s32.totalorder %v14427_v55, %v14433_v1  ;;  %vm1738_vm10 = vcmp.eq.s32.totalorder %v11254_v46, %v10752_v2  ;;  %vm1644_vm13 = vcmp.eq.s32.totalorder %v10902_v17, %v14433_v1 }
 0x16a   : > { %9466 = vmatprep.subr.msk.bf16.mxu1 %vm9465_vm0, %v10457_v19  ;;  %vm9529_vm3 = vmpackc.low %vm1689_vm12, %vm1686_vm11  ;;  %vm1741_vm11 = vcmp.eq.s32.totalorder %v11257_v5, %v10752_v2  ;;  %vm1745_vm0 = vcmp.eq.s32.totalorder %v11292_v24, %v10760_v41 }
 0x16b   : > { %9530 = vmatprep.subr.msk.bf16.mxu0 %vm9529_vm3, %v10457_v19  ;;  %vm9467_vm6 = vmpackc.low %vm1735_vm15, %vm1732_vm14  ;;  %vm1647_vm14 = vcmp.eq.s32.totalorder %v10905_v49, %v14433_v1  ;;  %vm1698_vm3 = vcmp.eq.s32.totalorder %v14430_v9, %v14433_v1 }
 0x16c   : > { %vm9531_vm9 = vmpackc.low %vm1641_vm2, %vm1638_vm1  ;;  %vm1748_vm1 = vcmp.eq.s32.totalorder %v11295_v42, %v10760_v41 }
 0x16d   : > { %9468 = vmatpush1.bf16.msk.msra.mxu1 %vm9467_vm6, %v10457_v19  ;;  %9532 = vmatpush3.bf16.msk.msra.mxu0 %vm9531_vm9, %v10457_v19  ;;  %vm9469_vm12 = vmpackc.low %vm1742_vm5, %vm1739_vm4  ;;  %vm1701_vm4 = vcmp.eq.s32.totalorder %v14431_v43, %v14433_v1  ;;  %vm1744_vm6 = vcmp.eq.s32.totalorder %v11292_v24, %v10752_v2  ;;  %vm1650_vm9 = vcmp.eq.s32.totalorder %v10940_v25, %v14433_v1 }
 0x16e   : > { %9470 = vmatprep.subr.msk.bf16.mxu1 %vm9469_vm12, %v10457_v19  ;;  %vm9533_vm15 = vmpackc.low %vm1695_vm8, %vm1692_vm7  ;;  %vm1747_vm7 = vcmp.eq.s32.totalorder %v11295_v42, %v10752_v2  ;;  %vm1751_vm12 = vcmp.eq.s32.totalorder %v11330_v0, %v10760_v41 }
 0x16f   : > { %9534 = vmatprep.subr.msk.bf16.mxu0 %vm9533_vm15, %v10457_v19  ;;  %vm9471_vm2 = vmpackc.low %vm1741_vm11, %vm1738_vm10  ;;  %vm1653_vm10 = vcmp.eq.s32.totalorder %v10943_v26, %v14433_v1  ;;  %vm1704_vm15 = vcmp.eq.s32.totalorder %v10989_v34, %v14433_v1 }
 0x170   : > { %vm9535_vm5 = vmpackc.low %vm1647_vm14, %vm1644_vm13  ;;  %vm1754_vm13 = vcmp.eq.s32.totalorder %v11333_v60, %v10760_v41 }
 0x171   : > { %9472 = vmatpush1.bf16.msk.msra.mxu1 %vm9471_vm2, %v10457_v19  ;;  %9536 = vmatpush3.bf16.msk.msra.mxu0 %vm9535_vm5, %v10457_v19  ;;  %vm9473_vm8 = vmpackc.low %vm1748_vm1, %vm1745_vm0  ;;  %vm1707_vm0 = vcmp.eq.s32.totalorder %v10992_v47, %v14433_v1  ;;  %vm1750_vm2 = vcmp.eq.s32.totalorder %v11330_v0, %v10752_v2  ;;  %vm1656_vm5 = vcmp.eq.s32.totalorder %v10978_v32, %v14433_v1 }
 0x172   : > { %9474 = vmatprep.subr.msk.bf16.mxu1 %vm9473_vm8, %v10457_v19  ;;  %vm9537_vm11 = vmpackc.low %vm1701_vm4, %vm1698_vm3  ;;  %vm1753_vm3 = vcmp.eq.s32.totalorder %v11333_v60, %v10752_v2  ;;  %vm1757_vm8 = vcmp.eq.s32.totalorder %v11368_v37, %v10760_v41 }
 0x173   : > { %9538 = vmatprep.subr.msk.bf16.mxu0 %vm9537_vm11, %v10457_v19  ;;  %vm9475_vm14 = vmpackc.low %vm1747_vm7, %vm1744_vm6  ;;  %vm1659_vm6 = vcmp.eq.s32.totalorder %v10981_v33, %v14433_v1  ;;  %vm1710_vm11 = vcmp.eq.s32.totalorder %v11027_v44, %v14433_v1 }
 0x174   : > { %vm9539_vm1 = vmpackc.low %vm1653_vm10, %vm1650_vm9  ;;  %vm1760_vm9 = vcmp.eq.s32.totalorder %v11371_v28, %v10760_v41 }
 0x175   : > { %9476 = vmatpush1.bf16.msk.msra.mxu1 %vm9475_vm14, %v10457_v19  ;;  %9540 = vmatpush3.bf16.msk.msra.mxu0 %vm9539_vm1, %v10457_v19  ;;  %vm9477_vm4 = vmpackc.low %vm1754_vm13, %vm1751_vm12  ;;  %vm1713_vm12 = vcmp.eq.s32.totalorder %v11030_v50, %v14433_v1  ;;  %vm1756_vm14 = vcmp.eq.s32.totalorder %v11368_v37, %v10752_v2  ;;  %vm1662_vm1 = vcmp.eq.s32.totalorder %v11016_v52, %v14433_v1 }
 0x176   : > { %9478 = vmatprep.subr.msk.bf16.mxu1 %vm9477_vm4, %v10457_v19  ;;  %vm9541_vm7 = vmpackc.low %vm1707_vm0, %vm1704_vm15  ;;  %vm1759_vm15 = vcmp.eq.s32.totalorder %v11371_v28, %v10752_v2  ;;  %vm1763_vm4 = vcmp.eq.s32.totalorder %v11059_v38, %v10760_v41 }
 0x177   : > { %9542 = vmatprep.subr.msk.bf16.mxu0 %vm9541_vm7, %v10457_v19  ;;  %vm9479_vm10 = vmpackc.low %vm1753_vm3, %vm1750_vm2  ;;  %vm1665_vm2 = vcmp.eq.s32.totalorder %v11019_v54, %v14433_v1  ;;  %vm1764_vm7 = vcmp.eq.s32.totalorder %v11059_v38, %v14433_v1 }
 0x178   : > { %vm9543_vm13 = vmpackc.low %vm1659_vm6, %vm1656_vm5  ;;  %vm1766_vm5 = vcmp.eq.s32.totalorder %v11062_v36, %v10760_v41 }
 0x179   : > { %9480 = vmatpush1.bf16.msk.msra.mxu1 %vm9479_vm10, %v10457_v19  ;;  %9544 = vmatpush3.bf16.msk.msra.mxu0 %vm9543_vm13, %v10457_v19  ;;  %vm9481_vm0 = vmpackc.low %vm1760_vm9, %vm1757_vm8  ;;  %vm1767_vm8 = vcmp.eq.s32.totalorder %v11062_v36, %v14433_v1  ;;  %vm1762_vm10 = vcmp.eq.s32.totalorder %v11059_v38, %v10752_v2  ;;  %vm1716_vm13 = vcmp.eq.s32.totalorder %v11075_v16, %v14433_v1 }
 0x17a   : > { %9482 = vmatprep.subr.msk.bf16.mxu1 %vm9481_vm0, %v10457_v19  ;;  %vm9545_vm3 = vmpackc.low %vm1713_vm12, %vm1710_vm11  ;;  %vm1765_vm11 = vcmp.eq.s32.totalorder %v11062_v36, %v10752_v2  ;;  %vm1769_vm0 = vcmp.eq.s32.totalorder %v14434_v3, %v10760_v41 }
 0x17b   : > { %9546 = vmatprep.subr.msk.bf16.mxu0 %vm9545_vm3, %v10457_v19  ;;  %vm9483_vm6 = vmpackc.low %vm1759_vm15, %vm1756_vm14  ;;  %vm1719_vm14 = vcmp.eq.s32.totalorder %v11078_v39, %v14433_v1  ;;  %vm1770_vm3 = vcmp.eq.s32.totalorder %v14434_v3, %v14433_v1 }
 0x17c   : > { %vm9547_vm9 = vmpackc.low %vm1665_vm2, %vm1662_vm1  ;;  %vm1772_vm1 = vcmp.eq.s32.totalorder %v14435_v4, %v10760_v41 }
 0x17d   : > { %9484 = vmatpush1.bf16.msk.msra.mxu1 %vm9483_vm6, %v10457_v19  ;;  %9548 = vmatpush3.bf16.msk.msra.mxu0 %vm9547_vm9, %v10457_v19  ;;  %vm9485_vm12 = vmpackc.low %vm1766_vm5, %vm1763_vm4  ;;  %vm1773_vm4 = vcmp.eq.s32.totalorder %v14435_v4, %v14433_v1  ;;  %vm1768_vm6 = vcmp.eq.s32.totalorder %v14434_v3, %v10752_v2  ;;  %vm1722_vm9 = vcmp.eq.s32.totalorder %v11117_v63, %v14433_v1  ;;  %v14437_v3 = vld [vmem:[#allocation48_spill] sm:$0xff] }
 0x17e   : > { %9486 = vmatprep.subr.msk.bf16.mxu1 %vm9485_vm12, %v10457_v19  ;;  %vm9549_vm15 = vmpackc.low %vm1767_vm8, %vm1764_vm7  ;;  %vm1771_vm7 = vcmp.eq.s32.totalorder %v14435_v4, %v10752_v2 }
 0x17f   : > { %9550 = vmatprep.subr.msk.bf16.mxu0 %vm9549_vm15, %v10457_v19  ;;  %vm9487_vm2 = vmpackc.low %vm1765_vm11, %vm1762_vm10  ;;  %vm1725_vm10 = vcmp.eq.s32.totalorder %v11125_v61, %v14433_v1 }
 0x180   : > { %2401 = vmatmul.mubr.f32.vlgmr.msra.gmra.mrb[2].mxu0 %v11423_v27  ;;  %vm9551_vm5 = vmpackc.low %vm1719_vm14, %vm1716_vm13  ;;  %v14436_v27 = vld [vmem:[#allocation47_spill] sm:$0xff]  ;;  %vm1778_vm13 = vcmp.eq.s32.totalorder %v14437_v3, %v10760_v41 }
 0x181   : > { %9488 = vmatpush1.bf16.msk.msra.mxu1 %vm9487_vm2, %v10457_v19  ;;  %9552 = vmatpush3.bf16.msk.msra.mxu0 %vm9551_vm5, %v10457_v19  ;;  %vm9489_vm8 = vmpackc.low %vm1772_vm1, %vm1769_vm0  ;;  %vm1775_vm12 = vcmp.eq.s32.totalorder %v14436_v27, %v10760_v41  ;;  %vm1776_vm15 = vcmp.eq.s32.totalorder %v14436_v27, %v14433_v1  ;;  %vm1779_vm0 = vcmp.eq.s32.totalorder %v14437_v3, %v14433_v1 }
 0x182   : > { %9490 = vmatprep.subr.msk.bf16.mxu1 %vm9489_vm8, %v10457_v19  ;;  %vm9553_vm11 = vmpackc.low %vm1773_vm4, %vm1770_vm3  ;;  %2470 = vmatprep.mubr.f32.mxu0 %v11129_v48  ;;  %vm1774_vm2 = vcmp.eq.s32.totalorder %v14436_v27, %v10752_v2  ;;  %vm1777_vm3 = vcmp.eq.s32.totalorder %v14437_v3, %v10752_v2  ;;  %vm1728_vm5 = vcmp.eq.s32.totalorder %v11171_v6, %v14433_v1  ;;  %v14438_v48 = vld [vmem:[#allocation50_spill] sm:$0xff]  ;;  %v14439_v27 = vld [vmem:[#allocation51_spill] sm:$0xff] }
 0x183   : > { %9554 = vmatprep.subr.msk.bf16.mxu0 %vm9553_vm11, %v10457_v19  ;;  %vm9491_vm14 = vmpackc.low %vm1771_vm7, %vm1768_vm6  ;;  %vm1731_vm6 = vcmp.eq.s32.totalorder %v11174_v29, %v14433_v1  ;;  %vm1781_vm8 = vcmp.eq.s32.totalorder %v14438_v48, %v10760_v41  ;;  %vm1782_vm11 = vcmp.eq.s32.totalorder %v14438_v48, %v14433_v1  ;;  %v14440_v29 = vld [vmem:[#allocation53_spill] sm:$0xff] }
 0x184   : > { %vm9555_vm1 = vmpackc.low %vm1725_vm10, %vm1722_vm9  ;;  %vm1784_vm9 = vcmp.eq.s32.totalorder %v14439_v27, %v10760_v41 }
 0x185   : > { %9492 = vmatpush1.bf16.msk.msra.mxu1 %vm9491_vm14, %v10457_v19  ;;  %9556 = vmatpush3.bf16.msk.msra.mxu0 %vm9555_vm1, %v10457_v19  ;;  %vm9493_vm4 = vmpackc.low %vm1778_vm13, %vm1775_vm12  ;;  %vm1785_vm12 = vcmp.eq.s32.totalorder %v14439_v27, %v14433_v1  ;;  %vm1780_vm14 = vcmp.eq.s32.totalorder %v14438_v48, %v10752_v2  ;;  %vm1734_vm1 = vcmp.eq.s32.totalorder %v11216_v10, %v14433_v1  ;;  %v14441_v48 = vld [vmem:[#allocation54_spill] sm:$0xff] }
 0x186   : > { %9494 = vmatprep.subr.msk.bf16.mxu1 %vm9493_vm4, %v10457_v19  ;;  %vm9557_vm7 = vmpackc.low %vm1779_vm0, %vm1776_vm15  ;;  %vm1783_vm15 = vcmp.eq.s32.totalorder %v14439_v27, %v10752_v2  ;;  %vm1787_vm4 = vcmp.eq.s32.totalorder %v14440_v29, %v10760_v41 }
 0x187   : > { %9558 = vmatprep.subr.msk.bf16.mxu0 %vm9557_vm7, %v10457_v19  ;;  %vm9495_vm10 = vmpackc.low %vm1777_vm3, %vm1774_vm2  ;;  %vm1737_vm2 = vcmp.eq.s32.totalorder %v11219_v8, %v14433_v1  ;;  %vm1788_vm7 = vcmp.eq.s32.totalorder %v14440_v29, %v14433_v1  ;;  %v14442_v8 = vld [vmem:[#allocation55_spill] sm:$0xff] }
 0x188   : > { %vm9559_vm13 = vmpackc.low %vm1731_vm6, %vm1728_vm5  ;;  %vm1790_vm5 = vcmp.eq.s32.totalorder %v14441_v48, %v10760_v41 }
 0x189   : > { %9496 = vmatpush1.bf16.msk.msra.mxu1 %vm9495_vm10, %v10457_v19  ;;  %9560 = vmatpush3.bf16.msk.msra.mxu0 %vm9559_vm13, %v10457_v19  ;;  %vm9497_vm0 = vmpackc.low %vm1784_vm9, %vm1781_vm8  ;;  %vm1791_vm8 = vcmp.eq.s32.totalorder %v14441_v48, %v14433_v1  ;;  %vm1786_vm10 = vcmp.eq.s32.totalorder %v14440_v29, %v10752_v2  ;;  %vm1740_vm13 = vcmp.eq.s32.totalorder %v11254_v46, %v14433_v1 }
 0x18a   : > { %9498 = vmatprep.subr.msk.bf16.mxu1 %vm9497_vm0, %v10457_v19  ;;  %vm9561_vm3 = vmpackc.low %vm1785_vm12, %vm1782_vm11  ;;  %vm1789_vm11 = vcmp.eq.s32.totalorder %v14441_v48, %v10752_v2  ;;  %vm1793_vm0 = vcmp.eq.s32.totalorder %v14442_v8, %v10760_v41 }
 0x18b   : > { %9562 = vmatprep.subr.msk.bf16.mxu0 %vm9561_vm3, %v10457_v19  ;;  %vm9499_vm6 = vmpackc.low %vm1783_vm15, %vm1780_vm14  ;;  %vm1743_vm14 = vcmp.eq.s32.totalorder %v11257_v5, %v14433_v1  ;;  %vm1794_vm3 = vcmp.eq.s32.totalorder %v14442_v8, %v14433_v1 }
 0x18c   : > { %vm9563_vm9 = vmpackc.low %vm1737_vm2, %vm1734_vm1  ;;  %vm1796_vm1 = vcmp.eq.s32.totalorder %v14429_v14, %v10760_v41 }
 0x18d   : > { %9500 = vmatpush1.bf16.msk.msra.mxu1 %vm9499_vm6, %v10457_v19  ;;  %9564 = vmatpush3.bf16.msk.msra.mxu0 %vm9563_vm9, %v10457_v19  ;;  %vm9501_vm12 = vmpackc.low %vm1790_vm5, %vm1787_vm4  ;;  %vm1797_vm4 = vcmp.eq.s32.totalorder %v14429_v14, %v14433_v1  ;;  %vm1792_vm6 = vcmp.eq.s32.totalorder %v14442_v8, %v10752_v2  ;;  %vm1746_vm9 = vcmp.eq.s32.totalorder %v11292_v24, %v14433_v1 }
 0x18e   : > { %9502 = vmatprep.subr.msk.bf16.mxu1 %vm9501_vm12, %v10457_v19  ;;  %vm9565_vm15 = vmpackc.low %vm1791_vm8, %vm1788_vm7  ;;  %vm1795_vm7 = vcmp.eq.s32.totalorder %v14429_v14, %v10752_v2  ;;  %vm1799_vm12 = vcmp.eq.s32.totalorder %v11311_v21, %v10760_v41 }
 0x18f   : > { %9566 = vmatprep.subr.msk.bf16.mxu0 %vm9565_vm15, %v10457_v19  ;;  %vm9503_vm2 = vmpackc.low %vm1789_vm11, %vm1786_vm10  ;;  %vm1749_vm10 = vcmp.eq.s32.totalorder %v11295_v42, %v14433_v1  ;;  %vm1800_vm15 = vcmp.eq.s32.totalorder %v11311_v21, %v14433_v1 }
 0x190   : > { %vm9567_vm5 = vmpackc.low %vm1743_vm14, %vm1740_vm13  ;;  %vm1802_vm13 = vcmp.eq.s32.totalorder %v14432_v35, %v10760_v41 }
 0x191   : > { %9504 = vmatpush1.bf16.msk.msra.mxu1 %vm9503_vm2, %v10457_v19  ;;  %9568 = vmatpush3.bf16.msk.msra.mxu0 %vm9567_vm5, %v10457_v19  ;;  %vm9505_vm8 = vmpackc.low %vm1796_vm1, %vm1793_vm0  ;;  %vm1803_vm0 = vcmp.eq.s32.totalorder %v14432_v35, %v14433_v1  ;;  %vm1798_vm2 = vcmp.eq.s32.totalorder %v11311_v21, %v10752_v2  ;;  %vm1752_vm5 = vcmp.eq.s32.totalorder %v11330_v0, %v14433_v1 }
 0x192   : > { %9506 = vmatprep.subr.msk.bf16.mxu1 %vm9505_vm8, %v10457_v19  ;;  %vm9569_vm11 = vmpackc.low %vm1797_vm4, %vm1794_vm3  ;;  %vm1801_vm3 = vcmp.eq.s32.totalorder %v14432_v35, %v10752_v2  ;;  %vm1805_vm8 = vcmp.eq.s32.totalorder %v11349_v31, %v10760_v41 }
 0x193   : > { %9570 = vmatprep.subr.msk.bf16.mxu0 %vm9569_vm11, %v10457_v19  ;;  %vm9507_vm14 = vmpackc.low %vm1795_vm7, %vm1792_vm6  ;;  %vm1755_vm6 = vcmp.eq.s32.totalorder %v11333_v60, %v14433_v1  ;;  %vm1806_vm11 = vcmp.eq.s32.totalorder %v11349_v31, %v14433_v1 }
 0x194   : > { %vm9571_vm1 = vmpackc.low %vm1749_vm10, %vm1746_vm9  ;;  %vm1808_vm9 = vcmp.eq.s32.totalorder %v11352_v30, %v10760_v41  ;;  %v14443_v41 = vld [vmem:[#allocation20_spill] sm:$0xff] }
 0x195   : > { %9508 = vmatpush1.bf16.msk.msra.mxu1 %vm9507_vm14, %v10457_v19  ;;  %9572 = vmatpush3.bf16.msk.msra.mxu0 %vm9571_vm1, %v10457_v19  ;;  %vm9509_vm4 = vmpackc.low %vm1802_vm13, %vm1799_vm12  ;;  %vm1809_vm12 = vcmp.eq.s32.totalorder %v11352_v30, %v14433_v1  ;;  %vm1804_vm14 = vcmp.eq.s32.totalorder %v11349_v31, %v10752_v2  ;;  %vm1758_vm1 = vcmp.eq.s32.totalorder %v11368_v37, %v14433_v1 }
 0x196   : > { %9510 = vmatprep.subr.msk.bf16.mxu1 %vm9509_vm4, %v10457_v19  ;;  %vm9573_vm7 = vmpackc.low %vm1803_vm0, %vm1800_vm15  ;;  %vm1807_vm15 = vcmp.eq.s32.totalorder %v11352_v30, %v10752_v2  ;;  %vm2561_vm4 = vcmp.eq.s32.totalorder %v10526_v12, %v14443_v41  ;;  %v14444_v2 = vld [vmem:[#allocation21_spill] sm:$0xff] }
 0x197   : > { %9574 = vmatprep.subr.msk.bf16.mxu0 %vm9573_vm7, %v10457_v19  ;;  %vm9511_vm10 = vmpackc.low %vm1801_vm3, %vm1798_vm2  ;;  %vm1761_vm2 = vcmp.eq.s32.totalorder %v11371_v28, %v14433_v1  ;;  %vm2610_vm7 = vcmp.eq.s32.totalorder %v10728_v53, %v14444_v2  ;;  %v14445_v1 = vld [vmem:[#allocation18_spill] sm:$0xff] }
 0x198   : > { %vm9575_vm13 = vmpackc.low %vm1755_vm6, %vm1752_vm5  ;;  %vm2564_vm5 = vcmp.eq.s32.totalorder %v10725_v51, %v14443_v41 }
 0x199   : > { %9512 = vmatpush1.bf16.msk.msra.mxu1 %vm9511_vm10, %v10457_v19  ;;  %9576 = vmatpush3.bf16.msk.msra.mxu0 %vm9575_vm13, %v10457_v19  ;;  %vm9513_vm0 = vmpackc.low %vm1808_vm9, %vm1805_vm8  ;;  %vm2613_vm8 = vcmp.eq.s32.totalorder %v10731_v57, %v14444_v2  ;;  %vm2560_vm10 = vcmp.eq.s32.totalorder %v10526_v12, %v14445_v1  ;;  %vm2562_vm13 = vcmp.eq.s32.totalorder %v10526_v12, %v14444_v2  ;;  %v12080_v12 = vld [vmem:[%s10515_s30 + $0x8] sm:$0xff] }
 0x19a   : > { %9514 = vmatprep.subr.msk.bf16.mxu1 %vm9513_vm0, %v10457_v19  ;;  %vm9577_vm3 = vmpackc.low %vm1809_vm12, %vm1806_vm11  ;;  %vm2563_vm11 = vcmp.eq.s32.totalorder %v10725_v51, %v14445_v1  ;;  %vm2567_vm0 = vcmp.eq.s32.totalorder %v10734_v58, %v14443_v41 }
 0x19b   : > { %9578 = vmatprep.subr.msk.bf16.mxu0 %vm9577_vm3, %v10457_v19  ;;  %vm9515_vm6 = vmpackc.low %vm1807_vm15, %vm1804_vm14  ;;  %vm2565_vm14 = vcmp.eq.s32.totalorder %v10725_v51, %v14444_v2  ;;  %vm2616_vm3 = vcmp.eq.s32.totalorder %v10742_v40, %v14444_v2 }
 0x19c   : > { %vm9579_vm9 = vmpackc.low %vm1761_vm2, %vm1758_vm1  ;;  %vm2570_vm1 = vcmp.eq.s32.totalorder %v10737_v45, %v14443_v41 }
 0x19d   : > { %9516 = vmatpush1.bf16.msk.msra.mxu1 %vm9515_vm6, %v10457_v19  ;;  %9580 = vmatpush3.bf16.msk.msra.mxu0 %vm9579_vm9, %v10457_v19  ;;  %vm9581_vm12 = vmpackc.low %vm2564_vm5, %vm2561_vm4  ;;  %vm2619_vm4 = vcmp.eq.s32.totalorder %v10787_v18, %v14444_v2  ;;  %vm2566_vm6 = vcmp.eq.s32.totalorder %v10734_v58, %v14445_v1  ;;  %vm2568_vm9 = vcmp.eq.s32.totalorder %v10734_v58, %v14444_v2 }
 0x19e   : > { %9582 = vmatprep.subr.msk.bf16.mxu0 %vm9581_vm12, %v10457_v19  ;;  %vm9709_vm15 = vmpackc.low %vm2613_vm8, %vm2610_vm7  ;;  %vm2569_vm7 = vcmp.eq.s32.totalorder %v10737_v45, %v14445_v1  ;;  %vm2573_vm12 = vcmp.eq.s32.totalorder %v10790_v20, %v14443_v41 }
 0x19f   : > { %9710 = vmatprep.subr.msk.bf16.mxu1 %vm9709_vm15, %v10457_v19  ;;  %vm9583_vm2 = vmpackc.low %vm2563_vm11, %vm2560_vm10  ;;  %vm2571_vm10 = vcmp.eq.s32.totalorder %v10737_v45, %v14444_v2  ;;  %vm2622_vm15 = vcmp.eq.s32.totalorder %v10840_v11, %v14444_v2 }
 0x1a0   : > { %2330 = vmatmul.mubr.f32.vlgmr.msra.gmra.mrb[4].mxu1 %v12080_v12  ;;  %2471 = vmatmul.mubr.f32.vlgmr.msra.gmra.mrb[4].mxu0 %v12080_v12  ;;  %vm9711_vm5 = vmpackc.low %vm2565_vm14, %vm2562_vm13  ;;  %vm2576_vm13 = vcmp.eq.s32.totalorder %v10832_v22, %v14443_v41 }
 0x1a1   : > { %9584 = vmatpush1.bf16.msk.msra.mxu0 %vm9583_vm2, %v10457_v19  ;;  %9712 = vmatpush3.bf16.msk.msra.mxu1 %vm9711_vm5, %v10457_v19  ;;  %vm9585_vm8 = vmpackc.low %vm2570_vm1, %vm2567_vm0  ;;  %vm2625_vm0 = vcmp.eq.s32.totalorder %v10843_v13, %v14444_v2  ;;  %vm2572_vm2 = vcmp.eq.s32.totalorder %v10790_v20, %v14445_v1  ;;  %vm2574_vm5 = vcmp.eq.s32.totalorder %v10790_v20, %v14444_v2 }
 0x1a2   : > { %9586 = vmatprep.subr.msk.bf16.mxu0 %vm9585_vm8, %v10457_v19  ;;  %vm9713_vm11 = vmpackc.low %vm2619_vm4, %vm2616_vm3  ;;  %3342 = vmatprep.mubr.f32.mxu1 %v10522_v7  ;;  %vm2575_vm3 = vcmp.eq.s32.totalorder %v10832_v22, %v14445_v1  ;;  %vm2579_vm8 = vcmp.eq.s32.totalorder %v10864_v15, %v14443_v41 }
 0x1a3   : > { %9714 = vmatprep.subr.msk.bf16.mxu1 %vm9713_vm11, %v10457_v19  ;;  %vm9587_vm14 = vmpackc.low %vm2569_vm7, %vm2566_vm6  ;;  %3200 = vmatprep.mubr.f32.mxu0 %v10522_v7  ;;  %vm2577_vm6 = vcmp.eq.s32.totalorder %v10832_v22, %v14444_v2  ;;  %vm2628_vm11 = vcmp.eq.s32.totalorder %v10875_v59, %v14444_v2 }
 0x1a4   : > { %vm9715_vm1 = vmpackc.low %vm2571_vm10, %vm2568_vm9  ;;  %vm2582_vm9 = vcmp.eq.s32.totalorder %v10867_v56, %v14443_v41 }
 0x1a5   : > { %9588 = vmatpush1.bf16.msk.msra.mxu0 %vm9587_vm14, %v10457_v19  ;;  %9716 = vmatpush3.bf16.msk.msra.mxu1 %vm9715_vm1, %v10457_v19  ;;  %vm9589_vm4 = vmpackc.low %vm2576_vm13, %vm2573_vm12  ;;  %vm2631_vm12 = vcmp.eq.s32.totalorder %v10878_v62, %v14444_v2  ;;  %vm2578_vm14 = vcmp.eq.s32.totalorder %v10864_v15, %v14445_v1  ;;  %vm2580_vm1 = vcmp.eq.s32.totalorder %v10864_v15, %v14444_v2 }
 0x1a6   : > { %9590 = vmatprep.subr.msk.bf16.mxu0 %vm9589_vm4, %v10457_v19  ;;  %vm9717_vm7 = vmpackc.low %vm2625_vm0, %vm2622_vm15  ;;  %vm2581_vm15 = vcmp.eq.s32.totalorder %v10867_v56, %v14445_v1  ;;  %vm2585_vm4 = vcmp.eq.s32.totalorder %v10902_v17, %v14443_v41 }
 0x1a7   : > { %9718 = vmatprep.subr.msk.bf16.mxu1 %vm9717_vm7, %v10457_v19  ;;  %vm9591_vm10 = vmpackc.low %vm2575_vm3, %vm2572_vm2  ;;  %vm2583_vm2 = vcmp.eq.s32.totalorder %v10867_v56, %v14444_v2  ;;  %vm2634_vm7 = vcmp.eq.s32.totalorder %v14426_v23, %v14444_v2 }
 0x1a8   : > { %vm9719_vm13 = vmpackc.low %vm2577_vm6, %vm2574_vm5  ;;  %vm2588_vm5 = vcmp.eq.s32.totalorder %v10905_v49, %v14443_v41 }
 0x1a9   : > { %9592 = vmatpush1.bf16.msk.msra.mxu0 %vm9591_vm10, %v10457_v19  ;;  %9720 = vmatpush3.bf16.msk.msra.mxu1 %vm9719_vm13, %v10457_v19  ;;  %vm9593_vm0 = vmpackc.low %vm2582_vm9, %vm2579_vm8  ;;  %vm2637_vm8 = vcmp.eq.s32.totalorder %v14427_v55, %v14444_v2  ;;  %vm2584_vm10 = vcmp.eq.s32.totalorder %v10902_v17, %v14445_v1  ;;  %vm2586_vm13 = vcmp.eq.s32.totalorder %v10902_v17, %v14444_v2 }
 0x1aa   : > { %9594 = vmatprep.subr.msk.bf16.mxu0 %vm9593_vm0, %v10457_v19  ;;  %vm9721_vm3 = vmpackc.low %vm2631_vm12, %vm2628_vm11  ;;  %vm2587_vm11 = vcmp.eq.s32.totalorder %v10905_v49, %v14445_v1  ;;  %vm2591_vm0 = vcmp.eq.s32.totalorder %v10940_v25, %v14443_v41 }
 0x1ab   : > { %9722 = vmatprep.subr.msk.bf16.mxu1 %vm9721_vm3, %v10457_v19  ;;  %vm9595_vm6 = vmpackc.low %vm2581_vm15, %vm2578_vm14  ;;  %vm2589_vm14 = vcmp.eq.s32.totalorder %v10905_v49, %v14444_v2  ;;  %vm2640_vm3 = vcmp.eq.s32.totalorder %v14430_v9, %v14444_v2 }
 0x1ac   : > { %vm9723_vm9 = vmpackc.low %vm2583_vm2, %vm2580_vm1  ;;  %vm2594_vm1 = vcmp.eq.s32.totalorder %v10943_v26, %v14443_v41 }
 0x1ad   : > { %9596 = vmatpush1.bf16.msk.msra.mxu0 %vm9595_vm6, %v10457_v19  ;;  %9724 = vmatpush3.bf16.msk.msra.mxu1 %vm9723_vm9, %v10457_v19  ;;  %vm9597_vm12 = vmpackc.low %vm2588_vm5, %vm2585_vm4  ;;  %vm2643_vm4 = vcmp.eq.s32.totalorder %v14431_v43, %v14444_v2  ;;  %vm2590_vm6 = vcmp.eq.s32.totalorder %v10940_v25, %v14445_v1  ;;  %vm2592_vm9 = vcmp.eq.s32.totalorder %v10940_v25, %v14444_v2 }
 0x1ae   : > { %9598 = vmatprep.subr.msk.bf16.mxu0 %vm9597_vm12, %v10457_v19  ;;  %vm9725_vm15 = vmpackc.low %vm2637_vm8, %vm2634_vm7  ;;  %vm2593_vm7 = vcmp.eq.s32.totalorder %v10943_v26, %v14445_v1  ;;  %vm2597_vm12 = vcmp.eq.s32.totalorder %v10978_v32, %v14443_v41 }
 0x1af   : > { %9726 = vmatprep.subr.msk.bf16.mxu1 %vm9725_vm15, %v10457_v19  ;;  %vm9599_vm2 = vmpackc.low %vm2587_vm11, %vm2584_vm10  ;;  %vm2595_vm10 = vcmp.eq.s32.totalorder %v10943_v26, %v14444_v2  ;;  %vm2646_vm15 = vcmp.eq.s32.totalorder %v10989_v34, %v14444_v2 }
 0x1b0   : > { %vm9727_vm5 = vmpackc.low %vm2589_vm14, %vm2586_vm13  ;;  %vm2600_vm13 = vcmp.eq.s32.totalorder %v10981_v33, %v14443_v41 }
 0x1b1   : > { %9600 = vmatpush1.bf16.msk.msra.mxu0 %vm9599_vm2, %v10457_v19  ;;  %9728 = vmatpush3.bf16.msk.msra.mxu1 %vm9727_vm5, %v10457_v19  ;;  %vm9601_vm8 = vmpackc.low %vm2594_vm1, %vm2591_vm0  ;;  %vm2649_vm0 = vcmp.eq.s32.totalorder %v10992_v47, %v14444_v2  ;;  %vm2596_vm2 = vcmp.eq.s32.totalorder %v10978_v32, %v14445_v1  ;;  %vm2598_vm5 = vcmp.eq.s32.totalorder %v10978_v32, %v14444_v2 }
 0x1b2   : > { %9602 = vmatprep.subr.msk.bf16.mxu0 %vm9601_vm8, %v10457_v19  ;;  %vm9729_vm11 = vmpackc.low %vm2643_vm4, %vm2640_vm3  ;;  %vm2599_vm3 = vcmp.eq.s32.totalorder %v10981_v33, %v14445_v1  ;;  %vm2603_vm8 = vcmp.eq.s32.totalorder %v11016_v52, %v14443_v41 }
 0x1b3   : > { %9730 = vmatprep.subr.msk.bf16.mxu1 %vm9729_vm11, %v10457_v19  ;;  %vm9603_vm14 = vmpackc.low %vm2593_vm7, %vm2590_vm6  ;;  %vm2601_vm6 = vcmp.eq.s32.totalorder %v10981_v33, %v14444_v2  ;;  %vm2652_vm11 = vcmp.eq.s32.totalorder %v11027_v44, %v14444_v2 }
 0x1b4   : > { %vm9731_vm1 = vmpackc.low %vm2595_vm10, %vm2592_vm9  ;;  %vm2606_vm9 = vcmp.eq.s32.totalorder %v11019_v54, %v14443_v41 }
 0x1b5   : > { %9604 = vmatpush1.bf16.msk.msra.mxu0 %vm9603_vm14, %v10457_v19  ;;  %9732 = vmatpush3.bf16.msk.msra.mxu1 %vm9731_vm1, %v10457_v19  ;;  %vm9605_vm4 = vmpackc.low %vm2600_vm13, %vm2597_vm12  ;;  %vm2655_vm12 = vcmp.eq.s32.totalorder %v11030_v50, %v14444_v2  ;;  %vm2602_vm14 = vcmp.eq.s32.totalorder %v11016_v52, %v14445_v1  ;;  %vm2604_vm1 = vcmp.eq.s32.totalorder %v11016_v52, %v14444_v2 }
 0x1b6   : > { %9606 = vmatprep.subr.msk.bf16.mxu0 %vm9605_vm4, %v10457_v19  ;;  %vm9733_vm7 = vmpackc.low %vm2649_vm0, %vm2646_vm15  ;;  %vm2605_vm15 = vcmp.eq.s32.totalorder %v11019_v54, %v14445_v1  ;;  %vm2609_vm4 = vcmp.eq.s32.totalorder %v10728_v53, %v14443_v41 }
 0x1b7   : > { %9734 = vmatprep.subr.msk.bf16.mxu1 %vm9733_vm7, %v10457_v19  ;;  %vm9607_vm10 = vmpackc.low %vm2599_vm3, %vm2596_vm2  ;;  %vm2607_vm2 = vcmp.eq.s32.totalorder %v11019_v54, %v14444_v2  ;;  %vm2706_vm7 = vcmp.eq.s32.totalorder %v11059_v38, %v14444_v2 }
 0x1b8   : > { %vm9735_vm13 = vmpackc.low %vm2601_vm6, %vm2598_vm5  ;;  %vm2612_vm5 = vcmp.eq.s32.totalorder %v10731_v57, %v14443_v41 }
 0x1b9   : > { %9608 = vmatpush1.bf16.msk.msra.mxu0 %vm9607_vm10, %v10457_v19  ;;  %9736 = vmatpush3.bf16.msk.msra.mxu1 %vm9735_vm13, %v10457_v19  ;;  %vm9609_vm0 = vmpackc.low %vm2606_vm9, %vm2603_vm8  ;;  %vm2709_vm8 = vcmp.eq.s32.totalorder %v11062_v36, %v14444_v2  ;;  %vm2608_vm10 = vcmp.eq.s32.totalorder %v10728_v53, %v14445_v1  ;;  %vm2658_vm13 = vcmp.eq.s32.totalorder %v11075_v16, %v14444_v2  ;;  %v12247_v53 = vld [vmem:[%s10515_s30] sm:$0xff] }
 0x1ba   : > { %9610 = vmatprep.subr.msk.bf16.mxu0 %vm9609_vm0, %v10457_v19  ;;  %vm9737_vm3 = vmpackc.low %vm2655_vm12, %vm2652_vm11  ;;  %vm2611_vm11 = vcmp.eq.s32.totalorder %v10731_v57, %v14445_v1  ;;  %vm2615_vm0 = vcmp.eq.s32.totalorder %v10742_v40, %v14443_v41  ;;  %v14446_v57 = vld [vmem:[#allocation44_spill] sm:$0xff] }
 0x1bb   : > { %9738 = vmatprep.subr.msk.bf16.mxu1 %vm9737_vm3, %v10457_v19  ;;  %vm9611_vm6 = vmpackc.low %vm2605_vm15, %vm2602_vm14  ;;  %vm2661_vm14 = vcmp.eq.s32.totalorder %v11078_v39, %v14444_v2  ;;  %vm2712_vm3 = vcmp.eq.s32.totalorder %v14446_v57, %v14444_v2 }
 0x1bc   : > { %vm9739_vm9 = vmpackc.low %vm2607_vm2, %vm2604_vm1  ;;  %vm2618_vm1 = vcmp.eq.s32.totalorder %v10787_v18, %v14443_v41 }
 0x1bd   : > { %9612 = vmatpush1.bf16.msk.msra.mxu0 %vm9611_vm6, %v10457_v19  ;;  %9740 = vmatpush3.bf16.msk.msra.mxu1 %vm9739_vm9, %v10457_v19  ;;  %vm9613_vm12 = vmpackc.low %vm2612_vm5, %vm2609_vm4  ;;  %vm2715_vm4 = vcmp.eq.s32.totalorder %v14435_v4, %v14444_v2  ;;  %vm2614_vm6 = vcmp.eq.s32.totalorder %v10742_v40, %v14445_v1  ;;  %vm2664_vm9 = vcmp.eq.s32.totalorder %v11117_v63, %v14444_v2  ;;  %v14448_v40 = vld [vmem:[#allocation47_spill] sm:$0xff] }
 0x1be   : > { %9614 = vmatprep.subr.msk.bf16.mxu0 %vm9613_vm12, %v10457_v19  ;;  %vm9741_vm15 = vmpackc.low %vm2709_vm8, %vm2706_vm7  ;;  %vm2617_vm7 = vcmp.eq.s32.totalorder %v10787_v18, %v14445_v1  ;;  %vm2621_vm12 = vcmp.eq.s32.totalorder %v10840_v11, %v14443_v41  ;;  %v14447_v18 = vld [vmem:[#allocation46_spill] sm:$0xff] }
 0x1bf   : > { %9742 = vmatprep.subr.msk.bf16.mxu1 %vm9741_vm15, %v10457_v19  ;;  %vm9615_vm2 = vmpackc.low %vm2611_vm11, %vm2608_vm10  ;;  %vm2667_vm10 = vcmp.eq.s32.totalorder %v11125_v61, %v14444_v2  ;;  %vm2718_vm15 = vcmp.eq.s32.totalorder %v14448_v40, %v14444_v2  ;;  %v14449_v40 = vld [vmem:[#allocation49_spill] sm:$0xff] }
 0x1c0   : > { %3343 = vmatmul.mubr.f32.vlgmr.msra.gmra.mrb[6].mxu1 %v12247_v53  ;;  %vm9743_vm5 = vmpackc.low %vm2661_vm14, %vm2658_vm13  ;;  %vm2624_vm13 = vcmp.eq.s32.totalorder %v10843_v13, %v14443_v41 }
 0x1c1   : > { %9616 = vmatpush1.bf16.msk.msra.mxu0 %vm9615_vm2, %v10457_v19  ;;  %9744 = vmatpush3.bf16.msk.msra.mxu1 %vm9743_vm5, %v10457_v19  ;;  %vm9617_vm8 = vmpackc.low %vm2618_vm1, %vm2615_vm0  ;;  %vm2721_vm0 = vcmp.eq.s32.totalorder %v14437_v3, %v14444_v2  ;;  %vm2620_vm2 = vcmp.eq.s32.totalorder %v10840_v11, %v14445_v1  ;;  %vm2670_vm5 = vcmp.eq.s32.totalorder %v11171_v6, %v14444_v2 }
 0x1c2   : > { %9618 = vmatprep.subr.msk.bf16.mxu0 %vm9617_vm8, %v10457_v19  ;;  %vm9745_vm11 = vmpackc.low %vm2715_vm4, %vm2712_vm3  ;;  %3412 = vmatprep.mubr.f32.mxu1 %v14447_v18  ;;  %vm2623_vm3 = vcmp.eq.s32.totalorder %v10843_v13, %v14445_v1  ;;  %vm2627_vm8 = vcmp.eq.s32.totalorder %v10875_v59, %v14443_v41  ;;  %v14450_v13 = vld [vmem:[#allocation50_spill] sm:$0xff] }
 0x1c3   : > { %9746 = vmatprep.subr.msk.bf16.mxu1 %vm9745_vm11, %v10457_v19  ;;  %vm9619_vm14 = vmpackc.low %vm2617_vm7, %vm2614_vm6  ;;  %vm2673_vm6 = vcmp.eq.s32.totalorder %v14449_v40, %v14444_v2  ;;  %vm2724_vm11 = vcmp.eq.s32.totalorder %v14450_v13, %v14444_v2  ;;  %v14451_v13 = vld [vmem:[#allocation52_spill] sm:$0xff] }
 0x1c4   : > { %vm9747_vm1 = vmpackc.low %vm2667_vm10, %vm2664_vm9  ;;  %vm2630_vm9 = vcmp.eq.s32.totalorder %v10878_v62, %v14443_v41 }
 0x1c5   : > { %9620 = vmatpush1.bf16.msk.msra.mxu0 %vm9619_vm14, %v10457_v19  ;;  %9748 = vmatpush3.bf16.msk.msra.mxu1 %vm9747_vm1, %v10457_v19  ;;  %vm9621_vm4 = vmpackc.low %vm2624_vm13, %vm2621_vm12  ;;  %vm2727_vm12 = vcmp.eq.s32.totalorder %v14439_v27, %v14444_v2  ;;  %vm2626_vm14 = vcmp.eq.s32.totalorder %v10875_v59, %v14445_v1  ;;  %vm2676_vm1 = vcmp.eq.s32.totalorder %v11216_v10, %v14444_v2 }
 0x1c6   : > { %9622 = vmatprep.subr.msk.bf16.mxu0 %vm9621_vm4, %v10457_v19  ;;  %vm9749_vm7 = vmpackc.low %vm2721_vm0, %vm2718_vm15  ;;  %vm2629_vm15 = vcmp.eq.s32.totalorder %v10878_v62, %v14445_v1  ;;  %vm2633_vm4 = vcmp.eq.s32.totalorder %v14426_v23, %v14443_v41 }
 0x1c7   : > { %9750 = vmatprep.subr.msk.bf16.mxu1 %vm9749_vm7, %v10457_v19  ;;  %vm9623_vm10 = vmpackc.low %vm2623_vm3, %vm2620_vm2  ;;  %vm2679_vm2 = vcmp.eq.s32.totalorder %v14451_v13, %v14444_v2  ;;  %vm2730_vm7 = vcmp.eq.s32.totalorder %v14440_v29, %v14444_v2 }
 0x1c8   : > { %vm9751_vm13 = vmpackc.low %vm2673_vm6, %vm2670_vm5  ;;  %vm2636_vm5 = vcmp.eq.s32.totalorder %v14427_v55, %v14443_v41 }
 0x1c9   : > { %9624 = vmatpush1.bf16.msk.msra.mxu0 %vm9623_vm10, %v10457_v19  ;;  %9752 = vmatpush3.bf16.msk.msra.mxu1 %vm9751_vm13, %v10457_v19  ;;  %vm9625_vm0 = vmpackc.low %vm2630_vm9, %vm2627_vm8  ;;  %vm2733_vm8 = vcmp.eq.s32.totalorder %v14441_v48, %v14444_v2  ;;  %vm2632_vm10 = vcmp.eq.s32.totalorder %v14426_v23, %v14445_v1  ;;  %vm2682_vm13 = vcmp.eq.s32.totalorder %v11254_v46, %v14444_v2 }
 0x1ca   : > { %9626 = vmatprep.subr.msk.bf16.mxu0 %vm9625_vm0, %v10457_v19  ;;  %vm9753_vm3 = vmpackc.low %vm2727_vm12, %vm2724_vm11  ;;  %vm2635_vm11 = vcmp.eq.s32.totalorder %v14427_v55, %v14445_v1  ;;  %vm2639_vm0 = vcmp.eq.s32.totalorder %v14430_v9, %v14443_v41 }
 0x1cb   : > { %9754 = vmatprep.subr.msk.bf16.mxu1 %vm9753_vm3, %v10457_v19  ;;  %vm9627_vm6 = vmpackc.low %vm2629_vm15, %vm2626_vm14  ;;  %vm2685_vm14 = vcmp.eq.s32.totalorder %v11257_v5, %v14444_v2  ;;  %vm2736_vm3 = vcmp.eq.s32.totalorder %v14442_v8, %v14444_v2 }
 0x1cc   : > { %vm9755_vm9 = vmpackc.low %vm2679_vm2, %vm2676_vm1  ;;  %vm2642_vm1 = vcmp.eq.s32.totalorder %v14431_v43, %v14443_v41 }
 0x1cd   : > { %9628 = vmatpush1.bf16.msk.msra.mxu0 %vm9627_vm6, %v10457_v19  ;;  %9756 = vmatpush3.bf16.msk.msra.mxu1 %vm9755_vm9, %v10457_v19  ;;  %vm9629_vm12 = vmpackc.low %vm2636_vm5, %vm2633_vm4  ;;  %vm2739_vm4 = vcmp.eq.s32.totalorder %v14429_v14, %v14444_v2  ;;  %vm2638_vm6 = vcmp.eq.s32.totalorder %v14430_v9, %v14445_v1  ;;  %vm2688_vm9 = vcmp.eq.s32.totalorder %v11292_v24, %v14444_v2 }
 0x1ce   : > { %9630 = vmatprep.subr.msk.bf16.mxu0 %vm9629_vm12, %v10457_v19  ;;  %vm9757_vm15 = vmpackc.low %vm2733_vm8, %vm2730_vm7  ;;  %vm2641_vm7 = vcmp.eq.s32.totalorder %v14431_v43, %v14445_v1  ;;  %vm2645_vm12 = vcmp.eq.s32.totalorder %v10989_v34, %v14443_v41 }
 0x1cf   : > { %9758 = vmatprep.subr.msk.bf16.mxu1 %vm9757_vm15, %v10457_v19  ;;  %vm9631_vm2 = vmpackc.low %vm2635_vm11, %vm2632_vm10  ;;  %vm2691_vm10 = vcmp.eq.s32.totalorder %v11295_v42, %v14444_v2  ;;  %vm2742_vm15 = vcmp.eq.s32.totalorder %v11311_v21, %v14444_v2 }
 0x1d0   : > { %vm9759_vm5 = vmpackc.low %vm2685_vm14, %vm2682_vm13  ;;  %vm2648_vm13 = vcmp.eq.s32.totalorder %v10992_v47, %v14443_v41 }
 0x1d1   : > { %9632 = vmatpush1.bf16.msk.msra.mxu0 %vm9631_vm2, %v10457_v19  ;;  %9760 = vmatpush3.bf16.msk.msra.mxu1 %vm9759_vm5, %v10457_v19  ;;  %vm9633_vm8 = vmpackc.low %vm2642_vm1, %vm2639_vm0  ;;  %vm2745_vm0 = vcmp.eq.s32.totalorder %v14432_v35, %v14444_v2  ;;  %vm2644_vm2 = vcmp.eq.s32.totalorder %v10989_v34, %v14445_v1  ;;  %vm2694_vm5 = vcmp.eq.s32.totalorder %v11330_v0, %v14444_v2  ;;  %v14453_v34 = vld [vmem:[#allocation17_spill] sm:$0xff] }
 0x1d2   : > { %9634 = vmatprep.subr.msk.bf16.mxu0 %vm9633_vm8, %v10457_v19  ;;  %vm9761_vm11 = vmpackc.low %vm2739_vm4, %vm2736_vm3  ;;  %vm2647_vm3 = vcmp.eq.s32.totalorder %v10992_v47, %v14445_v1  ;;  %vm2651_vm8 = vcmp.eq.s32.totalorder %v11027_v44, %v14443_v41  ;;  %v14452_v47 = vld [vmem:[#allocation12_spill] sm:$0xff] }
 0x1d3   : > { %9762 = vmatprep.subr.msk.bf16.mxu1 %vm9761_vm11, %v10457_v19  ;;  %v8809_v43 = vpop.f32.mrb[0].mxu1  ;;  %vm9635_vm14 = vmpackc.low %vm2641_vm7, %vm2638_vm6  ;;  %vm2697_vm6 = vcmp.eq.s32.totalorder %v11333_v60, %v14444_v2  ;;  %vm2748_vm11 = vcmp.eq.s32.totalorder %v11349_v31, %v14444_v2 }
 0x1d4   : > { %vm9763_vm1 = vmpackc.low %vm2691_vm10, %vm2688_vm9  ;;  %v8810_v9 = vpop.f32.mrb[1].mxu1  ;;  %vm2654_vm9 = vcmp.eq.s32.totalorder %v11030_v50, %v14443_v41 }
 0x1d5   : > { %9636 = vmatpush1.bf16.msk.msra.mxu0 %vm9635_vm14, %v10457_v19  ;;  %9764 = vmatpush3.bf16.msk.msra.mxu1 %vm9763_vm1, %v10457_v19  ;;  %v12357_v14 = vadd.f32 %v8810_v9, %v8809_v43  ;;  %vm9637_vm4 = vmpackc.low %vm2648_vm13, %vm2645_vm12  ;;  %v12370_v43 = vrot.slane %v14453_v34, %v14452_v47  ;;  %vm2751_vm12 = vcmp.eq.s32.totalorder %v11352_v30, %v14444_v2  ;;  %v14454_v9 = vld [vmem:[#allocation15_spill] sm:$0xff] }
 0x1d6   : > { %9638 = vmatprep.subr.msk.bf16.mxu0 %vm9637_vm4, %v10457_v19  ;;  %vm9765_vm7 = vmpackc.low %vm2745_vm0, %vm2742_vm15  ;;  %vm2650_vm14 = vcmp.eq.s32.totalorder %v11027_v44, %v14445_v1  ;;  %vm2653_vm15 = vcmp.eq.s32.totalorder %v11030_v50, %v14445_v1  ;;  %v12383_v34 = vrot.slane %v14454_v9, %v14452_v47  ;;  %vm2700_vm1 = vcmp.eq.s32.totalorder %v11368_v37, %v14444_v2  ;;  %v14455_v47 = vld [vmem:[#allocation2_spill] sm:$0xff] }
 0x1d7   : > { %9766 = vmatprep.subr.msk.bf16.mxu1 %vm9765_vm7, %v10457_v19  ;;  %vm9639_vm10 = vmpackc.low %vm2647_vm3, %vm2644_vm2  ;;  %vm2703_vm2 = vcmp.eq.s32.totalorder %v11371_v28, %v14444_v2  ;;  %vm2657_vm4 = vcmp.eq.s32.totalorder %v11075_v16, %v14443_v41  ;;  %vm3503_vm7 = vcmp.eq.s32.totalorder %v14455_v47, %v12370_v43 }
 0x1d8   : > { %vm9767_vm13 = vmpackc.low %vm2697_vm6, %vm2694_vm5  ;;  %vm2660_vm5 = vcmp.eq.s32.totalorder %v11078_v39, %v14443_v41 }
 0x1d9   : > { %9640 = vmatpush1.bf16.msk.msra.mxu0 %vm9639_vm10, %v10457_v19  ;;  %9768 = vmatpush3.bf16.msk.msra.mxu1 %vm9767_vm13, %v10457_v19  ;;  %vm9641_vm0 = vmpackc.low %vm2654_vm9, %vm2651_vm8  ;;  %vm3506_vm8 = vcmp.eq.s32.totalorder %v10725_v51, %v12370_v43  ;;  %vm2656_vm10 = vcmp.eq.s32.totalorder %v11075_v16, %v14445_v1  ;;  %vm3502_vm13 = vcmp.eq.s32.totalorder %v14455_v47, %v12383_v34 }
 0x1da   : > { %9642 = vmatprep.subr.msk.bf16.mxu0 %vm9641_vm0, %v10457_v19  ;;  %vm9769_vm3 = vmpackc.low %vm2751_vm12, %vm2748_vm11  ;;  %vm2659_vm11 = vcmp.eq.s32.totalorder %v11078_v39, %v14445_v1  ;;  %vm2663_vm0 = vcmp.eq.s32.totalorder %v11117_v63, %v14443_v41 }
 0x1db   : > { %9770 = vmatprep.subr.msk.bf16.mxu1 %vm9769_vm3, %v10457_v19  ;;  %vm9643_vm6 = vmpackc.low %vm2653_vm15, %vm2650_vm14  ;;  %vm3505_vm14 = vcmp.eq.s32.totalorder %v10725_v51, %v12383_v34  ;;  %vm3509_vm3 = vcmp.eq.s32.totalorder %v10734_v58, %v12370_v43 }
 0x1dc   : > { %vm9771_vm9 = vmpackc.low %vm2703_vm2, %vm2700_vm1  ;;  %vm2666_vm1 = vcmp.eq.s32.totalorder %v11125_v61, %v14443_v41 }
 0x1dd   : > { %9644 = vmatpush1.bf16.msk.msra.mxu0 %vm9643_vm6, %v10457_v19  ;;  %9772 = vmatpush3.bf16.msk.msra.mxu1 %vm9771_vm9, %v10457_v19  ;;  %vm9645_vm12 = vmpackc.low %vm2660_vm5, %vm2657_vm4  ;;  %vm3512_vm4 = vcmp.eq.s32.totalorder %v10737_v45, %v12370_v43  ;;  %vm2662_vm6 = vcmp.eq.s32.totalorder %v11117_v63, %v14445_v1  ;;  %vm3508_vm9 = vcmp.eq.s32.totalorder %v10734_v58, %v12383_v34 }
 0x1de   : > { %9646 = vmatprep.subr.msk.bf16.mxu0 %vm9645_vm12, %v10457_v19  ;;  %vm9773_vm15 = vmpackc.low %vm3506_vm8, %vm3503_vm7  ;;  %vm2665_vm7 = vcmp.eq.s32.totalorder %v11125_v61, %v14445_v1  ;;  %vm2669_vm12 = vcmp.eq.s32.totalorder %v11171_v6, %v14443_v41 }
 0x1df   : > { %9774 = vmatprep.subr.msk.bf16.mxu1 %vm9773_vm15, %v10457_v19  ;;  %vm9647_vm2 = vmpackc.low %vm2659_vm11, %vm2656_vm10  ;;  %vm3511_vm10 = vcmp.eq.s32.totalorder %v10737_v45, %v12383_v34  ;;  %vm3515_vm15 = vcmp.eq.s32.totalorder %v10790_v20, %v12370_v43 }
 0x1e0   : > { %3413 = vmatmul.mubr.f32.vlgmr.msra.gmra.mrb[8].mxu1 %v12080_v12  ;;  %3201 = vmatmul.mubr.f32.vlgmr.msra.gmra.mrb[6].mxu0 %v12247_v53  ;;  %vm9775_vm5 = vmpackc.low %vm3505_vm14, %vm3502_vm13  ;;  %vm2672_vm13 = vcmp.eq.s32.totalorder %v14449_v40, %v14443_v41 }
 0x1e1   : > { %9648 = vmatpush1.bf16.msk.msra.mxu0 %vm9647_vm2, %v10457_v19  ;;  %9776 = vmatpush1.bf16.msk.msra.mxu1 %vm9775_vm5, %v10457_v19  ;;  %vm9649_vm8 = vmpackc.low %vm2666_vm1, %vm2663_vm0  ;;  %vm3518_vm0 = vcmp.eq.s32.totalorder %v10832_v22, %v12370_v43  ;;  %vm2668_vm2 = vcmp.eq.s32.totalorder %v11171_v6, %v14445_v1  ;;  %vm3514_vm5 = vcmp.eq.s32.totalorder %v10790_v20, %v12383_v34 }
 0x1e2   : > { %9650 = vmatprep.subr.msk.bf16.mxu0 %vm9649_vm8, %v10457_v19  ;;  %vm9777_vm11 = vmpackc.low %vm3512_vm4, %vm3509_vm3  ;;  %3271 = vmatprep.mubr.f32.mxu0 %v14447_v18  ;;  %vm2671_vm3 = vcmp.eq.s32.totalorder %v14449_v40, %v14445_v1  ;;  %vm2675_vm8 = vcmp.eq.s32.totalorder %v11216_v10, %v14443_v41 }
 0x1e3   : > { %9778 = vmatprep.subr.msk.bf16.mxu1 %vm9777_vm11, %v10457_v19  ;;  %vm9651_vm14 = vmpackc.low %vm2665_vm7, %vm2662_vm6  ;;  %4142 = vmatprep.mubr.f32.mxu1 %v10522_v7  ;;  %vm3517_vm6 = vcmp.eq.s32.totalorder %v10832_v22, %v12383_v34  ;;  %vm3521_vm11 = vcmp.eq.s32.totalorder %v10864_v15, %v12370_v43 }
 0x1e4   : > { %vm9779_vm1 = vmpackc.low %vm3511_vm10, %vm3508_vm9  ;;  %vm2678_vm9 = vcmp.eq.s32.totalorder %v14451_v13, %v14443_v41 }
 0x1e5   : > { %9652 = vmatpush1.bf16.msk.msra.mxu0 %vm9651_vm14, %v10457_v19  ;;  %9780 = vmatpush1.bf16.msk.msra.mxu1 %vm9779_vm1, %v10457_v19  ;;  %vm9653_vm4 = vmpackc.low %vm2672_vm13, %vm2669_vm12  ;;  %vm3524_vm12 = vcmp.eq.s32.totalorder %v10867_v56, %v12370_v43  ;;  %vm2674_vm14 = vcmp.eq.s32.totalorder %v11216_v10, %v14445_v1  ;;  %vm3520_vm1 = vcmp.eq.s32.totalorder %v10864_v15, %v12383_v34 }
 0x1e6   : > { %9654 = vmatprep.subr.msk.bf16.mxu0 %vm9653_vm4, %v10457_v19  ;;  %vm9781_vm7 = vmpackc.low %vm3518_vm0, %vm3515_vm15  ;;  %vm2677_vm15 = vcmp.eq.s32.totalorder %v14451_v13, %v14445_v1  ;;  %vm2681_vm4 = vcmp.eq.s32.totalorder %v11254_v46, %v14443_v41 }
 0x1e7   : > { %9782 = vmatprep.subr.msk.bf16.mxu1 %vm9781_vm7, %v10457_v19  ;;  %vm9655_vm10 = vmpackc.low %vm2671_vm3, %vm2668_vm2  ;;  %vm3523_vm2 = vcmp.eq.s32.totalorder %v10867_v56, %v12383_v34  ;;  %vm3527_vm7 = vcmp.eq.s32.totalorder %v10902_v17, %v12370_v43 }
 0x1e8   : > { %vm9783_vm13 = vmpackc.low %vm3517_vm6, %vm3514_vm5  ;;  %vm2684_vm5 = vcmp.eq.s32.totalorder %v11257_v5, %v14443_v41 }
 0x1e9   : > { %9656 = vmatpush1.bf16.msk.msra.mxu0 %vm9655_vm10, %v10457_v19  ;;  %9784 = vmatpush1.bf16.msk.msra.mxu1 %vm9783_vm13, %v10457_v19  ;;  %vm9657_vm0 = vmpackc.low %vm2678_vm9, %vm2675_vm8  ;;  %vm3530_vm8 = vcmp.eq.s32.totalorder %v10905_v49, %v12370_v43  ;;  %vm2680_vm10 = vcmp.eq.s32.totalorder %v11254_v46, %v14445_v1  ;;  %vm3526_vm13 = vcmp.eq.s32.totalorder %v10902_v17, %v12383_v34 }
 0x1ea   : > { %9658 = vmatprep.subr.msk.bf16.mxu0 %vm9657_vm0, %v10457_v19  ;;  %vm9785_vm3 = vmpackc.low %vm3524_vm12, %vm3521_vm11  ;;  %vm2683_vm11 = vcmp.eq.s32.totalorder %v11257_v5, %v14445_v1  ;;  %vm2687_vm0 = vcmp.eq.s32.totalorder %v11292_v24, %v14443_v41 }
 0x1eb   : > { %9786 = vmatprep.subr.msk.bf16.mxu1 %vm9785_vm3, %v10457_v19  ;;  %vm9659_vm6 = vmpackc.low %vm2677_vm15, %vm2674_vm14  ;;  %vm3529_vm14 = vcmp.eq.s32.totalorder %v10905_v49, %v12383_v34  ;;  %vm3533_vm3 = vcmp.eq.s32.totalorder %v10940_v25, %v12370_v43 }
 0x1ec   : > { %vm9787_vm9 = vmpackc.low %vm3523_vm2, %vm3520_vm1  ;;  %vm2690_vm1 = vcmp.eq.s32.totalorder %v11295_v42, %v14443_v41 }
 0x1ed   : > { %9660 = vmatpush1.bf16.msk.msra.mxu0 %vm9659_vm6, %v10457_v19  ;;  %9788 = vmatpush1.bf16.msk.msra.mxu1 %vm9787_vm9, %v10457_v19  ;;  %vm9661_vm12 = vmpackc.low %vm2684_vm5, %vm2681_vm4  ;;  %vm3536_vm4 = vcmp.eq.s32.totalorder %v10943_v26, %v12370_v43  ;;  %vm2686_vm6 = vcmp.eq.s32.totalorder %v11292_v24, %v14445_v1  ;;  %vm3532_vm9 = vcmp.eq.s32.totalorder %v10940_v25, %v12383_v34 }
 0x1ee   : > { %9662 = vmatprep.subr.msk.bf16.mxu0 %vm9661_vm12, %v10457_v19  ;;  %vm9789_vm15 = vmpackc.low %vm3530_vm8, %vm3527_vm7  ;;  %vm2689_vm7 = vcmp.eq.s32.totalorder %v11295_v42, %v14445_v1  ;;  %vm2693_vm12 = vcmp.eq.s32.totalorder %v11330_v0, %v14443_v41 }
 0x1ef   : > { %9790 = vmatprep.subr.msk.bf16.mxu1 %vm9789_vm15, %v10457_v19  ;;  %vm9663_vm2 = vmpackc.low %vm2683_vm11, %vm2680_vm10  ;;  %vm3535_vm10 = vcmp.eq.s32.totalorder %v10943_v26, %v12383_v34  ;;  %vm3539_vm15 = vcmp.eq.s32.totalorder %v10978_v32, %v12370_v43 }
 0x1f0   : > { %vm9791_vm5 = vmpackc.low %vm3529_vm14, %vm3526_vm13  ;;  %vm2696_vm13 = vcmp.eq.s32.totalorder %v11333_v60, %v14443_v41 }
 0x1f1   : > { %9664 = vmatpush1.bf16.msk.msra.mxu0 %vm9663_vm2, %v10457_v19  ;;  %9792 = vmatpush1.bf16.msk.msra.mxu1 %vm9791_vm5, %v10457_v19  ;;  %vm9665_vm8 = vmpackc.low %vm2690_vm1, %vm2687_vm0  ;;  %vm3542_vm0 = vcmp.eq.s32.totalorder %v10981_v33, %v12370_v43  ;;  %vm2692_vm2 = vcmp.eq.s32.totalorder %v11330_v0, %v14445_v1  ;;  %vm3538_vm5 = vcmp.eq.s32.totalorder %v10978_v32, %v12383_v34 }
 0x1f2   : > { %9666 = vmatprep.subr.msk.bf16.mxu0 %vm9665_vm8, %v10457_v19  ;;  %vm9793_vm11 = vmpackc.low %vm3536_vm4, %vm3533_vm3  ;;  %vm2695_vm3 = vcmp.eq.s32.totalorder %v11333_v60, %v14445_v1  ;;  %vm2699_vm8 = vcmp.eq.s32.totalorder %v11368_v37, %v14443_v41 }
 0x1f3   : > { %9794 = vmatprep.subr.msk.bf16.mxu1 %vm9793_vm11, %v10457_v19  ;;  %v8844_v12 = vpop.f32.mrb[2].mxu1  ;;  %vm9667_vm14 = vmpackc.low %vm2689_vm7, %vm2686_vm6  ;;  %vm3541_vm6 = vcmp.eq.s32.totalorder %v10981_v33, %v12383_v34  ;;  %vm3545_vm11 = vcmp.eq.s32.totalorder %v11016_v52, %v12370_v43 }
 0x1f4   : > { %v8845_v2 = vpop.f32.mrb[3].mxu1  ;;  %vm9795_vm1 = vmpackc.low %vm3535_vm10, %vm3532_vm9  ;;  %vm2702_vm9 = vcmp.eq.s32.totalorder %v11371_v28, %v14443_v41 }
 0x1f5   : > { %v8846_v9 = vadd.f32 %v8845_v2, %v8844_v12  ;;  %9668 = vmatpush1.bf16.msk.msra.mxu0 %vm9667_vm14, %v10457_v19  ;;  %9796 = vmatpush1.bf16.msk.msra.mxu1 %vm9795_vm1, %v10457_v19  ;;  %vm9669_vm4 = vmpackc.low %vm2696_vm13, %vm2693_vm12  ;;  %vm3548_vm12 = vcmp.eq.s32.totalorder %v11019_v54, %v12370_v43  ;;  %vm2698_vm14 = vcmp.eq.s32.totalorder %v11368_v37, %v14445_v1  ;;  %v14458_v2 = vld [vmem:[#allocation14_spill] sm:$0xff] }
 0x1f6   : > { %9670 = vmatprep.subr.msk.bf16.mxu0 %vm9669_vm4, %v10457_v19  ;;  %vm9797_vm7 = vmpackc.low %vm3542_vm0, %vm3539_vm15  ;;  %vm2701_vm15 = vcmp.eq.s32.totalorder %v11371_v28, %v14445_v1  ;;  %vm3544_vm1 = vcmp.eq.s32.totalorder %v11016_v52, %v12383_v34  ;;  %vm2705_vm4 = vcmp.eq.s32.totalorder %v11059_v38, %v14443_v41 }
 0x1f7   : > { %v12541_v12 = vadd.f32 %v8846_v9, %v12357_v14  ;;  %9798 = vmatprep.subr.msk.bf16.mxu1 %vm9797_vm7, %v10457_v19  ;;  %vm9671_vm10 = vmpackc.low %vm2695_vm3, %vm2692_vm2  ;;  %vm3547_vm2 = vcmp.eq.s32.totalorder %v11019_v54, %v12383_v34  ;;  %v14457_v14 = vld [vmem:[#allocation13_spill] sm:$0xff]  ;;  %v14459_v9 = vld [vmem:[#allocation16_spill] sm:$0xff] }
 0x1f8   : > { %vm9799_vm13 = vmpackc.low %vm3541_vm6, %vm3538_vm5  ;;  %vm2708_vm5 = vcmp.eq.s32.totalorder %v11062_v36, %v14443_v41  ;;  %vm3551_vm7 = vcmp.eq.s32.totalorder %v14457_v14, %v12370_v43 }
 0x1f9   : > { %14456 = vst [vmem:[#allocation59_spill] sm:$0xff] %v12541_v12  ;;  %9672 = vmatpush1.bf16.msk.msra.mxu0 %vm9671_vm10, %v10457_v19  ;;  %9800 = vmatpush1.bf16.msk.msra.mxu1 %vm9799_vm13, %v10457_v19  ;;  %vm9673_vm0 = vmpackc.low %vm2702_vm9, %vm2699_vm8  ;;  %vm3554_vm8 = vcmp.eq.s32.totalorder %v14458_v2, %v12370_v43  ;;  %vm2704_vm10 = vcmp.eq.s32.totalorder %v11059_v38, %v14445_v1  ;;  %v14460_v12 = vld [vmem:[#allocation24_spill] sm:$0xff] }
 0x1fa   : > { %9674 = vmatprep.subr.msk.bf16.mxu0 %vm9673_vm0, %v10457_v19  ;;  %vm9801_vm3 = vmpackc.low %vm3548_vm12, %vm3545_vm11  ;;  %vm2707_vm11 = vcmp.eq.s32.totalorder %v11062_v36, %v14445_v1  ;;  %vm3550_vm13 = vcmp.eq.s32.totalorder %v14457_v14, %v12383_v34  ;;  %vm2711_vm0 = vcmp.eq.s32.totalorder %v14446_v57, %v14443_v41  ;;  %v14461_v36 = vld [vmem:[#allocation47_spill] sm:$0xff] }
 0x1fb   : > { %9802 = vmatprep.subr.msk.bf16.mxu1 %vm9801_vm3, %v10457_v19  ;;  %vm9675_vm6 = vmpackc.low %vm2701_vm15, %vm2698_vm14  ;;  %vm3553_vm14 = vcmp.eq.s32.totalorder %v14458_v2, %v12383_v34  ;;  %vm3557_vm3 = vcmp.eq.s32.totalorder %v14459_v9, %v12370_v43 }
 0x1fc   : > { %vm9803_vm9 = vmpackc.low %vm3547_vm2, %vm3544_vm1  ;;  %vm2714_vm1 = vcmp.eq.s32.totalorder %v14435_v4, %v14443_v41 }
 0x1fd   : > { %9676 = vmatpush1.bf16.msk.msra.mxu0 %vm9675_vm6, %v10457_v19  ;;  %9804 = vmatpush1.bf16.msk.msra.mxu1 %vm9803_vm9, %v10457_v19  ;;  %vm9677_vm12 = vmpackc.low %vm2708_vm5, %vm2705_vm4  ;;  %vm3560_vm4 = vcmp.eq.s32.totalorder %v14460_v12, %v12370_v43  ;;  %vm2710_vm6 = vcmp.eq.s32.totalorder %v14446_v57, %v14445_v1  ;;  %vm3556_vm9 = vcmp.eq.s32.totalorder %v14459_v9, %v12383_v34  ;;  %v14463_v57 = vld [vmem:[#allocation50_spill] sm:$0xff] }
 0x1fe   : > { %9678 = vmatprep.subr.msk.bf16.mxu0 %vm9677_vm12, %v10457_v19  ;;  %vm9805_vm15 = vmpackc.low %vm3554_vm8, %vm3551_vm7  ;;  %vm2713_vm7 = vcmp.eq.s32.totalorder %v14435_v4, %v14445_v1  ;;  %vm2717_vm12 = vcmp.eq.s32.totalorder %v14461_v36, %v14443_v41  ;;  %v14462_v4 = vld [vmem:[#allocation30_spill] sm:$0xff] }
 0x1ff   : > { %9806 = vmatprep.subr.msk.bf16.mxu1 %vm9805_vm15, %v10457_v19  ;;  %vm9679_vm2 = vmpackc.low %vm2707_vm11, %vm2704_vm10  ;;  %vm3559_vm10 = vcmp.eq.s32.totalorder %v14460_v12, %v12383_v34  ;;  %vm3563_vm15 = vcmp.eq.s32.totalorder %v10840_v11, %v12370_v43 }
 0x200   : > { %vm9807_vm5 = vmpackc.low %vm3553_vm14, %vm3550_vm13  ;;  %vm2720_vm13 = vcmp.eq.s32.totalorder %v14437_v3, %v14443_v41 }
 0x201   : > { %9680 = vmatpush1.bf16.msk.msra.mxu0 %vm9679_vm2, %v10457_v19  ;;  %9808 = vmatpush1.bf16.msk.msra.mxu1 %vm9807_vm5, %v10457_v19  ;;  %vm9681_vm8 = vmpackc.low %vm2714_vm1, %vm2711_vm0  ;;  %vm3566_vm0 = vcmp.eq.s32.totalorder %v14462_v4, %v12370_v43  ;;  %vm2716_vm2 = vcmp.eq.s32.totalorder %v14461_v36, %v14445_v1  ;;  %vm3562_vm5 = vcmp.eq.s32.totalorder %v10840_v11, %v12383_v34 }
 0x202   : > { %9682 = vmatprep.subr.msk.bf16.mxu0 %vm9681_vm8, %v10457_v19  ;;  %vm9809_vm11 = vmpackc.low %vm3560_vm4, %vm3557_vm3  ;;  %vm2719_vm3 = vcmp.eq.s32.totalorder %v14437_v3, %v14445_v1  ;;  %vm2723_vm8 = vcmp.eq.s32.totalorder %v14463_v57, %v14443_v41 }
 0x203   : > { %9810 = vmatprep.subr.msk.bf16.mxu1 %vm9809_vm11, %v10457_v19  ;;  %vm9683_vm14 = vmpackc.low %vm2713_vm7, %vm2710_vm6  ;;  %vm3565_vm6 = vcmp.eq.s32.totalorder %v14462_v4, %v12383_v34  ;;  %vm3569_vm11 = vcmp.eq.s32.totalorder %v10875_v59, %v12370_v43 }
 0x204   : > { %vm9811_vm1 = vmpackc.low %vm3559_vm10, %vm3556_vm9  ;;  %vm2726_vm9 = vcmp.eq.s32.totalorder %v14439_v27, %v14443_v41 }
 0x205   : > { %9684 = vmatpush1.bf16.msk.msra.mxu0 %vm9683_vm14, %v10457_v19  ;;  %9812 = vmatpush1.bf16.msk.msra.mxu1 %vm9811_vm1, %v10457_v19  ;;  %vm9685_vm4 = vmpackc.low %vm2720_vm13, %vm2717_vm12  ;;  %vm3572_vm12 = vcmp.eq.s32.totalorder %v10878_v62, %v12370_v43  ;;  %vm2722_vm14 = vcmp.eq.s32.totalorder %v14463_v57, %v14445_v1  ;;  %vm3568_vm1 = vcmp.eq.s32.totalorder %v10875_v59, %v12383_v34 }
 0x206   : > { %9686 = vmatprep.subr.msk.bf16.mxu0 %vm9685_vm4, %v10457_v19  ;;  %vm9813_vm7 = vmpackc.low %vm3566_vm0, %vm3563_vm15  ;;  %vm2725_vm15 = vcmp.eq.s32.totalorder %v14439_v27, %v14445_v1  ;;  %vm2729_vm4 = vcmp.eq.s32.totalorder %v14440_v29, %v14443_v41  ;;  %v14466_v27 = vld [vmem:[#allocation38_spill] sm:$0xff] }
 0x207   : > { %9814 = vmatprep.subr.msk.bf16.mxu1 %vm9813_vm7, %v10457_v19  ;;  %vm9687_vm10 = vmpackc.low %vm2719_vm3, %vm2716_vm2  ;;  %vm3571_vm2 = vcmp.eq.s32.totalorder %v10878_v62, %v12383_v34  ;;  %vm3575_vm7 = vcmp.eq.s32.totalorder %v14426_v23, %v12370_v43 }
 0x208   : > { %vm9815_vm13 = vmpackc.low %vm3565_vm6, %vm3562_vm5  ;;  %vm2732_vm5 = vcmp.eq.s32.totalorder %v14441_v48, %v14443_v41 }
 0x209   : > { %9688 = vmatpush1.bf16.msk.msra.mxu0 %vm9687_vm10, %v10457_v19  ;;  %9816 = vmatpush1.bf16.msk.msra.mxu1 %vm9815_vm13, %v10457_v19  ;;  %vm9689_vm0 = vmpackc.low %vm2726_vm9, %vm2723_vm8  ;;  %vm3578_vm8 = vcmp.eq.s32.totalorder %v14427_v55, %v12370_v43  ;;  %vm2728_vm10 = vcmp.eq.s32.totalorder %v14440_v29, %v14445_v1  ;;  %vm3574_vm13 = vcmp.eq.s32.totalorder %v14426_v23, %v12383_v34  ;;  %v14464_v29 = vld [vmem:[#allocation56_spill] sm:$0xff] }
 0x20a   : > { %9690 = vmatprep.subr.msk.bf16.mxu0 %vm9689_vm0, %v10457_v19  ;;  %vm9817_vm3 = vmpackc.low %vm3572_vm12, %vm3569_vm11  ;;  %vm2731_vm11 = vcmp.eq.s32.totalorder %v14441_v48, %v14445_v1  ;;  %vm2735_vm0 = vcmp.eq.s32.totalorder %v14442_v8, %v14443_v41  ;;  %v14465_v48 = vld [vmem:[#allocation37_spill] sm:$0xff] }
 0x20b   : > { %9818 = vmatprep.subr.msk.bf16.mxu1 %vm9817_vm3, %v10457_v19  ;;  %vm9691_vm6 = vmpackc.low %vm2725_vm15, %vm2722_vm14  ;;  %vm3577_vm14 = vcmp.eq.s32.totalorder %v14427_v55, %v12383_v34  ;;  %vm3581_vm3 = vcmp.eq.s32.totalorder %v14465_v48, %v12370_v43 }
 0x20c   : > { %vm9819_vm9 = vmpackc.low %vm3571_vm2, %vm3568_vm1  ;;  %vm2738_vm1 = vcmp.eq.s32.totalorder %v14464_v29, %v14443_v41 }
 0x20d   : > { %9692 = vmatpush1.bf16.msk.msra.mxu0 %vm9691_vm6, %v10457_v19  ;;  %9820 = vmatpush1.bf16.msk.msra.mxu1 %vm9819_vm9, %v10457_v19  ;;  %vm9693_vm12 = vmpackc.low %vm2732_vm5, %vm2729_vm4  ;;  %vm3584_vm4 = vcmp.eq.s32.totalorder %v14466_v27, %v12370_v43  ;;  %vm2734_vm6 = vcmp.eq.s32.totalorder %v14442_v8, %v14445_v1  ;;  %vm3580_vm9 = vcmp.eq.s32.totalorder %v14465_v48, %v12383_v34  ;;  %v14468_v8 = vld [vmem:[#allocation40_spill] sm:$0xff] }
 0x20e   : > { %9694 = vmatprep.subr.msk.bf16.mxu0 %vm9693_vm12, %v10457_v19  ;;  %vm9821_vm15 = vmpackc.low %vm3578_vm8, %vm3575_vm7  ;;  %vm2737_vm7 = vcmp.eq.s32.totalorder %v14464_v29, %v14445_v1  ;;  %vm2741_vm12 = vcmp.eq.s32.totalorder %v11311_v21, %v14443_v41  ;;  %v14467_v29 = vld [vmem:[#allocation39_spill] sm:$0xff] }
 0x20f   : > { %9822 = vmatprep.subr.msk.bf16.mxu1 %vm9821_vm15, %v10457_v19  ;;  %vm9695_vm2 = vmpackc.low %vm2731_vm11, %vm2728_vm10  ;;  %vm3583_vm10 = vcmp.eq.s32.totalorder %v14466_v27, %v12383_v34  ;;  %vm3587_vm15 = vcmp.eq.s32.totalorder %v14467_v29, %v12370_v43 }
 0x210   : > { %vm9823_vm5 = vmpackc.low %vm3577_vm14, %vm3574_vm13  ;;  %vm2744_vm13 = vcmp.eq.s32.totalorder %v14432_v35, %v14443_v41 }
 0x211   : > { %9696 = vmatpush1.bf16.msk.msra.mxu0 %vm9695_vm2, %v10457_v19  ;;  %9824 = vmatpush1.bf16.msk.msra.mxu1 %vm9823_vm5, %v10457_v19  ;;  %vm9697_vm8 = vmpackc.low %vm2738_vm1, %vm2735_vm0  ;;  %vm3590_vm0 = vcmp.eq.s32.totalorder %v14468_v8, %v12370_v43  ;;  %vm2740_vm2 = vcmp.eq.s32.totalorder %v11311_v21, %v14445_v1  ;;  %vm3586_vm5 = vcmp.eq.s32.totalorder %v14467_v29, %v12383_v34 }
 0x212   : > { %9698 = vmatprep.subr.msk.bf16.mxu0 %vm9697_vm8, %v10457_v19  ;;  %vm9825_vm11 = vmpackc.low %vm3584_vm4, %vm3581_vm3  ;;  %vm2743_vm3 = vcmp.eq.s32.totalorder %v14432_v35, %v14445_v1  ;;  %vm2747_vm8 = vcmp.eq.s32.totalorder %v11349_v31, %v14443_v41 }
 0x213   : > { %9826 = vmatprep.subr.msk.bf16.mxu1 %vm9825_vm11, %v10457_v19  ;;  %vm9699_vm14 = vmpackc.low %vm2737_vm7, %vm2734_vm6  ;;  %vm3589_vm6 = vcmp.eq.s32.totalorder %v14468_v8, %v12383_v34  ;;  %vm3593_vm11 = vcmp.eq.s32.totalorder %v11027_v44, %v12370_v43 }
 0x214   : > { %vm9827_vm1 = vmpackc.low %vm3583_vm10, %vm3580_vm9  ;;  %vm2750_vm9 = vcmp.eq.s32.totalorder %v11352_v30, %v14443_v41  ;;  %v14469_v41 = vld [vmem:[#allocation22_spill] sm:$0xff] }
 0x215   : > { %9700 = vmatpush1.bf16.msk.msra.mxu0 %vm9699_vm14, %v10457_v19  ;;  %9828 = vmatpush1.bf16.msk.msra.mxu1 %vm9827_vm1, %v10457_v19  ;;  %vm9701_vm4 = vmpackc.low %vm2744_vm13, %vm2741_vm12  ;;  %vm3596_vm12 = vcmp.eq.s32.totalorder %v11030_v50, %v12370_v43  ;;  %vm2746_vm14 = vcmp.eq.s32.totalorder %v11349_v31, %v14445_v1  ;;  %vm3592_vm1 = vcmp.eq.s32.totalorder %v11027_v44, %v12383_v34 }
 0x216   : > { %9702 = vmatprep.subr.msk.bf16.mxu0 %vm9701_vm4, %v10457_v19  ;;  %vm9829_vm7 = vmpackc.low %vm3590_vm0, %vm3587_vm15  ;;  %vm2749_vm15 = vcmp.eq.s32.totalorder %v11352_v30, %v14445_v1  ;;  %vm3599_vm4 = vcmp.eq.s32.totalorder %v11075_v16, %v12370_v43  ;;  %v12749_v1 = vld [vmem:[%s10515_s30 + $0x8] sm:$0xff] }
 0x217   : > { %9830 = vmatprep.subr.msk.bf16.mxu1 %vm9829_vm7, %v10457_v19  ;;  %vm9703_vm10 = vmpackc.low %vm2743_vm3, %vm2740_vm2  ;;  %vm3595_vm2 = vcmp.eq.s32.totalorder %v11030_v50, %v12383_v34  ;;  %vm3552_vm7 = vcmp.eq.s32.totalorder %v14457_v14, %v14469_v41 }
 0x218   : > { %vm9831_vm13 = vmpackc.low %vm3589_vm6, %vm3586_vm5  ;;  %vm3602_vm5 = vcmp.eq.s32.totalorder %v11078_v39, %v12370_v43 }
 0x219   : > { %9704 = vmatpush1.bf16.msk.msra.mxu0 %vm9703_vm10, %v10457_v19  ;;  %9832 = vmatpush1.bf16.msk.msra.mxu1 %vm9831_vm13, %v10457_v19  ;;  %vm9705_vm0 = vmpackc.low %vm2750_vm9, %vm2747_vm8  ;;  %vm3555_vm8 = vcmp.eq.s32.totalorder %v14458_v2, %v14469_v41  ;;  %vm3598_vm10 = vcmp.eq.s32.totalorder %v11075_v16, %v12383_v34  ;;  %vm3504_vm13 = vcmp.eq.s32.totalorder %v14455_v47, %v14469_v41 }
 0x21a   : > { %9706 = vmatprep.subr.msk.bf16.mxu0 %vm9705_vm0, %v10457_v19  ;;  %vm9833_vm3 = vmpackc.low %vm3596_vm12, %vm3593_vm11  ;;  %vm3601_vm11 = vcmp.eq.s32.totalorder %v11078_v39, %v12383_v34  ;;  %vm3605_vm0 = vcmp.eq.s32.totalorder %v11117_v63, %v12370_v43 }
 0x21b   : > { %9834 = vmatprep.subr.msk.bf16.mxu1 %vm9833_vm3, %v10457_v19  ;;  %vm9707_vm6 = vmpackc.low %vm2749_vm15, %vm2746_vm14  ;;  %vm3507_vm14 = vcmp.eq.s32.totalorder %v10725_v51, %v14469_v41  ;;  %vm3558_vm3 = vcmp.eq.s32.totalorder %v14459_v9, %v14469_v41 }
 0x21c   : > { %vm9835_vm9 = vmpackc.low %vm3595_vm2, %vm3592_vm1  ;;  %vm3608_vm1 = vcmp.eq.s32.totalorder %v11125_v61, %v12370_v43 }
 0x21d   : > { %9708 = vmatpush1.bf16.msk.msra.mxu0 %vm9707_vm6, %v10457_v19  ;;  %9836 = vmatpush1.bf16.msk.msra.mxu1 %vm9835_vm9, %v10457_v19  ;;  %vm9837_vm12 = vmpackc.low %vm3602_vm5, %vm3599_vm4  ;;  %vm3561_vm4 = vcmp.eq.s32.totalorder %v14460_v12, %v14469_v41  ;;  %vm3604_vm6 = vcmp.eq.s32.totalorder %v11117_v63, %v12383_v34  ;;  %vm3510_vm9 = vcmp.eq.s32.totalorder %v10734_v58, %v14469_v41 }
 0x21e   : > { %9838 = vmatprep.subr.msk.bf16.mxu1 %vm9837_vm12, %v10457_v19  ;;  %vm9901_vm15 = vmpackc.low %vm3555_vm8, %vm3552_vm7  ;;  %vm3607_vm7 = vcmp.eq.s32.totalorder %v11125_v61, %v12383_v34  ;;  %vm3611_vm12 = vcmp.eq.s32.totalorder %v11171_v6, %v12370_v43 }
 0x21f   : > { %9902 = vmatprep.subr.msk.bf16.mxu0 %vm9901_vm15, %v10457_v19  ;;  %vm9839_vm2 = vmpackc.low %vm3601_vm11, %vm3598_vm10  ;;  %vm3513_vm10 = vcmp.eq.s32.totalorder %v10737_v45, %v14469_v41  ;;  %vm3564_vm15 = vcmp.eq.s32.totalorder %v10840_v11, %v14469_v41 }
 0x220   : > { %3272 = vmatmul.mubr.f32.vlgmr.msra.gmra.mrb[6].mxu0 %v12749_v1  ;;  %4143 = vmatmul.mubr.f32.vlgmr.msra.gmra.mrb[10].mxu1 %v12247_v53  ;;  %vm9903_vm5 = vmpackc.low %vm3507_vm14, %vm3504_vm13  ;;  %vm3614_vm13 = vcmp.eq.s32.totalorder %v14449_v40, %v12370_v43 }
 0x221   : > { %9840 = vmatpush1.bf16.msk.msra.mxu1 %vm9839_vm2, %v10457_v19  ;;  %9904 = vmatpush3.bf16.msk.msra.mxu0 %vm9903_vm5, %v10457_v19  ;;  %vm9841_vm8 = vmpackc.low %vm3608_vm1, %vm3605_vm0  ;;  %vm3567_vm0 = vcmp.eq.s32.totalorder %v14462_v4, %v14469_v41  ;;  %vm3610_vm2 = vcmp.eq.s32.totalorder %v11171_v6, %v12383_v34  ;;  %vm3516_vm5 = vcmp.eq.s32.totalorder %v10790_v20, %v14469_v41 }
 0x222   : > { %9842 = vmatprep.subr.msk.bf16.mxu1 %vm9841_vm8, %v10457_v19  ;;  %vm9905_vm11 = vmpackc.low %vm3561_vm4, %vm3558_vm3  ;;  %4284 = vmatprep.mubr.f32.mxu0 %v10522_v7  ;;  %vm3613_vm3 = vcmp.eq.s32.totalorder %v14449_v40, %v12383_v34  ;;  %vm3617_vm8 = vcmp.eq.s32.totalorder %v11216_v10, %v12370_v43 }
 0x223   : > { %9906 = vmatprep.subr.msk.bf16.mxu0 %vm9905_vm11, %v10457_v19  ;;  %vm9843_vm14 = vmpackc.low %vm3607_vm7, %vm3604_vm6  ;;  %4213 = vmatprep.mubr.f32.mxu1 %v14447_v18  ;;  %vm3519_vm6 = vcmp.eq.s32.totalorder %v10832_v22, %v14469_v41  ;;  %vm3570_vm11 = vcmp.eq.s32.totalorder %v10875_v59, %v14469_v41 }
 0x224   : > { %vm9907_vm1 = vmpackc.low %vm3513_vm10, %vm3510_vm9  ;;  %vm3620_vm9 = vcmp.eq.s32.totalorder %v14451_v13, %v12370_v43 }
 0x225   : > { %9844 = vmatpush1.bf16.msk.msra.mxu1 %vm9843_vm14, %v10457_v19  ;;  %9908 = vmatpush3.bf16.msk.msra.mxu0 %vm9907_vm1, %v10457_v19  ;;  %vm9845_vm4 = vmpackc.low %vm3614_vm13, %vm3611_vm12  ;;  %vm3573_vm12 = vcmp.eq.s32.totalorder %v10878_v62, %v14469_v41  ;;  %vm3616_vm14 = vcmp.eq.s32.totalorder %v11216_v10, %v12383_v34  ;;  %vm3522_vm1 = vcmp.eq.s32.totalorder %v10864_v15, %v14469_v41 }
 0x226   : > { %9846 = vmatprep.subr.msk.bf16.mxu1 %vm9845_vm4, %v10457_v19  ;;  %vm9909_vm7 = vmpackc.low %vm3567_vm0, %vm3564_vm15  ;;  %vm3619_vm15 = vcmp.eq.s32.totalorder %v14451_v13, %v12383_v34  ;;  %vm3623_vm4 = vcmp.eq.s32.totalorder %v11254_v46, %v12370_v43 }
 0x227   : > { %9910 = vmatprep.subr.msk.bf16.mxu0 %vm9909_vm7, %v10457_v19  ;;  %vm9847_vm10 = vmpackc.low %vm3613_vm3, %vm3610_vm2  ;;  %vm3525_vm2 = vcmp.eq.s32.totalorder %v10867_v56, %v14469_v41  ;;  %vm3576_vm7 = vcmp.eq.s32.totalorder %v14426_v23, %v14469_v41 }
 0x228   : > { %vm9911_vm13 = vmpackc.low %vm3519_vm6, %vm3516_vm5  ;;  %vm3626_vm5 = vcmp.eq.s32.totalorder %v11257_v5, %v12370_v43 }
 0x229   : > { %9848 = vmatpush1.bf16.msk.msra.mxu1 %vm9847_vm10, %v10457_v19  ;;  %9912 = vmatpush3.bf16.msk.msra.mxu0 %vm9911_vm13, %v10457_v19  ;;  %vm9849_vm0 = vmpackc.low %vm3620_vm9, %vm3617_vm8  ;;  %vm3579_vm8 = vcmp.eq.s32.totalorder %v14427_v55, %v14469_v41  ;;  %vm3622_vm10 = vcmp.eq.s32.totalorder %v11254_v46, %v12383_v34  ;;  %vm3528_vm13 = vcmp.eq.s32.totalorder %v10902_v17, %v14469_v41 }
 0x22a   : > { %9850 = vmatprep.subr.msk.bf16.mxu1 %vm9849_vm0, %v10457_v19  ;;  %vm9913_vm3 = vmpackc.low %vm3573_vm12, %vm3570_vm11  ;;  %vm3625_vm11 = vcmp.eq.s32.totalorder %v11257_v5, %v12383_v34  ;;  %vm3629_vm0 = vcmp.eq.s32.totalorder %v11292_v24, %v12370_v43 }
 0x22b   : > { %9914 = vmatprep.subr.msk.bf16.mxu0 %vm9913_vm3, %v10457_v19  ;;  %vm9851_vm6 = vmpackc.low %vm3619_vm15, %vm3616_vm14  ;;  %vm3531_vm14 = vcmp.eq.s32.totalorder %v10905_v49, %v14469_v41  ;;  %vm3582_vm3 = vcmp.eq.s32.totalorder %v14465_v48, %v14469_v41 }
 0x22c   : > { %vm9915_vm9 = vmpackc.low %vm3525_vm2, %vm3522_vm1  ;;  %vm3632_vm1 = vcmp.eq.s32.totalorder %v11295_v42, %v12370_v43 }
 0x22d   : > { %9852 = vmatpush1.bf16.msk.msra.mxu1 %vm9851_vm6, %v10457_v19  ;;  %9916 = vmatpush3.bf16.msk.msra.mxu0 %vm9915_vm9, %v10457_v19  ;;  %vm9853_vm12 = vmpackc.low %vm3626_vm5, %vm3623_vm4  ;;  %vm3585_vm4 = vcmp.eq.s32.totalorder %v14466_v27, %v14469_v41  ;;  %vm3628_vm6 = vcmp.eq.s32.totalorder %v11292_v24, %v12383_v34  ;;  %vm3534_vm9 = vcmp.eq.s32.totalorder %v10940_v25, %v14469_v41 }
 0x22e   : > { %9854 = vmatprep.subr.msk.bf16.mxu1 %vm9853_vm12, %v10457_v19  ;;  %vm9917_vm15 = vmpackc.low %vm3579_vm8, %vm3576_vm7  ;;  %vm3631_vm7 = vcmp.eq.s32.totalorder %v11295_v42, %v12383_v34  ;;  %vm3635_vm12 = vcmp.eq.s32.totalorder %v11330_v0, %v12370_v43 }
 0x22f   : > { %9918 = vmatprep.subr.msk.bf16.mxu0 %vm9917_vm15, %v10457_v19  ;;  %vm9855_vm2 = vmpackc.low %vm3625_vm11, %vm3622_vm10  ;;  %vm3537_vm10 = vcmp.eq.s32.totalorder %v10943_v26, %v14469_v41  ;;  %vm3588_vm15 = vcmp.eq.s32.totalorder %v14467_v29, %v14469_v41 }
 0x230   : > { %vm9919_vm5 = vmpackc.low %vm3531_vm14, %vm3528_vm13  ;;  %vm3638_vm13 = vcmp.eq.s32.totalorder %v11333_v60, %v12370_v43 }
 0x231   : > { %9856 = vmatpush1.bf16.msk.msra.mxu1 %vm9855_vm2, %v10457_v19  ;;  %9920 = vmatpush3.bf16.msk.msra.mxu0 %vm9919_vm5, %v10457_v19  ;;  %vm9857_vm8 = vmpackc.low %vm3632_vm1, %vm3629_vm0  ;;  %vm3591_vm0 = vcmp.eq.s32.totalorder %v14468_v8, %v14469_v41  ;;  %vm3634_vm2 = vcmp.eq.s32.totalorder %v11330_v0, %v12383_v34  ;;  %vm3540_vm5 = vcmp.eq.s32.totalorder %v10978_v32, %v14469_v41 }
 0x232   : > { %9858 = vmatprep.subr.msk.bf16.mxu1 %vm9857_vm8, %v10457_v19  ;;  %vm9921_vm11 = vmpackc.low %vm3585_vm4, %vm3582_vm3  ;;  %v12846_v53 = vpop.f32.mrb[0].mxu0  ;;  %vm3637_vm3 = vcmp.eq.s32.totalorder %v11333_v60, %v12383_v34  ;;  %vm3641_vm8 = vcmp.eq.s32.totalorder %v11368_v37, %v12370_v43 }
 0x233   : > { %14470 = vst [vmem:[#allocation19_spill] sm:$0xff] %v12846_v53  ;;  %9922 = vmatprep.subr.msk.bf16.mxu0 %vm9921_vm11, %v10457_v19  ;;  %v12853_v27 = vpop.f32.mrb[1].mxu0  ;;  %vm9859_vm14 = vmpackc.low %vm3631_vm7, %vm3628_vm6  ;;  %vm3543_vm6 = vcmp.eq.s32.totalorder %v10981_v33, %v14469_v41  ;;  %vm3594_vm11 = vcmp.eq.s32.totalorder %v11027_v44, %v14469_v41  ;;  %v14473_v53 = vld [vmem:[#allocation44_spill] sm:$0xff] }
 0x234   : > { %14471 = vst [vmem:[#allocation48_spill] sm:$0xff] %v12853_v27  ;;  %vm9923_vm1 = vmpackc.low %vm3537_vm10, %vm3534_vm9  ;;  %vm3644_vm9 = vcmp.eq.s32.totalorder %v11371_v28, %v12370_v43  ;;  %v14472_v27 = vld [vmem:[#allocation42_spill] sm:$0xff] }
 0x235   : > { %9860 = vmatpush1.bf16.msk.msra.mxu1 %vm9859_vm14, %v10457_v19  ;;  %9924 = vmatpush3.bf16.msk.msra.mxu0 %vm9923_vm1, %v10457_v19  ;;  %vm9861_vm4 = vmpackc.low %vm3638_vm13, %vm3635_vm12  ;;  %vm3597_vm12 = vcmp.eq.s32.totalorder %v11030_v50, %v14469_v41  ;;  %vm3640_vm14 = vcmp.eq.s32.totalorder %v11368_v37, %v12383_v34  ;;  %vm3546_vm1 = vcmp.eq.s32.totalorder %v11016_v52, %v14469_v41 }
 0x236   : > { %9862 = vmatprep.subr.msk.bf16.mxu1 %vm9861_vm4, %v10457_v19  ;;  %vm9925_vm7 = vmpackc.low %vm3591_vm0, %vm3588_vm15  ;;  %vm3643_vm15 = vcmp.eq.s32.totalorder %v11371_v28, %v12383_v34  ;;  %vm3647_vm4 = vcmp.eq.s32.totalorder %v11059_v38, %v12370_v43 }
 0x237   : > { %9926 = vmatprep.subr.msk.bf16.mxu0 %vm9925_vm7, %v10457_v19  ;;  %vm9863_vm10 = vmpackc.low %vm3637_vm3, %vm3634_vm2  ;;  %vm3549_vm2 = vcmp.eq.s32.totalorder %v11019_v54, %v14469_v41  ;;  %vm3648_vm7 = vcmp.eq.s32.totalorder %v11059_v38, %v14469_v41 }
 0x238   : > { %vm9927_vm13 = vmpackc.low %vm3543_vm6, %vm3540_vm5  ;;  %vm3650_vm5 = vcmp.eq.s32.totalorder %v14472_v27, %v12370_v43 }
 0x239   : > { %9864 = vmatpush1.bf16.msk.msra.mxu1 %vm9863_vm10, %v10457_v19  ;;  %9928 = vmatpush3.bf16.msk.msra.mxu0 %vm9927_vm13, %v10457_v19  ;;  %vm9865_vm0 = vmpackc.low %vm3644_vm9, %vm3641_vm8  ;;  %vm3651_vm8 = vcmp.eq.s32.totalorder %v14472_v27, %v14469_v41  ;;  %vm3646_vm10 = vcmp.eq.s32.totalorder %v11059_v38, %v12383_v34  ;;  %vm3600_vm13 = vcmp.eq.s32.totalorder %v11075_v16, %v14469_v41  ;;  %v14474_v38 = vld [vmem:[#allocation45_spill] sm:$0xff]  ;;  %v12920_v16 = vld [vmem:[%s10515_s30] sm:$0xff] }
 0x23a   : > { %9866 = vmatprep.subr.msk.bf16.mxu1 %vm9865_vm0, %v10457_v19  ;;  %vm9929_vm3 = vmpackc.low %vm3597_vm12, %vm3594_vm11  ;;  %vm3649_vm11 = vcmp.eq.s32.totalorder %v14472_v27, %v12383_v34  ;;  %vm3653_vm0 = vcmp.eq.s32.totalorder %v14473_v53, %v12370_v43 }
 0x23b   : > { %9930 = vmatprep.subr.msk.bf16.mxu0 %vm9929_vm3, %v10457_v19  ;;  %vm9867_vm6 = vmpackc.low %vm3643_vm15, %vm3640_vm14  ;;  %vm3603_vm14 = vcmp.eq.s32.totalorder %v11078_v39, %v14469_v41  ;;  %vm3654_vm3 = vcmp.eq.s32.totalorder %v14473_v53, %v14469_v41 }
 0x23c   : > { %vm9931_vm9 = vmpackc.low %vm3549_vm2, %vm3546_vm1  ;;  %vm3656_vm1 = vcmp.eq.s32.totalorder %v14474_v38, %v12370_v43 }
 0x23d   : > { %9868 = vmatpush1.bf16.msk.msra.mxu1 %vm9867_vm6, %v10457_v19  ;;  %9932 = vmatpush3.bf16.msk.msra.mxu0 %vm9931_vm9, %v10457_v19  ;;  %vm9869_vm12 = vmpackc.low %vm3650_vm5, %vm3647_vm4  ;;  %vm3657_vm4 = vcmp.eq.s32.totalorder %v14474_v38, %v14469_v41  ;;  %vm3652_vm6 = vcmp.eq.s32.totalorder %v14473_v53, %v12383_v34  ;;  %vm3606_vm9 = vcmp.eq.s32.totalorder %v11117_v63, %v14469_v41 }
 0x23e   : > { %9870 = vmatprep.subr.msk.bf16.mxu1 %vm9869_vm12, %v10457_v19  ;;  %vm9933_vm15 = vmpackc.low %vm3651_vm8, %vm3648_vm7  ;;  %vm3655_vm7 = vcmp.eq.s32.totalorder %v14474_v38, %v12383_v34  ;;  %vm3659_vm12 = vcmp.eq.s32.totalorder %v14461_v36, %v12370_v43 }
 0x23f   : > { %9934 = vmatprep.subr.msk.bf16.mxu0 %vm9933_vm15, %v10457_v19  ;;  %vm9871_vm2 = vmpackc.low %vm3649_vm11, %vm3646_vm10  ;;  %vm3609_vm10 = vcmp.eq.s32.totalorder %v11125_v61, %v14469_v41  ;;  %vm3660_vm15 = vcmp.eq.s32.totalorder %v14461_v36, %v14469_v41 }
 0x240   : > { %4285 = vmatmul.mubr.f32.vlgmr.msra.gmra.mrb[8].mxu0 %v12920_v16  ;;  %vm9935_vm5 = vmpackc.low %vm3603_vm14, %vm3600_vm13  ;;  %vm3662_vm13 = vcmp.eq.s32.totalorder %v14437_v3, %v12370_v43 }
 0x241   : > { %9872 = vmatpush1.bf16.msk.msra.mxu1 %vm9871_vm2, %v10457_v19  ;;  %9936 = vmatpush3.bf16.msk.msra.mxu0 %vm9935_vm5, %v10457_v19  ;;  %vm9873_vm8 = vmpackc.low %vm3656_vm1, %vm3653_vm0  ;;  %vm3663_vm0 = vcmp.eq.s32.totalorder %v14437_v3, %v14469_v41  ;;  %vm3658_vm2 = vcmp.eq.s32.totalorder %v14461_v36, %v12383_v34  ;;  %vm3612_vm5 = vcmp.eq.s32.totalorder %v11171_v6, %v14469_v41  ;;  %v14475_v36 = vld [vmem:[#allocation51_spill] sm:$0xff] }
 0x242   : > { %9874 = vmatprep.subr.msk.bf16.mxu1 %vm9873_vm8, %v10457_v19  ;;  %vm9937_vm11 = vmpackc.low %vm3657_vm4, %vm3654_vm3  ;;  %4354 = vmatprep.mubr.f32.mxu0 %v14447_v18  ;;  %vm3661_vm3 = vcmp.eq.s32.totalorder %v14437_v3, %v12383_v34  ;;  %vm3665_vm8 = vcmp.eq.s32.totalorder %v14463_v57, %v12370_v43 }
 0x243   : > { %9938 = vmatprep.subr.msk.bf16.mxu0 %vm9937_vm11, %v10457_v19  ;;  %vm9875_vm14 = vmpackc.low %vm3655_vm7, %vm3652_vm6  ;;  %vm3615_vm6 = vcmp.eq.s32.totalorder %v14449_v40, %v14469_v41  ;;  %vm3666_vm11 = vcmp.eq.s32.totalorder %v14463_v57, %v14469_v41  ;;  %v14476_v40 = vld [vmem:[#allocation53_spill] sm:$0xff] }
 0x244   : > { %vm9939_vm1 = vmpackc.low %vm3609_vm10, %vm3606_vm9  ;;  %vm3668_vm9 = vcmp.eq.s32.totalorder %v14475_v36, %v12370_v43 }
 0x245   : > { %9876 = vmatpush1.bf16.msk.msra.mxu1 %vm9875_vm14, %v10457_v19  ;;  %9940 = vmatpush3.bf16.msk.msra.mxu0 %vm9939_vm1, %v10457_v19  ;;  %vm9877_vm4 = vmpackc.low %vm3662_vm13, %vm3659_vm12  ;;  %vm3669_vm12 = vcmp.eq.s32.totalorder %v14475_v36, %v14469_v41  ;;  %vm3664_vm14 = vcmp.eq.s32.totalorder %v14463_v57, %v12383_v34  ;;  %vm3618_vm1 = vcmp.eq.s32.totalorder %v11216_v10, %v14469_v41  ;;  %v14477_v57 = vld [vmem:[#allocation54_spill] sm:$0xff] }
 0x246   : > { %9878 = vmatprep.subr.msk.bf16.mxu1 %vm9877_vm4, %v10457_v19  ;;  %vm9941_vm7 = vmpackc.low %vm3663_vm0, %vm3660_vm15  ;;  %vm3667_vm15 = vcmp.eq.s32.totalorder %v14475_v36, %v12383_v34  ;;  %vm3671_vm4 = vcmp.eq.s32.totalorder %v14476_v40, %v12370_v43 }
 0x247   : > { %9942 = vmatprep.subr.msk.bf16.mxu0 %vm9941_vm7, %v10457_v19  ;;  %vm9879_vm10 = vmpackc.low %vm3661_vm3, %vm3658_vm2  ;;  %vm3621_vm2 = vcmp.eq.s32.totalorder %v14451_v13, %v14469_v41  ;;  %vm3672_vm7 = vcmp.eq.s32.totalorder %v14476_v40, %v14469_v41  ;;  %v14478_v13 = vld [vmem:[#allocation55_spill] sm:$0xff] }
 0x248   : > { %vm9943_vm13 = vmpackc.low %vm3615_vm6, %vm3612_vm5  ;;  %vm3674_vm5 = vcmp.eq.s32.totalorder %v14477_v57, %v12370_v43 }
 0x249   : > { %9880 = vmatpush1.bf16.msk.msra.mxu1 %vm9879_vm10, %v10457_v19  ;;  %9944 = vmatpush3.bf16.msk.msra.mxu0 %vm9943_vm13, %v10457_v19  ;;  %vm9881_vm0 = vmpackc.low %vm3668_vm9, %vm3665_vm8  ;;  %vm3675_vm8 = vcmp.eq.s32.totalorder %v14477_v57, %v14469_v41  ;;  %vm3670_vm10 = vcmp.eq.s32.totalorder %v14476_v40, %v12383_v34  ;;  %vm3624_vm13 = vcmp.eq.s32.totalorder %v11254_v46, %v14469_v41  ;;  %v14479_v40 = vld [vmem:[#allocation56_spill] sm:$0xff] }
 0x24a   : > { %9882 = vmatprep.subr.msk.bf16.mxu1 %vm9881_vm0, %v10457_v19  ;;  %vm9945_vm3 = vmpackc.low %vm3669_vm12, %vm3666_vm11  ;;  %vm3673_vm11 = vcmp.eq.s32.totalorder %v14477_v57, %v12383_v34  ;;  %vm3677_vm0 = vcmp.eq.s32.totalorder %v14478_v13, %v12370_v43 }
 0x24b   : > { %9946 = vmatprep.subr.msk.bf16.mxu0 %vm9945_vm3, %v10457_v19  ;;  %vm9883_vm6 = vmpackc.low %vm3667_vm15, %vm3664_vm14  ;;  %vm3627_vm14 = vcmp.eq.s32.totalorder %v11257_v5, %v14469_v41  ;;  %vm3678_vm3 = vcmp.eq.s32.totalorder %v14478_v13, %v14469_v41 }
 0x24c   : > { %vm9947_vm9 = vmpackc.low %vm3621_vm2, %vm3618_vm1  ;;  %vm3680_vm1 = vcmp.eq.s32.totalorder %v14479_v40, %v12370_v43 }
 0x24d   : > { %9884 = vmatpush1.bf16.msk.msra.mxu1 %vm9883_vm6, %v10457_v19  ;;  %9948 = vmatpush3.bf16.msk.msra.mxu0 %vm9947_vm9, %v10457_v19  ;;  %vm9885_vm12 = vmpackc.low %vm3674_vm5, %vm3671_vm4  ;;  %vm3681_vm4 = vcmp.eq.s32.totalorder %v14479_v40, %v14469_v41  ;;  %vm3676_vm6 = vcmp.eq.s32.totalorder %v14478_v13, %v12383_v34  ;;  %vm3630_vm9 = vcmp.eq.s32.totalorder %v11292_v24, %v14469_v41 }
 0x24e   : > { %9886 = vmatprep.subr.msk.bf16.mxu1 %vm9885_vm12, %v10457_v19  ;;  %vm9949_vm15 = vmpackc.low %vm3675_vm8, %vm3672_vm7  ;;  %vm3679_vm7 = vcmp.eq.s32.totalorder %v14479_v40, %v12383_v34  ;;  %vm3683_vm12 = vcmp.eq.s32.totalorder %v11311_v21, %v12370_v43 }
 0x24f   : > { %9950 = vmatprep.subr.msk.bf16.mxu0 %vm9949_vm15, %v10457_v19  ;;  %vm9887_vm2 = vmpackc.low %vm3673_vm11, %vm3670_vm10  ;;  %vm3633_vm10 = vcmp.eq.s32.totalorder %v11295_v42, %v14469_v41  ;;  %vm3684_vm15 = vcmp.eq.s32.totalorder %v11311_v21, %v14469_v41 }
 0x250   : > { %vm9951_vm5 = vmpackc.low %vm3627_vm14, %vm3624_vm13  ;;  %vm3686_vm13 = vcmp.eq.s32.totalorder %v14432_v35, %v12370_v43 }
 0x251   : > { %9888 = vmatpush1.bf16.msk.msra.mxu1 %vm9887_vm2, %v10457_v19  ;;  %9952 = vmatpush3.bf16.msk.msra.mxu0 %vm9951_vm5, %v10457_v19  ;;  %vm9889_vm8 = vmpackc.low %vm3680_vm1, %vm3677_vm0  ;;  %vm3687_vm0 = vcmp.eq.s32.totalorder %v14432_v35, %v14469_v41  ;;  %vm3682_vm2 = vcmp.eq.s32.totalorder %v11311_v21, %v12383_v34  ;;  %vm3636_vm5 = vcmp.eq.s32.totalorder %v11330_v0, %v14469_v41 }
 0x252   : > { %9890 = vmatprep.subr.msk.bf16.mxu1 %vm9889_vm8, %v10457_v19  ;;  %vm9953_vm11 = vmpackc.low %vm3681_vm4, %vm3678_vm3  ;;  %vm3685_vm3 = vcmp.eq.s32.totalorder %v14432_v35, %v12383_v34  ;;  %vm3689_vm8 = vcmp.eq.s32.totalorder %v11349_v31, %v12370_v43 }
 0x253   : > { %9954 = vmatprep.subr.msk.bf16.mxu0 %vm9953_vm11, %v10457_v19  ;;  %v8879_v40 = vpop.f32.mrb[2].mxu0  ;;  %vm9891_vm14 = vmpackc.low %vm3679_vm7, %vm3676_vm6  ;;  %vm3639_vm6 = vcmp.eq.s32.totalorder %v11333_v60, %v14469_v41  ;;  %vm3690_vm11 = vcmp.eq.s32.totalorder %v11349_v31, %v14469_v41 }
 0x254   : > { %v8880_v42 = vpop.f32.mrb[3].mxu0  ;;  %vm9955_vm1 = vmpackc.low %vm3633_vm10, %vm3630_vm9  ;;  %vm3692_vm9 = vcmp.eq.s32.totalorder %v11352_v30, %v12370_v43  ;;  %v14482_v43 = vld [vmem:[#allocation23_spill] sm:$0xff] }
 0x255   : > { %v13028_v24 = vadd.f32 %v8880_v42, %v8879_v40  ;;  %9892 = vmatpush1.bf16.msk.msra.mxu1 %vm9891_vm14, %v10457_v19  ;;  %9956 = vmatpush3.bf16.msk.msra.mxu0 %vm9955_vm1, %v10457_v19  ;;  %vm9893_vm4 = vmpackc.low %vm3686_vm13, %vm3683_vm12  ;;  %vm3693_vm12 = vcmp.eq.s32.totalorder %v11352_v30, %v14469_v41  ;;  %vm3688_vm14 = vcmp.eq.s32.totalorder %v11349_v31, %v12383_v34  ;;  %v14480_v40 = vld [vmem:[#allocation25_spill] sm:$0xff]  ;;  %v14481_v42 = vld [vmem:[#allocation26_spill] sm:$0xff] }
 0x256   : > { %9894 = vmatprep.subr.msk.bf16.mxu1 %vm9893_vm4, %v10457_v19  ;;  %vm9957_vm7 = vmpackc.low %vm3687_vm0, %vm3684_vm15  ;;  %vm3691_vm15 = vcmp.eq.s32.totalorder %v11352_v30, %v12383_v34  ;;  %vm3642_vm1 = vcmp.eq.s32.totalorder %v11368_v37, %v14469_v41  ;;  %vm4442_vm4 = vcmp.eq.s32.totalorder %v14455_v47, %v14480_v40  ;;  %v14483_v34 = vld [vmem:[#allocation38_spill] sm:$0xff] }
 0x257   : > { %9958 = vmatprep.subr.msk.bf16.mxu0 %vm9957_vm7, %v10457_v19  ;;  %vm9895_vm10 = vmpackc.low %vm3685_vm3, %vm3682_vm2  ;;  %vm3645_vm2 = vcmp.eq.s32.totalorder %v11371_v28, %v14469_v41  ;;  %vm4491_vm7 = vcmp.eq.s32.totalorder %v14457_v14, %v14481_v42 }
 0x258   : > { %vm9959_vm13 = vmpackc.low %vm3639_vm6, %vm3636_vm5  ;;  %vm4445_vm5 = vcmp.eq.s32.totalorder %v10725_v51, %v14480_v40 }
 0x259   : > { %9896 = vmatpush1.bf16.msk.msra.mxu1 %vm9895_vm10, %v10457_v19  ;;  %9960 = vmatpush3.bf16.msk.msra.mxu0 %vm9959_vm13, %v10457_v19  ;;  %vm9897_vm0 = vmpackc.low %vm3692_vm9, %vm3689_vm8  ;;  %vm4494_vm8 = vcmp.eq.s32.totalorder %v14458_v2, %v14481_v42  ;;  %vm4441_vm10 = vcmp.eq.s32.totalorder %v14455_v47, %v14482_v43  ;;  %vm4443_vm13 = vcmp.eq.s32.totalorder %v14455_v47, %v14481_v42 }
 0x25a   : > { %9898 = vmatprep.subr.msk.bf16.mxu1 %vm9897_vm0, %v10457_v19  ;;  %vm9961_vm3 = vmpackc.low %vm3693_vm12, %vm3690_vm11  ;;  %vm4444_vm11 = vcmp.eq.s32.totalorder %v10725_v51, %v14482_v43  ;;  %vm4448_vm0 = vcmp.eq.s32.totalorder %v10734_v58, %v14480_v40 }
 0x25b   : > { %9962 = vmatprep.subr.msk.bf16.mxu0 %vm9961_vm3, %v10457_v19  ;;  %vm9899_vm6 = vmpackc.low %vm3691_vm15, %vm3688_vm14  ;;  %vm4446_vm14 = vcmp.eq.s32.totalorder %v10725_v51, %v14481_v42  ;;  %vm4497_vm3 = vcmp.eq.s32.totalorder %v14459_v9, %v14481_v42 }
 0x25c   : > { %vm9963_vm9 = vmpackc.low %vm3645_vm2, %vm3642_vm1  ;;  %vm4451_vm1 = vcmp.eq.s32.totalorder %v10737_v45, %v14480_v40 }
 0x25d   : > { %9900 = vmatpush1.bf16.msk.msra.mxu1 %vm9899_vm6, %v10457_v19  ;;  %9964 = vmatpush3.bf16.msk.msra.mxu0 %vm9963_vm9, %v10457_v19  ;;  %vm9965_vm12 = vmpackc.low %vm4445_vm5, %vm4442_vm4  ;;  %vm4500_vm4 = vcmp.eq.s32.totalorder %v14460_v12, %v14481_v42  ;;  %vm4447_vm6 = vcmp.eq.s32.totalorder %v10734_v58, %v14482_v43  ;;  %vm4449_vm9 = vcmp.eq.s32.totalorder %v10734_v58, %v14481_v42 }
 0x25e   : > { %9966 = vmatprep.subr.msk.bf16.mxu0 %vm9965_vm12, %v10457_v19  ;;  %vm10093_vm15 = vmpackc.low %vm4494_vm8, %vm4491_vm7  ;;  %vm4450_vm7 = vcmp.eq.s32.totalorder %v10737_v45, %v14482_v43  ;;  %vm4454_vm12 = vcmp.eq.s32.totalorder %v10790_v20, %v14480_v40 }
 0x25f   : > { %10094 = vmatprep.subr.msk.bf16.mxu1 %vm10093_vm15, %v10457_v19  ;;  %vm9967_vm2 = vmpackc.low %vm4444_vm11, %vm4441_vm10  ;;  %vm4452_vm10 = vcmp.eq.s32.totalorder %v10737_v45, %v14481_v42  ;;  %vm4503_vm15 = vcmp.eq.s32.totalorder %v10840_v11, %v14481_v42 }
 0x260   : > { %4214 = vmatmul.mubr.f32.vlgmr.msra.gmra.mrb[10].mxu1 %v12749_v1  ;;  %4355 = vmatmul.mubr.f32.vlgmr.msra.gmra.mrb[10].mxu0 %v12749_v1  ;;  %vm10095_vm5 = vmpackc.low %vm4446_vm14, %vm4443_vm13  ;;  %vm4457_vm13 = vcmp.eq.s32.totalorder %v10832_v22, %v14480_v40 }
 0x261   : > { %9968 = vmatpush1.bf16.msk.msra.mxu0 %vm9967_vm2, %v10457_v19  ;;  %10096 = vmatpush3.bf16.msk.msra.mxu1 %vm10095_vm5, %v10457_v19  ;;  %vm9969_vm8 = vmpackc.low %vm4451_vm1, %vm4448_vm0  ;;  %vm4506_vm0 = vcmp.eq.s32.totalorder %v14462_v4, %v14481_v42  ;;  %vm4453_vm2 = vcmp.eq.s32.totalorder %v10790_v20, %v14482_v43  ;;  %vm4455_vm5 = vcmp.eq.s32.totalorder %v10790_v20, %v14481_v42 }
 0x262   : > { %9970 = vmatprep.subr.msk.bf16.mxu0 %vm9969_vm8, %v10457_v19  ;;  %vm10097_vm11 = vmpackc.low %vm4500_vm4, %vm4497_vm3  ;;  %5223 = vmatprep.mubr.f32.mxu1 %v10522_v7  ;;  %vm4456_vm3 = vcmp.eq.s32.totalorder %v10832_v22, %v14482_v43  ;;  %vm4460_vm8 = vcmp.eq.s32.totalorder %v10864_v15, %v14480_v40 }
 0x263   : > { %10098 = vmatprep.subr.msk.bf16.mxu1 %vm10097_vm11, %v10457_v19  ;;  %vm9971_vm14 = vmpackc.low %vm4450_vm7, %vm4447_vm6  ;;  %5081 = vmatprep.mubr.f32.mxu0 %v10522_v7  ;;  %vm4458_vm6 = vcmp.eq.s32.totalorder %v10832_v22, %v14481_v42  ;;  %vm4509_vm11 = vcmp.eq.s32.totalorder %v10875_v59, %v14481_v42 }
 0x264   : > { %vm10099_vm1 = vmpackc.low %vm4452_vm10, %vm4449_vm9  ;;  %vm4463_vm9 = vcmp.eq.s32.totalorder %v10867_v56, %v14480_v40 }
 0x265   : > { %9972 = vmatpush1.bf16.msk.msra.mxu0 %vm9971_vm14, %v10457_v19  ;;  %10100 = vmatpush3.bf16.msk.msra.mxu1 %vm10099_vm1, %v10457_v19  ;;  %vm9973_vm4 = vmpackc.low %vm4457_vm13, %vm4454_vm12  ;;  %vm4512_vm12 = vcmp.eq.s32.totalorder %v10878_v62, %v14481_v42  ;;  %vm4459_vm14 = vcmp.eq.s32.totalorder %v10864_v15, %v14482_v43  ;;  %vm4461_vm1 = vcmp.eq.s32.totalorder %v10864_v15, %v14481_v42 }
 0x266   : > { %9974 = vmatprep.subr.msk.bf16.mxu0 %vm9973_vm4, %v10457_v19  ;;  %vm10101_vm7 = vmpackc.low %vm4506_vm0, %vm4503_vm15  ;;  %vm4462_vm15 = vcmp.eq.s32.totalorder %v10867_v56, %v14482_v43  ;;  %vm4466_vm4 = vcmp.eq.s32.totalorder %v10902_v17, %v14480_v40 }
 0x267   : > { %10102 = vmatprep.subr.msk.bf16.mxu1 %vm10101_vm7, %v10457_v19  ;;  %vm9975_vm10 = vmpackc.low %vm4456_vm3, %vm4453_vm2  ;;  %vm4464_vm2 = vcmp.eq.s32.totalorder %v10867_v56, %v14481_v42  ;;  %vm4515_vm7 = vcmp.eq.s32.totalorder %v14426_v23, %v14481_v42 }
 0x268   : > { %vm10103_vm13 = vmpackc.low %vm4458_vm6, %vm4455_vm5  ;;  %vm4469_vm5 = vcmp.eq.s32.totalorder %v10905_v49, %v14480_v40 }
 0x269   : > { %9976 = vmatpush1.bf16.msk.msra.mxu0 %vm9975_vm10, %v10457_v19  ;;  %10104 = vmatpush3.bf16.msk.msra.mxu1 %vm10103_vm13, %v10457_v19  ;;  %vm9977_vm0 = vmpackc.low %vm4463_vm9, %vm4460_vm8  ;;  %vm4518_vm8 = vcmp.eq.s32.totalorder %v14427_v55, %v14481_v42  ;;  %vm4465_vm10 = vcmp.eq.s32.totalorder %v10902_v17, %v14482_v43  ;;  %vm4467_vm13 = vcmp.eq.s32.totalorder %v10902_v17, %v14481_v42 }
 0x26a   : > { %9978 = vmatprep.subr.msk.bf16.mxu0 %vm9977_vm0, %v10457_v19  ;;  %vm10105_vm3 = vmpackc.low %vm4512_vm12, %vm4509_vm11  ;;  %vm4468_vm11 = vcmp.eq.s32.totalorder %v10905_v49, %v14482_v43  ;;  %vm4472_vm0 = vcmp.eq.s32.totalorder %v10940_v25, %v14480_v40 }
 0x26b   : > { %10106 = vmatprep.subr.msk.bf16.mxu1 %vm10105_vm3, %v10457_v19  ;;  %vm9979_vm6 = vmpackc.low %vm4462_vm15, %vm4459_vm14  ;;  %vm4470_vm14 = vcmp.eq.s32.totalorder %v10905_v49, %v14481_v42  ;;  %vm4521_vm3 = vcmp.eq.s32.totalorder %v14465_v48, %v14481_v42 }
 0x26c   : > { %vm10107_vm9 = vmpackc.low %vm4464_vm2, %vm4461_vm1  ;;  %vm4475_vm1 = vcmp.eq.s32.totalorder %v10943_v26, %v14480_v40 }
 0x26d   : > { %9980 = vmatpush1.bf16.msk.msra.mxu0 %vm9979_vm6, %v10457_v19  ;;  %10108 = vmatpush3.bf16.msk.msra.mxu1 %vm10107_vm9, %v10457_v19  ;;  %vm9981_vm12 = vmpackc.low %vm4469_vm5, %vm4466_vm4  ;;  %vm4524_vm4 = vcmp.eq.s32.totalorder %v14483_v34, %v14481_v42  ;;  %vm4471_vm6 = vcmp.eq.s32.totalorder %v10940_v25, %v14482_v43  ;;  %vm4473_vm9 = vcmp.eq.s32.totalorder %v10940_v25, %v14481_v42 }
 0x26e   : > { %9982 = vmatprep.subr.msk.bf16.mxu0 %vm9981_vm12, %v10457_v19  ;;  %vm10109_vm15 = vmpackc.low %vm4518_vm8, %vm4515_vm7  ;;  %vm4474_vm7 = vcmp.eq.s32.totalorder %v10943_v26, %v14482_v43  ;;  %vm4478_vm12 = vcmp.eq.s32.totalorder %v10978_v32, %v14480_v40 }
 0x26f   : > { %10110 = vmatprep.subr.msk.bf16.mxu1 %vm10109_vm15, %v10457_v19  ;;  %vm9983_vm2 = vmpackc.low %vm4468_vm11, %vm4465_vm10  ;;  %vm4476_vm10 = vcmp.eq.s32.totalorder %v10943_v26, %v14481_v42  ;;  %vm4527_vm15 = vcmp.eq.s32.totalorder %v14467_v29, %v14481_v42 }
 0x270   : > { %vm10111_vm5 = vmpackc.low %vm4470_vm14, %vm4467_vm13  ;;  %vm4481_vm13 = vcmp.eq.s32.totalorder %v10981_v33, %v14480_v40 }
 0x271   : > { %9984 = vmatpush1.bf16.msk.msra.mxu0 %vm9983_vm2, %v10457_v19  ;;  %10112 = vmatpush3.bf16.msk.msra.mxu1 %vm10111_vm5, %v10457_v19  ;;  %vm9985_vm8 = vmpackc.low %vm4475_vm1, %vm4472_vm0  ;;  %vm4530_vm0 = vcmp.eq.s32.totalorder %v14468_v8, %v14481_v42  ;;  %vm4477_vm2 = vcmp.eq.s32.totalorder %v10978_v32, %v14482_v43  ;;  %vm4479_vm5 = vcmp.eq.s32.totalorder %v10978_v32, %v14481_v42 }
 0x272   : > { %9986 = vmatprep.subr.msk.bf16.mxu0 %vm9985_vm8, %v10457_v19  ;;  %vm10113_vm11 = vmpackc.low %vm4524_vm4, %vm4521_vm3  ;;  %vm4480_vm3 = vcmp.eq.s32.totalorder %v10981_v33, %v14482_v43  ;;  %vm4484_vm8 = vcmp.eq.s32.totalorder %v11016_v52, %v14480_v40 }
 0x273   : > { %10114 = vmatprep.subr.msk.bf16.mxu1 %vm10113_vm11, %v10457_v19  ;;  %v13186_v41 = vpop.f32.mrb[4].mxu1  ;;  %v8914_v1 = vpop.f32.mrb[4].mxu0  ;;  %vm9987_vm14 = vmpackc.low %vm4474_vm7, %vm4471_vm6  ;;  %vm4482_vm6 = vcmp.eq.s32.totalorder %v10981_v33, %v14481_v42  ;;  %vm4533_vm11 = vcmp.eq.s32.totalorder %v11027_v44, %v14481_v42 }
 0x274   : > { %14484 = vst [vmem:[#allocation20_spill] sm:$0xff] %v13186_v41  ;;  %v13192_v26 = vpop.f32.mrb[5].mxu1  ;;  %v8915_v25 = vpop.f32.mrb[5].mxu0  ;;  %vm10115_vm1 = vmpackc.low %vm4476_vm10, %vm4473_vm9  ;;  %vm4487_vm9 = vcmp.eq.s32.totalorder %v11019_v54, %v14480_v40  ;;  %v14491_v41 = vld [vmem:[#allocation50_spill] sm:$0xff] }
 0x275   : > { %14485 = vst [vmem:[#allocation21_spill] sm:$0xff] %v13192_v26  ;;  %9988 = vmatpush1.bf16.msk.msra.mxu0 %vm9987_vm14, %v10457_v19  ;;  %10116 = vmatpush3.bf16.msk.msra.mxu1 %vm10115_vm1, %v10457_v19  ;;  %vm9989_vm4 = vmpackc.low %vm4481_vm13, %vm4478_vm12  ;;  %v8916_v26 = vadd.f32 %v8915_v25, %v8914_v1  ;;  %vm4536_vm12 = vcmp.eq.s32.totalorder %v11030_v50, %v14481_v42  ;;  %v14489_v1 = vld [vmem:[#allocation47_spill] sm:$0xff] }
 0x276   : > { %9990 = vmatprep.subr.msk.bf16.mxu0 %vm9989_vm4, %v10457_v19  ;;  %vm10117_vm7 = vmpackc.low %vm4530_vm0, %vm4527_vm15  ;;  %vm4483_vm14 = vcmp.eq.s32.totalorder %v11016_v52, %v14482_v43  ;;  %vm4486_vm15 = vcmp.eq.s32.totalorder %v11019_v54, %v14482_v43  ;;  %vm4485_vm1 = vcmp.eq.s32.totalorder %v11016_v52, %v14481_v42  ;;  %vm4490_vm4 = vcmp.eq.s32.totalorder %v14457_v14, %v14480_v40 }
 0x277   : > { %10118 = vmatprep.subr.msk.bf16.mxu1 %vm10117_vm7, %v10457_v19  ;;  %vm9991_vm10 = vmpackc.low %vm4480_vm3, %vm4477_vm2  ;;  %v13218_v25 = vadd.f32 %v8916_v26, %v13028_v24  ;;  %vm4488_vm2 = vcmp.eq.s32.totalorder %v11019_v54, %v14481_v42  ;;  %v14487_v24 = vld [vmem:[#allocation41_spill] sm:$0xff]  ;;  %v14488_v26 = vld [vmem:[#allocation43_spill] sm:$0xff] }
 0x278   : > { %vm10119_vm13 = vmpackc.low %vm4482_vm6, %vm4479_vm5  ;;  %vm4493_vm5 = vcmp.eq.s32.totalorder %v14458_v2, %v14480_v40  ;;  %vm4587_vm7 = vcmp.eq.s32.totalorder %v14487_v24, %v14481_v42 }
 0x279   : > { %14486 = vst [vmem:[#allocation18_spill] sm:$0xff] %v13218_v25  ;;  %9992 = vmatpush1.bf16.msk.msra.mxu0 %vm9991_vm10, %v10457_v19  ;;  %10120 = vmatpush3.bf16.msk.msra.mxu1 %vm10119_vm13, %v10457_v19  ;;  %vm9993_vm0 = vmpackc.low %vm4487_vm9, %vm4484_vm8  ;;  %vm4590_vm8 = vcmp.eq.s32.totalorder %v14472_v27, %v14481_v42  ;;  %vm4489_vm10 = vcmp.eq.s32.totalorder %v14457_v14, %v14482_v43  ;;  %v14490_v25 = vld [vmem:[#allocation49_spill] sm:$0xff] }
 0x27a   : > { %9994 = vmatprep.subr.msk.bf16.mxu0 %vm9993_vm0, %v10457_v19  ;;  %vm10121_vm3 = vmpackc.low %vm4536_vm12, %vm4533_vm11  ;;  %vm4492_vm11 = vcmp.eq.s32.totalorder %v14458_v2, %v14482_v43  ;;  %vm4539_vm13 = vcmp.eq.s32.totalorder %v14488_v26, %v14481_v42  ;;  %vm4496_vm0 = vcmp.eq.s32.totalorder %v14459_v9, %v14480_v40 }
 0x27b   : > { %10122 = vmatprep.subr.msk.bf16.mxu1 %vm10121_vm3, %v10457_v19  ;;  %vm9995_vm6 = vmpackc.low %vm4486_vm15, %vm4483_vm14  ;;  %vm4542_vm14 = vcmp.eq.s32.totalorder %v11078_v39, %v14481_v42  ;;  %vm4593_vm3 = vcmp.eq.s32.totalorder %v14473_v53, %v14481_v42 }
 0x27c   : > { %vm10123_vm9 = vmpackc.low %vm4488_vm2, %vm4485_vm1  ;;  %vm4499_vm1 = vcmp.eq.s32.totalorder %v14460_v12, %v14480_v40 }
 0x27d   : > { %9996 = vmatpush1.bf16.msk.msra.mxu0 %vm9995_vm6, %v10457_v19  ;;  %10124 = vmatpush3.bf16.msk.msra.mxu1 %vm10123_vm9, %v10457_v19  ;;  %vm9997_vm12 = vmpackc.low %vm4493_vm5, %vm4490_vm4  ;;  %vm4596_vm4 = vcmp.eq.s32.totalorder %v14474_v38, %v14481_v42  ;;  %vm4495_vm6 = vcmp.eq.s32.totalorder %v14459_v9, %v14482_v43  ;;  %vm4545_vm9 = vcmp.eq.s32.totalorder %v11117_v63, %v14481_v42 }
 0x27e   : > { %9998 = vmatprep.subr.msk.bf16.mxu0 %vm9997_vm12, %v10457_v19  ;;  %vm10125_vm15 = vmpackc.low %vm4590_vm8, %vm4587_vm7  ;;  %vm4498_vm7 = vcmp.eq.s32.totalorder %v14460_v12, %v14482_v43  ;;  %vm4502_vm12 = vcmp.eq.s32.totalorder %v10840_v11, %v14480_v40 }
 0x27f   : > { %10126 = vmatprep.subr.msk.bf16.mxu1 %vm10125_vm15, %v10457_v19  ;;  %vm9999_vm2 = vmpackc.low %vm4492_vm11, %vm4489_vm10  ;;  %vm4548_vm10 = vcmp.eq.s32.totalorder %v11125_v61, %v14481_v42  ;;  %vm4599_vm15 = vcmp.eq.s32.totalorder %v14489_v1, %v14481_v42 }
 0x280   : > { %5224 = vmatmul.mubr.f32.vlgmr.msra.gmra.mrb[12].mxu1 %v12920_v16  ;;  %vm10127_vm5 = vmpackc.low %vm4542_vm14, %vm4539_vm13  ;;  %vm4505_vm13 = vcmp.eq.s32.totalorder %v14462_v4, %v14480_v40 }
 0x281   : > { %10000 = vmatpush1.bf16.msk.msra.mxu0 %vm9999_vm2, %v10457_v19  ;;  %10128 = vmatpush3.bf16.msk.msra.mxu1 %vm10127_vm5, %v10457_v19  ;;  %vm10001_vm8 = vmpackc.low %vm4499_vm1, %vm4496_vm0  ;;  %vm4602_vm0 = vcmp.eq.s32.totalorder %v14437_v3, %v14481_v42  ;;  %vm4501_vm2 = vcmp.eq.s32.totalorder %v10840_v11, %v14482_v43  ;;  %vm4551_vm5 = vcmp.eq.s32.totalorder %v11171_v6, %v14481_v42 }
 0x282   : > { %10002 = vmatprep.subr.msk.bf16.mxu0 %vm10001_vm8, %v10457_v19  ;;  %vm10129_vm11 = vmpackc.low %vm4596_vm4, %vm4593_vm3  ;;  %5293 = vmatprep.mubr.f32.mxu1 %v14447_v18  ;;  %vm4504_vm3 = vcmp.eq.s32.totalorder %v14462_v4, %v14482_v43  ;;  %vm4508_vm8 = vcmp.eq.s32.totalorder %v10875_v59, %v14480_v40 }
 0x283   : > { %10130 = vmatprep.subr.msk.bf16.mxu1 %vm10129_vm11, %v10457_v19  ;;  %vm10003_vm14 = vmpackc.low %vm4498_vm7, %vm4495_vm6  ;;  %vm4554_vm6 = vcmp.eq.s32.totalorder %v14490_v25, %v14481_v42  ;;  %vm4605_vm11 = vcmp.eq.s32.totalorder %v14491_v41, %v14481_v42  ;;  %v14492_v41 = vld [vmem:[#allocation52_spill] sm:$0xff] }
 0x284   : > { %vm10131_vm1 = vmpackc.low %vm4548_vm10, %vm4545_vm9  ;;  %vm4511_vm9 = vcmp.eq.s32.totalorder %v10878_v62, %v14480_v40 }
 0x285   : > { %10004 = vmatpush1.bf16.msk.msra.mxu0 %vm10003_vm14, %v10457_v19  ;;  %10132 = vmatpush3.bf16.msk.msra.mxu1 %vm10131_vm1, %v10457_v19  ;;  %vm10005_vm4 = vmpackc.low %vm4505_vm13, %vm4502_vm12  ;;  %vm4608_vm12 = vcmp.eq.s32.totalorder %v14475_v36, %v14481_v42  ;;  %vm4507_vm14 = vcmp.eq.s32.totalorder %v10875_v59, %v14482_v43  ;;  %vm4557_vm1 = vcmp.eq.s32.totalorder %v11216_v10, %v14481_v42 }
 0x286   : > { %10006 = vmatprep.subr.msk.bf16.mxu0 %vm10005_vm4, %v10457_v19  ;;  %vm10133_vm7 = vmpackc.low %vm4602_vm0, %vm4599_vm15  ;;  %vm4510_vm15 = vcmp.eq.s32.totalorder %v10878_v62, %v14482_v43  ;;  %vm4514_vm4 = vcmp.eq.s32.totalorder %v14426_v23, %v14480_v40  ;;  %v14493_v62 = vld [vmem:[#allocation53_spill] sm:$0xff] }
 0x287   : > { %10134 = vmatprep.subr.msk.bf16.mxu1 %vm10133_vm7, %v10457_v19  ;;  %vm10007_vm10 = vmpackc.low %vm4504_vm3, %vm4501_vm2  ;;  %vm4560_vm2 = vcmp.eq.s32.totalorder %v14492_v41, %v14481_v42  ;;  %vm4611_vm7 = vcmp.eq.s32.totalorder %v14493_v62, %v14481_v42 }
 0x288   : > { %vm10135_vm13 = vmpackc.low %vm4554_vm6, %vm4551_vm5  ;;  %vm4517_vm5 = vcmp.eq.s32.totalorder %v14427_v55, %v14480_v40 }
 0x289   : > { %10008 = vmatpush1.bf16.msk.msra.mxu0 %vm10007_vm10, %v10457_v19  ;;  %10136 = vmatpush3.bf16.msk.msra.mxu1 %vm10135_vm13, %v10457_v19  ;;  %vm10009_vm0 = vmpackc.low %vm4511_vm9, %vm4508_vm8  ;;  %vm4614_vm8 = vcmp.eq.s32.totalorder %v14477_v57, %v14481_v42  ;;  %vm4513_vm10 = vcmp.eq.s32.totalorder %v14426_v23, %v14482_v43  ;;  %vm4563_vm13 = vcmp.eq.s32.totalorder %v11254_v46, %v14481_v42  ;;  %v14495_v23 = vld [vmem:[#allocation57_spill] sm:$0xff] }
 0x28a   : > { %10010 = vmatprep.subr.msk.bf16.mxu0 %vm10009_vm0, %v10457_v19  ;;  %vm10137_vm3 = vmpackc.low %vm4608_vm12, %vm4605_vm11  ;;  %vm4516_vm11 = vcmp.eq.s32.totalorder %v14427_v55, %v14482_v43  ;;  %vm4520_vm0 = vcmp.eq.s32.totalorder %v14465_v48, %v14480_v40  ;;  %v14494_v55 = vld [vmem:[#allocation56_spill] sm:$0xff] }
 0x28b   : > { %10138 = vmatprep.subr.msk.bf16.mxu1 %vm10137_vm3, %v10457_v19  ;;  %vm10011_vm6 = vmpackc.low %vm4510_vm15, %vm4507_vm14  ;;  %vm4566_vm14 = vcmp.eq.s32.totalorder %v11257_v5, %v14481_v42  ;;  %vm4617_vm3 = vcmp.eq.s32.totalorder %v14478_v13, %v14481_v42  ;;  %v14496_v13 = vld [vmem:[#allocation58_spill] sm:$0xff] }
 0x28c   : > { %vm10139_vm9 = vmpackc.low %vm4560_vm2, %vm4557_vm1  ;;  %vm4523_vm1 = vcmp.eq.s32.totalorder %v14483_v34, %v14480_v40 }
 0x28d   : > { %10012 = vmatpush1.bf16.msk.msra.mxu0 %vm10011_vm6, %v10457_v19  ;;  %10140 = vmatpush3.bf16.msk.msra.mxu1 %vm10139_vm9, %v10457_v19  ;;  %vm10013_vm12 = vmpackc.low %vm4517_vm5, %vm4514_vm4  ;;  %vm4620_vm4 = vcmp.eq.s32.totalorder %v14494_v55, %v14481_v42  ;;  %vm4519_vm6 = vcmp.eq.s32.totalorder %v14465_v48, %v14482_v43  ;;  %vm4569_vm9 = vcmp.eq.s32.totalorder %v14495_v23, %v14481_v42 }
 0x28e   : > { %10014 = vmatprep.subr.msk.bf16.mxu0 %vm10013_vm12, %v10457_v19  ;;  %vm10141_vm15 = vmpackc.low %vm4614_vm8, %vm4611_vm7  ;;  %vm4522_vm7 = vcmp.eq.s32.totalorder %v14483_v34, %v14482_v43  ;;  %vm4526_vm12 = vcmp.eq.s32.totalorder %v14467_v29, %v14480_v40 }
 0x28f   : > { %10142 = vmatprep.subr.msk.bf16.mxu1 %vm10141_vm15, %v10457_v19  ;;  %vm10015_vm2 = vmpackc.low %vm4516_vm11, %vm4513_vm10  ;;  %vm4572_vm10 = vcmp.eq.s32.totalorder %v14496_v13, %v14481_v42  ;;  %vm4623_vm15 = vcmp.eq.s32.totalorder %v11311_v21, %v14481_v42 }
 0x290   : > { %vm10143_vm5 = vmpackc.low %vm4566_vm14, %vm4563_vm13  ;;  %vm4529_vm13 = vcmp.eq.s32.totalorder %v14468_v8, %v14480_v40 }
 0x291   : > { %10016 = vmatpush1.bf16.msk.msra.mxu0 %vm10015_vm2, %v10457_v19  ;;  %10144 = vmatpush3.bf16.msk.msra.mxu1 %vm10143_vm5, %v10457_v19  ;;  %vm10017_vm8 = vmpackc.low %vm4523_vm1, %vm4520_vm0  ;;  %vm4626_vm0 = vcmp.eq.s32.totalorder %v14432_v35, %v14481_v42  ;;  %vm4525_vm2 = vcmp.eq.s32.totalorder %v14467_v29, %v14482_v43  ;;  %vm4575_vm5 = vcmp.eq.s32.totalorder %v11330_v0, %v14481_v42 }
 0x292   : > { %10018 = vmatprep.subr.msk.bf16.mxu0 %vm10017_vm8, %v10457_v19  ;;  %vm10145_vm11 = vmpackc.low %vm4620_vm4, %vm4617_vm3  ;;  %vm4528_vm3 = vcmp.eq.s32.totalorder %v14468_v8, %v14482_v43  ;;  %vm4532_vm8 = vcmp.eq.s32.totalorder %v11027_v44, %v14480_v40 }
 0x293   : > { %10146 = vmatprep.subr.msk.bf16.mxu1 %vm10145_vm11, %v10457_v19  ;;  %v8949_v34 = vpop.f32.mrb[6].mxu1  ;;  %vm10019_vm14 = vmpackc.low %vm4522_vm7, %vm4519_vm6  ;;  %vm4578_vm6 = vcmp.eq.s32.totalorder %v11333_v60, %v14481_v42  ;;  %vm4629_vm11 = vcmp.eq.s32.totalorder %v11349_v31, %v14481_v42 }
 0x294   : > { %vm10147_vm1 = vmpackc.low %vm4572_vm10, %vm4569_vm9  ;;  %v8950_v48 = vpop.f32.mrb[7].mxu1  ;;  %vm4535_vm9 = vcmp.eq.s32.totalorder %v11030_v50, %v14480_v40 }
 0x295   : > { %10020 = vmatpush1.bf16.msk.msra.mxu0 %vm10019_vm14, %v10457_v19  ;;  %10148 = vmatpush3.bf16.msk.msra.mxu1 %vm10147_vm1, %v10457_v19  ;;  %v13368_v55 = vadd.f32 %v8950_v48, %v8949_v34  ;;  %vm10021_vm4 = vmpackc.low %vm4529_vm13, %vm4526_vm12  ;;  %vm4632_vm12 = vcmp.eq.s32.totalorder %v11352_v30, %v14481_v42  ;;  %vm4531_vm14 = vcmp.eq.s32.totalorder %v11027_v44, %v14482_v43  ;;  %v14497_v48 = vld [vmem:[#allocation28_spill] sm:$0xff]  ;;  %v13425_v34 = vld [vmem:[%s10515_s30 + $0x8] sm:$0xff] }
 0x296   : > { %10022 = vmatprep.subr.msk.bf16.mxu0 %vm10021_vm4, %v10457_v19  ;;  %vm10149_vm7 = vmpackc.low %vm4626_vm0, %vm4623_vm15  ;;  %vm4534_vm15 = vcmp.eq.s32.totalorder %v11030_v50, %v14482_v43  ;;  %vm4581_vm1 = vcmp.eq.s32.totalorder %v11368_v37, %v14481_v42  ;;  %vm4538_vm4 = vcmp.eq.s32.totalorder %v14488_v26, %v14480_v40 }
 0x297   : > { %10150 = vmatprep.subr.msk.bf16.mxu1 %vm10149_vm7, %v10457_v19  ;;  %vm10023_vm10 = vmpackc.low %vm4528_vm3, %vm4525_vm2  ;;  %vm4584_vm2 = vcmp.eq.s32.totalorder %v11371_v28, %v14481_v42  ;;  %vm5390_vm7 = vcmp.eq.s32.totalorder %v14455_v47, %v14497_v48  ;;  %v14498_v42 = vld [vmem:[#allocation27_spill] sm:$0xff] }
 0x298   : > { %vm10151_vm13 = vmpackc.low %vm4578_vm6, %vm4575_vm5  ;;  %vm4541_vm5 = vcmp.eq.s32.totalorder %v11078_v39, %v14480_v40 }
 0x299   : > { %10024 = vmatpush1.bf16.msk.msra.mxu0 %vm10023_vm10, %v10457_v19  ;;  %10152 = vmatpush3.bf16.msk.msra.mxu1 %vm10151_vm13, %v10457_v19  ;;  %vm10025_vm0 = vmpackc.low %vm4535_vm9, %vm4532_vm8  ;;  %vm5393_vm8 = vcmp.eq.s32.totalorder %v10725_v51, %v14497_v48  ;;  %vm4537_vm10 = vcmp.eq.s32.totalorder %v14488_v26, %v14482_v43  ;;  %vm5389_vm13 = vcmp.eq.s32.totalorder %v14455_v47, %v14498_v42 }
 0x29a   : > { %10026 = vmatprep.subr.msk.bf16.mxu0 %vm10025_vm0, %v10457_v19  ;;  %vm10153_vm3 = vmpackc.low %vm4632_vm12, %vm4629_vm11  ;;  %vm4540_vm11 = vcmp.eq.s32.totalorder %v11078_v39, %v14482_v43  ;;  %vm4544_vm0 = vcmp.eq.s32.totalorder %v11117_v63, %v14480_v40 }
 0x29b   : > { %10154 = vmatprep.subr.msk.bf16.mxu1 %vm10153_vm3, %v10457_v19  ;;  %vm10027_vm6 = vmpackc.low %vm4534_vm15, %vm4531_vm14  ;;  %vm5392_vm14 = vcmp.eq.s32.totalorder %v10725_v51, %v14498_v42  ;;  %vm5396_vm3 = vcmp.eq.s32.totalorder %v10734_v58, %v14497_v48 }
 0x29c   : > { %vm10155_vm9 = vmpackc.low %vm4584_vm2, %vm4581_vm1  ;;  %vm4547_vm1 = vcmp.eq.s32.totalorder %v11125_v61, %v14480_v40 }
 0x29d   : > { %10028 = vmatpush1.bf16.msk.msra.mxu0 %vm10027_vm6, %v10457_v19  ;;  %10156 = vmatpush3.bf16.msk.msra.mxu1 %vm10155_vm9, %v10457_v19  ;;  %vm10029_vm12 = vmpackc.low %vm4541_vm5, %vm4538_vm4  ;;  %vm5399_vm4 = vcmp.eq.s32.totalorder %v10737_v45, %v14497_v48  ;;  %vm4543_vm6 = vcmp.eq.s32.totalorder %v11117_v63, %v14482_v43  ;;  %vm5395_vm9 = vcmp.eq.s32.totalorder %v10734_v58, %v14498_v42 }
 0x29e   : > { %10030 = vmatprep.subr.msk.bf16.mxu0 %vm10029_vm12, %v10457_v19  ;;  %vm10157_vm15 = vmpackc.low %vm5393_vm8, %vm5390_vm7  ;;  %vm4546_vm7 = vcmp.eq.s32.totalorder %v11125_v61, %v14482_v43  ;;  %vm4550_vm12 = vcmp.eq.s32.totalorder %v11171_v6, %v14480_v40 }
 0x29f   : > { %10158 = vmatprep.subr.msk.bf16.mxu1 %vm10157_vm15, %v10457_v19  ;;  %vm10031_vm2 = vmpackc.low %vm4540_vm11, %vm4537_vm10  ;;  %vm5398_vm10 = vcmp.eq.s32.totalorder %v10737_v45, %v14498_v42  ;;  %vm5402_vm15 = vcmp.eq.s32.totalorder %v10790_v20, %v14497_v48 }
 0x2a0   : > { %5294 = vmatmul.mubr.f32.vlgmr.msra.gmra.mrb[14].mxu1 %v13425_v34  ;;  %5082 = vmatmul.mubr.f32.vlgmr.msra.gmra.mrb[12].mxu0 %v12920_v16  ;;  %vm10159_vm5 = vmpackc.low %vm5392_vm14, %vm5389_vm13  ;;  %vm4553_vm13 = vcmp.eq.s32.totalorder %v14490_v25, %v14480_v40  ;;  %v14499_v16 = vld [vmem:[#allocation35_spill] sm:$0xff] }
 0x2a1   : > { %10032 = vmatpush1.bf16.msk.msra.mxu0 %vm10031_vm2, %v10457_v19  ;;  %10160 = vmatpush1.bf16.msk.msra.mxu1 %vm10159_vm5, %v10457_v19  ;;  %vm10033_vm8 = vmpackc.low %vm4547_vm1, %vm4544_vm0  ;;  %vm5405_vm0 = vcmp.eq.s32.totalorder %v10832_v22, %v14497_v48  ;;  %vm4549_vm2 = vcmp.eq.s32.totalorder %v11171_v6, %v14482_v43  ;;  %vm5401_vm5 = vcmp.eq.s32.totalorder %v10790_v20, %v14498_v42 }
 0x2a2   : > { %10034 = vmatprep.subr.msk.bf16.mxu0 %vm10033_vm8, %v10457_v19  ;;  %vm10161_vm11 = vmpackc.low %vm5399_vm4, %vm5396_vm3  ;;  %5152 = vmatprep.mubr.f32.mxu0 %v14447_v18  ;;  %vm4552_vm3 = vcmp.eq.s32.totalorder %v14490_v25, %v14482_v43  ;;  %vm4556_vm8 = vcmp.eq.s32.totalorder %v11216_v10, %v14480_v40 }
 0x2a3   : > { %10162 = vmatprep.subr.msk.bf16.mxu1 %vm10161_vm11, %v10457_v19  ;;  %vm10035_vm14 = vmpackc.low %vm4546_vm7, %vm4543_vm6  ;;  %6029 = vmatprep.mubr.f32.mxu1 %v10522_v7  ;;  %vm5404_vm6 = vcmp.eq.s32.totalorder %v10832_v22, %v14498_v42  ;;  %vm5408_vm11 = vcmp.eq.s32.totalorder %v10864_v15, %v14497_v48 }
 0x2a4   : > { %vm10163_vm1 = vmpackc.low %vm5398_vm10, %vm5395_vm9  ;;  %vm4559_vm9 = vcmp.eq.s32.totalorder %v14492_v41, %v14480_v40 }
 0x2a5   : > { %10036 = vmatpush1.bf16.msk.msra.mxu0 %vm10035_vm14, %v10457_v19  ;;  %10164 = vmatpush1.bf16.msk.msra.mxu1 %vm10163_vm1, %v10457_v19  ;;  %vm10037_vm4 = vmpackc.low %vm4553_vm13, %vm4550_vm12  ;;  %vm5411_vm12 = vcmp.eq.s32.totalorder %v10867_v56, %v14497_v48  ;;  %vm4555_vm14 = vcmp.eq.s32.totalorder %v11216_v10, %v14482_v43  ;;  %vm5407_vm1 = vcmp.eq.s32.totalorder %v10864_v15, %v14498_v42 }
 0x2a6   : > { %10038 = vmatprep.subr.msk.bf16.mxu0 %vm10037_vm4, %v10457_v19  ;;  %vm10165_vm7 = vmpackc.low %vm5405_vm0, %vm5402_vm15  ;;  %vm4558_vm15 = vcmp.eq.s32.totalorder %v14492_v41, %v14482_v43  ;;  %vm4562_vm4 = vcmp.eq.s32.totalorder %v11254_v46, %v14480_v40 }
 0x2a7   : > { %10166 = vmatprep.subr.msk.bf16.mxu1 %vm10165_vm7, %v10457_v19  ;;  %vm10039_vm10 = vmpackc.low %vm4552_vm3, %vm4549_vm2  ;;  %vm5410_vm2 = vcmp.eq.s32.totalorder %v10867_v56, %v14498_v42  ;;  %vm5414_vm7 = vcmp.eq.s32.totalorder %v10902_v17, %v14497_v48 }
 0x2a8   : > { %vm10167_vm13 = vmpackc.low %vm5404_vm6, %vm5401_vm5  ;;  %vm4565_vm5 = vcmp.eq.s32.totalorder %v11257_v5, %v14480_v40 }
 0x2a9   : > { %10040 = vmatpush1.bf16.msk.msra.mxu0 %vm10039_vm10, %v10457_v19  ;;  %10168 = vmatpush1.bf16.msk.msra.mxu1 %vm10167_vm13, %v10457_v19  ;;  %vm10041_vm0 = vmpackc.low %vm4559_vm9, %vm4556_vm8  ;;  %vm5417_vm8 = vcmp.eq.s32.totalorder %v10905_v49, %v14497_v48  ;;  %vm4561_vm10 = vcmp.eq.s32.totalorder %v11254_v46, %v14482_v43  ;;  %vm5413_vm13 = vcmp.eq.s32.totalorder %v10902_v17, %v14498_v42  ;;  %v14500_v17 = vld [vmem:[#allocation36_spill] sm:$0xff] }
 0x2aa   : > { %10042 = vmatprep.subr.msk.bf16.mxu0 %vm10041_vm0, %v10457_v19  ;;  %vm10169_vm3 = vmpackc.low %vm5411_vm12, %vm5408_vm11  ;;  %vm4564_vm11 = vcmp.eq.s32.totalorder %v11257_v5, %v14482_v43  ;;  %vm4568_vm0 = vcmp.eq.s32.totalorder %v14495_v23, %v14480_v40 }
 0x2ab   : > { %10170 = vmatprep.subr.msk.bf16.mxu1 %vm10169_vm3, %v10457_v19  ;;  %vm10043_vm6 = vmpackc.low %vm4558_vm15, %vm4555_vm14  ;;  %vm5416_vm14 = vcmp.eq.s32.totalorder %v10905_v49, %v14498_v42  ;;  %vm5420_vm3 = vcmp.eq.s32.totalorder %v14499_v16, %v14497_v48 }
 0x2ac   : > { %vm10171_vm9 = vmpackc.low %vm5410_vm2, %vm5407_vm1  ;;  %vm4571_vm1 = vcmp.eq.s32.totalorder %v14496_v13, %v14480_v40 }
 0x2ad   : > { %10044 = vmatpush1.bf16.msk.msra.mxu0 %vm10043_vm6, %v10457_v19  ;;  %10172 = vmatpush1.bf16.msk.msra.mxu1 %vm10171_vm9, %v10457_v19  ;;  %vm10045_vm12 = vmpackc.low %vm4565_vm5, %vm4562_vm4  ;;  %vm5423_vm4 = vcmp.eq.s32.totalorder %v14500_v17, %v14497_v48  ;;  %vm4567_vm6 = vcmp.eq.s32.totalorder %v14495_v23, %v14482_v43  ;;  %vm5419_vm9 = vcmp.eq.s32.totalorder %v14499_v16, %v14498_v42 }
 0x2ae   : > { %10046 = vmatprep.subr.msk.bf16.mxu0 %vm10045_vm12, %v10457_v19  ;;  %vm10173_vm15 = vmpackc.low %vm5417_vm8, %vm5414_vm7  ;;  %vm4570_vm7 = vcmp.eq.s32.totalorder %v14496_v13, %v14482_v43  ;;  %vm4574_vm12 = vcmp.eq.s32.totalorder %v11330_v0, %v14480_v40 }
 0x2af   : > { %10174 = vmatprep.subr.msk.bf16.mxu1 %vm10173_vm15, %v10457_v19  ;;  %vm10047_vm2 = vmpackc.low %vm4564_vm11, %vm4561_vm10  ;;  %vm5422_vm10 = vcmp.eq.s32.totalorder %v14500_v17, %v14498_v42  ;;  %vm5426_vm15 = vcmp.eq.s32.totalorder %v10978_v32, %v14497_v48 }
 0x2b0   : > { %vm10175_vm5 = vmpackc.low %vm5416_vm14, %vm5413_vm13  ;;  %vm4577_vm13 = vcmp.eq.s32.totalorder %v11333_v60, %v14480_v40 }
 0x2b1   : > { %10048 = vmatpush1.bf16.msk.msra.mxu0 %vm10047_vm2, %v10457_v19  ;;  %10176 = vmatpush1.bf16.msk.msra.mxu1 %vm10175_vm5, %v10457_v19  ;;  %vm10049_vm8 = vmpackc.low %vm4571_vm1, %vm4568_vm0  ;;  %vm5429_vm0 = vcmp.eq.s32.totalorder %v10981_v33, %v14497_v48  ;;  %vm4573_vm2 = vcmp.eq.s32.totalorder %v11330_v0, %v14482_v43  ;;  %vm5425_vm5 = vcmp.eq.s32.totalorder %v10978_v32, %v14498_v42 }
 0x2b2   : > { %10050 = vmatprep.subr.msk.bf16.mxu0 %vm10049_vm8, %v10457_v19  ;;  %vm10177_vm11 = vmpackc.low %vm5423_vm4, %vm5420_vm3  ;;  %vm4576_vm3 = vcmp.eq.s32.totalorder %v11333_v60, %v14482_v43  ;;  %vm4580_vm8 = vcmp.eq.s32.totalorder %v11368_v37, %v14480_v40 }
 0x2b3   : > { %10178 = vmatprep.subr.msk.bf16.mxu1 %vm10177_vm11, %v10457_v19  ;;  %v8984_v13 = vpop.f32.mrb[8].mxu1  ;;  %vm10051_vm14 = vmpackc.low %vm4570_vm7, %vm4567_vm6  ;;  %vm5428_vm6 = vcmp.eq.s32.totalorder %v10981_v33, %v14498_v42  ;;  %vm5432_vm11 = vcmp.eq.s32.totalorder %v11016_v52, %v14497_v48 }
 0x2b4   : > { %v8985_v17 = vpop.f32.mrb[9].mxu1  ;;  %vm10179_vm1 = vmpackc.low %vm5422_vm10, %vm5419_vm9  ;;  %vm4583_vm9 = vcmp.eq.s32.totalorder %v11371_v28, %v14480_v40 }
 0x2b5   : > { %v8986_v16 = vadd.f32 %v8985_v17, %v8984_v13  ;;  %10052 = vmatpush1.bf16.msk.msra.mxu0 %vm10051_vm14, %v10457_v19  ;;  %10180 = vmatpush1.bf16.msk.msra.mxu1 %vm10179_vm1, %v10457_v19  ;;  %vm10053_vm4 = vmpackc.low %vm4577_vm13, %vm4574_vm12  ;;  %vm5435_vm12 = vcmp.eq.s32.totalorder %v11019_v54, %v14497_v48  ;;  %vm4579_vm14 = vcmp.eq.s32.totalorder %v11368_v37, %v14482_v43  ;;  %v14503_v17 = vld [vmem:[#allocation31_spill] sm:$0xff] }
 0x2b6   : > { %10054 = vmatprep.subr.msk.bf16.mxu0 %vm10053_vm4, %v10457_v19  ;;  %vm10181_vm7 = vmpackc.low %vm5429_vm0, %vm5426_vm15  ;;  %vm4582_vm15 = vcmp.eq.s32.totalorder %v11371_v28, %v14482_v43  ;;  %vm5431_vm1 = vcmp.eq.s32.totalorder %v11016_v52, %v14498_v42  ;;  %vm4586_vm4 = vcmp.eq.s32.totalorder %v14487_v24, %v14480_v40 }
 0x2b7   : > { %v13547_v13 = vadd.f32 %v8986_v16, %v13368_v55  ;;  %10182 = vmatprep.subr.msk.bf16.mxu1 %vm10181_vm7, %v10457_v19  ;;  %vm10055_vm10 = vmpackc.low %vm4576_vm3, %vm4573_vm2  ;;  %vm5434_vm2 = vcmp.eq.s32.totalorder %v11019_v54, %v14498_v42  ;;  %vm5438_vm7 = vcmp.eq.s32.totalorder %v14457_v14, %v14497_v48  ;;  %v14502_v55 = vld [vmem:[#allocation50_spill] sm:$0xff]  ;;  %v14504_v16 = vld [vmem:[#allocation33_spill] sm:$0xff] }
 0x2b8   : > { %vm10183_vm13 = vmpackc.low %vm5428_vm6, %vm5425_vm5  ;;  %vm4589_vm5 = vcmp.eq.s32.totalorder %v14472_v27, %v14480_v40 }
 0x2b9   : > { %14501 = vst [vmem:[#allocation46_spill] sm:$0xff] %v13547_v13  ;;  %10056 = vmatpush1.bf16.msk.msra.mxu0 %vm10055_vm10, %v10457_v19  ;;  %10184 = vmatpush1.bf16.msk.msra.mxu1 %vm10183_vm13, %v10457_v19  ;;  %vm10057_vm0 = vmpackc.low %vm4583_vm9, %vm4580_vm8  ;;  %vm5441_vm8 = vcmp.eq.s32.totalorder %v14458_v2, %v14497_v48  ;;  %vm4585_vm10 = vcmp.eq.s32.totalorder %v14487_v24, %v14482_v43  ;;  %v14505_v13 = vld [vmem:[#allocation34_spill] sm:$0xff] }
 0x2ba   : > { %10058 = vmatprep.subr.msk.bf16.mxu0 %vm10057_vm0, %v10457_v19  ;;  %vm10185_vm3 = vmpackc.low %vm5435_vm12, %vm5432_vm11  ;;  %vm4588_vm11 = vcmp.eq.s32.totalorder %v14472_v27, %v14482_v43  ;;  %vm5437_vm13 = vcmp.eq.s32.totalorder %v14457_v14, %v14498_v42  ;;  %vm4592_vm0 = vcmp.eq.s32.totalorder %v14473_v53, %v14480_v40 }
 0x2bb   : > { %10186 = vmatprep.subr.msk.bf16.mxu1 %vm10185_vm3, %v10457_v19  ;;  %vm10059_vm6 = vmpackc.low %vm4582_vm15, %vm4579_vm14  ;;  %vm5440_vm14 = vcmp.eq.s32.totalorder %v14458_v2, %v14498_v42  ;;  %vm5444_vm3 = vcmp.eq.s32.totalorder %v14459_v9, %v14497_v48 }
 0x2bc   : > { %vm10187_vm9 = vmpackc.low %vm5434_vm2, %vm5431_vm1  ;;  %vm4595_vm1 = vcmp.eq.s32.totalorder %v14474_v38, %v14480_v40 }
 0x2bd   : > { %10060 = vmatpush1.bf16.msk.msra.mxu0 %vm10059_vm6, %v10457_v19  ;;  %10188 = vmatpush1.bf16.msk.msra.mxu1 %vm10187_vm9, %v10457_v19  ;;  %vm10061_vm12 = vmpackc.low %vm4589_vm5, %vm4586_vm4  ;;  %vm5447_vm4 = vcmp.eq.s32.totalorder %v14460_v12, %v14497_v48  ;;  %vm4591_vm6 = vcmp.eq.s32.totalorder %v14473_v53, %v14482_v43  ;;  %vm5443_vm9 = vcmp.eq.s32.totalorder %v14459_v9, %v14498_v42 }
 0x2be   : > { %10062 = vmatprep.subr.msk.bf16.mxu0 %vm10061_vm12, %v10457_v19  ;;  %vm10189_vm15 = vmpackc.low %vm5441_vm8, %vm5438_vm7  ;;  %vm4594_vm7 = vcmp.eq.s32.totalorder %v14474_v38, %v14482_v43  ;;  %vm4598_vm12 = vcmp.eq.s32.totalorder %v14489_v1, %v14480_v40 }
 0x2bf   : > { %10190 = vmatprep.subr.msk.bf16.mxu1 %vm10189_vm15, %v10457_v19  ;;  %vm10063_vm2 = vmpackc.low %vm4588_vm11, %vm4585_vm10  ;;  %vm5446_vm10 = vcmp.eq.s32.totalorder %v14460_v12, %v14498_v42  ;;  %vm5450_vm15 = vcmp.eq.s32.totalorder %v10840_v11, %v14497_v48 }
 0x2c0   : > { %vm10191_vm5 = vmpackc.low %vm5440_vm14, %vm5437_vm13  ;;  %vm4601_vm13 = vcmp.eq.s32.totalorder %v14437_v3, %v14480_v40 }
 0x2c1   : > { %10064 = vmatpush1.bf16.msk.msra.mxu0 %vm10063_vm2, %v10457_v19  ;;  %10192 = vmatpush1.bf16.msk.msra.mxu1 %vm10191_vm5, %v10457_v19  ;;  %vm10065_vm8 = vmpackc.low %vm4595_vm1, %vm4592_vm0  ;;  %vm5453_vm0 = vcmp.eq.s32.totalorder %v14462_v4, %v14497_v48  ;;  %vm4597_vm2 = vcmp.eq.s32.totalorder %v14489_v1, %v14482_v43  ;;  %vm5449_vm5 = vcmp.eq.s32.totalorder %v10840_v11, %v14498_v42 }
 0x2c2   : > { %10066 = vmatprep.subr.msk.bf16.mxu0 %vm10065_vm8, %v10457_v19  ;;  %vm10193_vm11 = vmpackc.low %vm5447_vm4, %vm5444_vm3  ;;  %vm4600_vm3 = vcmp.eq.s32.totalorder %v14437_v3, %v14482_v43  ;;  %vm4604_vm8 = vcmp.eq.s32.totalorder %v14502_v55, %v14480_v40 }
 0x2c3   : > { %10194 = vmatprep.subr.msk.bf16.mxu1 %vm10193_vm11, %v10457_v19  ;;  %vm10067_vm14 = vmpackc.low %vm4594_vm7, %vm4591_vm6  ;;  %vm5452_vm6 = vcmp.eq.s32.totalorder %v14462_v4, %v14498_v42  ;;  %vm5456_vm11 = vcmp.eq.s32.totalorder %v10875_v59, %v14497_v48 }
 0x2c4   : > { %vm10195_vm1 = vmpackc.low %vm5446_vm10, %vm5443_vm9  ;;  %vm4607_vm9 = vcmp.eq.s32.totalorder %v14475_v36, %v14480_v40 }
 0x2c5   : > { %10068 = vmatpush1.bf16.msk.msra.mxu0 %vm10067_vm14, %v10457_v19  ;;  %10196 = vmatpush1.bf16.msk.msra.mxu1 %vm10195_vm1, %v10457_v19  ;;  %vm10069_vm4 = vmpackc.low %vm4601_vm13, %vm4598_vm12  ;;  %vm5459_vm12 = vcmp.eq.s32.totalorder %v14503_v17, %v14497_v48  ;;  %vm4603_vm14 = vcmp.eq.s32.totalorder %v14502_v55, %v14482_v43  ;;  %vm5455_vm1 = vcmp.eq.s32.totalorder %v10875_v59, %v14498_v42  ;;  %v14509_v55 = vld [vmem:[#allocation38_spill] sm:$0xff] }
 0x2c6   : > { %10070 = vmatprep.subr.msk.bf16.mxu0 %vm10069_vm4, %v10457_v19  ;;  %vm10197_vm7 = vmpackc.low %vm5453_vm0, %vm5450_vm15  ;;  %vm4606_vm15 = vcmp.eq.s32.totalorder %v14475_v36, %v14482_v43  ;;  %vm4610_vm4 = vcmp.eq.s32.totalorder %v14493_v62, %v14480_v40  ;;  %v14506_v36 = vld [vmem:[#allocation55_spill] sm:$0xff] }
 0x2c7   : > { %10198 = vmatprep.subr.msk.bf16.mxu1 %vm10197_vm7, %v10457_v19  ;;  %vm10071_vm10 = vmpackc.low %vm4600_vm3, %vm4597_vm2  ;;  %vm5458_vm2 = vcmp.eq.s32.totalorder %v14503_v17, %v14498_v42  ;;  %vm5462_vm7 = vcmp.eq.s32.totalorder %v14504_v16, %v14497_v48 }
 0x2c8   : > { %vm10199_vm13 = vmpackc.low %vm5452_vm6, %vm5449_vm5  ;;  %vm4613_vm5 = vcmp.eq.s32.totalorder %v14477_v57, %v14480_v40 }
 0x2c9   : > { %10072 = vmatpush1.bf16.msk.msra.mxu0 %vm10071_vm10, %v10457_v19  ;;  %10200 = vmatpush1.bf16.msk.msra.mxu1 %vm10199_vm13, %v10457_v19  ;;  %vm10073_vm0 = vmpackc.low %vm4607_vm9, %vm4604_vm8  ;;  %vm5465_vm8 = vcmp.eq.s32.totalorder %v14505_v13, %v14497_v48  ;;  %vm4609_vm10 = vcmp.eq.s32.totalorder %v14493_v62, %v14482_v43  ;;  %vm5461_vm13 = vcmp.eq.s32.totalorder %v14504_v16, %v14498_v42  ;;  %v14507_v62 = vld [vmem:[#allocation56_spill] sm:$0xff] }
 0x2ca   : > { %10074 = vmatprep.subr.msk.bf16.mxu0 %vm10073_vm0, %v10457_v19  ;;  %vm10201_vm3 = vmpackc.low %vm5459_vm12, %vm5456_vm11  ;;  %vm4612_vm11 = vcmp.eq.s32.totalorder %v14477_v57, %v14482_v43  ;;  %vm4616_vm0 = vcmp.eq.s32.totalorder %v14506_v36, %v14480_v40  ;;  %v14508_v57 = vld [vmem:[#allocation37_spill] sm:$0xff] }
 0x2cb   : > { %10202 = vmatprep.subr.msk.bf16.mxu1 %vm10201_vm3, %v10457_v19  ;;  %vm10075_vm6 = vmpackc.low %vm4606_vm15, %vm4603_vm14  ;;  %vm5464_vm14 = vcmp.eq.s32.totalorder %v14505_v13, %v14498_v42  ;;  %vm5468_vm3 = vcmp.eq.s32.totalorder %v14508_v57, %v14497_v48 }
 0x2cc   : > { %vm10203_vm9 = vmpackc.low %vm5458_vm2, %vm5455_vm1  ;;  %vm4619_vm1 = vcmp.eq.s32.totalorder %v14507_v62, %v14480_v40 }
 0x2cd   : > { %10076 = vmatpush1.bf16.msk.msra.mxu0 %vm10075_vm6, %v10457_v19  ;;  %10204 = vmatpush1.bf16.msk.msra.mxu1 %vm10203_vm9, %v10457_v19  ;;  %vm10077_vm12 = vmpackc.low %vm4613_vm5, %vm4610_vm4  ;;  %vm5471_vm4 = vcmp.eq.s32.totalorder %v14509_v55, %v14497_v48  ;;  %vm4615_vm6 = vcmp.eq.s32.totalorder %v14506_v36, %v14482_v43  ;;  %vm5467_vm9 = vcmp.eq.s32.totalorder %v14508_v57, %v14498_v42 }
 0x2ce   : > { %10078 = vmatprep.subr.msk.bf16.mxu0 %vm10077_vm12, %v10457_v19  ;;  %vm10205_vm15 = vmpackc.low %vm5465_vm8, %vm5462_vm7  ;;  %vm4618_vm7 = vcmp.eq.s32.totalorder %v14507_v62, %v14482_v43  ;;  %vm4622_vm12 = vcmp.eq.s32.totalorder %v11311_v21, %v14480_v40 }
 0x2cf   : > { %10206 = vmatprep.subr.msk.bf16.mxu1 %vm10205_vm15, %v10457_v19  ;;  %vm10079_vm2 = vmpackc.low %vm4612_vm11, %vm4609_vm10  ;;  %vm5470_vm10 = vcmp.eq.s32.totalorder %v14509_v55, %v14498_v42  ;;  %vm5474_vm15 = vcmp.eq.s32.totalorder %v14467_v29, %v14497_v48 }
 0x2d0   : > { %vm10207_vm5 = vmpackc.low %vm5464_vm14, %vm5461_vm13  ;;  %vm4625_vm13 = vcmp.eq.s32.totalorder %v14432_v35, %v14480_v40 }
 0x2d1   : > { %10080 = vmatpush1.bf16.msk.msra.mxu0 %vm10079_vm2, %v10457_v19  ;;  %10208 = vmatpush1.bf16.msk.msra.mxu1 %vm10207_vm5, %v10457_v19  ;;  %vm10081_vm8 = vmpackc.low %vm4619_vm1, %vm4616_vm0  ;;  %vm5477_vm0 = vcmp.eq.s32.totalorder %v14468_v8, %v14497_v48  ;;  %vm4621_vm2 = vcmp.eq.s32.totalorder %v11311_v21, %v14482_v43  ;;  %vm5473_vm5 = vcmp.eq.s32.totalorder %v14467_v29, %v14498_v42 }
 0x2d2   : > { %10082 = vmatprep.subr.msk.bf16.mxu0 %vm10081_vm8, %v10457_v19  ;;  %vm10209_vm11 = vmpackc.low %vm5471_vm4, %vm5468_vm3  ;;  %vm4624_vm3 = vcmp.eq.s32.totalorder %v14432_v35, %v14482_v43  ;;  %vm4628_vm8 = vcmp.eq.s32.totalorder %v11349_v31, %v14480_v40 }
 0x2d3   : > { %10210 = vmatprep.subr.msk.bf16.mxu1 %vm10209_vm11, %v10457_v19  ;;  %vm10083_vm14 = vmpackc.low %vm4618_vm7, %vm4615_vm6  ;;  %vm5476_vm6 = vcmp.eq.s32.totalorder %v14468_v8, %v14498_v42  ;;  %vm5480_vm11 = vcmp.eq.s32.totalorder %v11027_v44, %v14497_v48 }
 0x2d4   : > { %vm10211_vm1 = vmpackc.low %vm5470_vm10, %vm5467_vm9  ;;  %vm4631_vm9 = vcmp.eq.s32.totalorder %v11352_v30, %v14480_v40  ;;  %v14510_v40 = vld [vmem:[#allocation29_spill] sm:$0xff] }
 0x2d5   : > { %10084 = vmatpush1.bf16.msk.msra.mxu0 %vm10083_vm14, %v10457_v19  ;;  %10212 = vmatpush1.bf16.msk.msra.mxu1 %vm10211_vm1, %v10457_v19  ;;  %vm10085_vm4 = vmpackc.low %vm4625_vm13, %vm4622_vm12  ;;  %vm5483_vm12 = vcmp.eq.s32.totalorder %v11030_v50, %v14497_v48  ;;  %vm4627_vm14 = vcmp.eq.s32.totalorder %v11349_v31, %v14482_v43  ;;  %vm5479_vm1 = vcmp.eq.s32.totalorder %v11027_v44, %v14498_v42 }
 0x2d6   : > { %10086 = vmatprep.subr.msk.bf16.mxu0 %vm10085_vm4, %v10457_v19  ;;  %vm10213_vm7 = vmpackc.low %vm5477_vm0, %vm5474_vm15  ;;  %vm4630_vm15 = vcmp.eq.s32.totalorder %v11352_v30, %v14482_v43  ;;  %vm5486_vm4 = vcmp.eq.s32.totalorder %v14488_v26, %v14497_v48  ;;  %v14527_v43 = vld [vmem:[#allocation3_spill] sm:$0xff] }
 0x2d7   : > { %10214 = vmatprep.subr.msk.bf16.mxu1 %vm10213_vm7, %v10457_v19  ;;  %vm10087_vm10 = vmpackc.low %vm4624_vm3, %vm4621_vm2  ;;  %vm5482_vm2 = vcmp.eq.s32.totalorder %v11030_v50, %v14498_v42  ;;  %vm5439_vm7 = vcmp.eq.s32.totalorder %v14457_v14, %v14510_v40 }
 0x2d8   : > { %vm10215_vm13 = vmpackc.low %vm5476_vm6, %vm5473_vm5  ;;  %vm5489_vm5 = vcmp.eq.s32.totalorder %v11078_v39, %v14497_v48 }
 0x2d9   : > { %10088 = vmatpush1.bf16.msk.msra.mxu0 %vm10087_vm10, %v10457_v19  ;;  %10216 = vmatpush1.bf16.msk.msra.mxu1 %vm10215_vm13, %v10457_v19  ;;  %vm10089_vm0 = vmpackc.low %vm4631_vm9, %vm4628_vm8  ;;  %vm5442_vm8 = vcmp.eq.s32.totalorder %v14458_v2, %v14510_v40  ;;  %vm5485_vm10 = vcmp.eq.s32.totalorder %v14488_v26, %v14498_v42  ;;  %vm5391_vm13 = vcmp.eq.s32.totalorder %v14455_v47, %v14510_v40  ;;  %v14526_v2 = vld [vmem:[#allocation48_spill] sm:$0xff] }
 0x2da   : > { %10090 = vmatprep.subr.msk.bf16.mxu0 %vm10089_vm0, %v10457_v19  ;;  %vm10217_vm3 = vmpackc.low %vm5483_vm12, %vm5480_vm11  ;;  %vm5488_vm11 = vcmp.eq.s32.totalorder %v11078_v39, %v14498_v42  ;;  %vm5492_vm0 = vcmp.eq.s32.totalorder %v11117_v63, %v14497_v48 }
 0x2db   : > { %10218 = vmatprep.subr.msk.bf16.mxu1 %vm10217_vm3, %v10457_v19  ;;  %vm10091_vm6 = vmpackc.low %vm4630_vm15, %vm4627_vm14  ;;  %vm5394_vm14 = vcmp.eq.s32.totalorder %v10725_v51, %v14510_v40  ;;  %vm5445_vm3 = vcmp.eq.s32.totalorder %v14459_v9, %v14510_v40  ;;  %v13756_v51 = vld [vmem:[%s10515_s30] sm:$0xff]  ;;  %v1544_v9 = vsub.f32 1.0, %v14526_v2 }
 0x2dc   : > { %vm10219_vm9 = vmpackc.low %vm5482_vm2, %vm5479_vm1  ;;  %vm5495_vm1 = vcmp.eq.s32.totalorder %v11125_v61, %v14497_v48 }
 0x2dd   : > { %10092 = vmatpush1.bf16.msk.msra.mxu0 %vm10091_vm6, %v10457_v19  ;;  %10220 = vmatpush1.bf16.msk.msra.mxu1 %vm10219_vm9, %v10457_v19  ;;  %vm10221_vm12 = vmpackc.low %vm5489_vm5, %vm5486_vm4  ;;  %vm5448_vm4 = vcmp.eq.s32.totalorder %v14460_v12, %v14510_v40  ;;  %vm5491_vm6 = vcmp.eq.s32.totalorder %v11117_v63, %v14498_v42  ;;  %vm5397_vm9 = vcmp.eq.s32.totalorder %v10734_v58, %v14510_v40  ;;  %v14512_v58 = vld [vmem:[#allocation58_spill] sm:$0xff] }
 0x2de   : > { %10222 = vmatprep.subr.msk.bf16.mxu1 %vm10221_vm12, %v10457_v19  ;;  %vm10285_vm15 = vmpackc.low %vm5442_vm8, %vm5439_vm7  ;;  %vm5494_vm7 = vcmp.eq.s32.totalorder %v11125_v61, %v14498_v42  ;;  %vm5498_vm12 = vcmp.eq.s32.totalorder %v11171_v6, %v14497_v48 }
 0x2df   : > { %10286 = vmatprep.subr.msk.bf16.mxu0 %vm10285_vm15, %v10457_v19  ;;  %vm10223_vm2 = vmpackc.low %vm5488_vm11, %vm5485_vm10  ;;  %vm5400_vm10 = vcmp.eq.s32.totalorder %v10737_v45, %v14510_v40  ;;  %vm5451_vm15 = vcmp.eq.s32.totalorder %v10840_v11, %v14510_v40  ;;  %v14513_v45 = vld [vmem:[#allocation35_spill] sm:$0xff] }
 0x2e0   : > { %5153 = vmatmul.mubr.f32.vlgmr.msra.gmra.mrb[12].mxu0 %v13425_v34  ;;  %6030 = vmatmul.mubr.f32.vlgmr.msra.gmra.mrb[16].mxu1 %v13756_v51  ;;  %vm10287_vm5 = vmpackc.low %vm5394_vm14, %vm5391_vm13  ;;  %vm5501_vm13 = vcmp.eq.s32.totalorder %v14490_v25, %v14497_v48 }
 0x2e1   : > { %10224 = vmatpush1.bf16.msk.msra.mxu1 %vm10223_vm2, %v10457_v19  ;;  %10288 = vmatpush3.bf16.msk.msra.mxu0 %vm10287_vm5, %v10457_v19  ;;  %vm10225_vm8 = vmpackc.low %vm5495_vm1, %vm5492_vm0  ;;  %vm5454_vm0 = vcmp.eq.s32.totalorder %v14462_v4, %v14510_v40  ;;  %vm5497_vm2 = vcmp.eq.s32.totalorder %v11171_v6, %v14498_v42  ;;  %vm5403_vm5 = vcmp.eq.s32.totalorder %v10790_v20, %v14510_v40  ;;  %v14525_v4 = vld [vmem:[#allocation19_spill] sm:$0xff] }
 0x2e2   : > { %10226 = vmatprep.subr.msk.bf16.mxu1 %vm10225_vm8, %v10457_v19  ;;  %vm10289_vm11 = vmpackc.low %vm5448_vm4, %vm5445_vm3  ;;  %6171 = vmatprep.mubr.f32.mxu0 %v10522_v7  ;;  %vm5500_vm3 = vcmp.eq.s32.totalorder %v14490_v25, %v14498_v42  ;;  %vm5504_vm8 = vcmp.eq.s32.totalorder %v11216_v10, %v14497_v48  ;;  %v14511_v7 = vld [vmem:[#allocation32_spill] sm:$0xff]  ;;  %v1564_v47 = vrot.slane %v14525_v4, 1  ;;  %v1576_v14 = vrot.slane %v14525_v4, 2 }
 0x2e3   : > { %10290 = vmatprep.subr.msk.bf16.mxu0 %vm10289_vm11, %v10457_v19  ;;  %vm10227_vm14 = vmpackc.low %vm5494_vm7, %vm5491_vm6  ;;  %6100 = vmatprep.mubr.f32.mxu1 %v14447_v18  ;;  %vm5406_vm6 = vcmp.eq.s32.totalorder %v10832_v22, %v14510_v40  ;;  %vm5457_vm11 = vcmp.eq.s32.totalorder %v10875_v59, %v14510_v40 }
 0x2e4   : > { %vm10291_vm1 = vmpackc.low %vm5400_vm10, %vm5397_vm9  ;;  %vm5507_vm9 = vcmp.eq.s32.totalorder %v14492_v41, %v14497_v48 }
 0x2e5   : > { %10228 = vmatpush1.bf16.msk.msra.mxu1 %vm10227_vm14, %v10457_v19  ;;  %10292 = vmatpush3.bf16.msk.msra.mxu0 %vm10291_vm1, %v10457_v19  ;;  %vm10229_vm4 = vmpackc.low %vm5501_vm13, %vm5498_vm12  ;;  %vm5460_vm12 = vcmp.eq.s32.totalorder %v14503_v17, %v14510_v40  ;;  %vm5503_vm14 = vcmp.eq.s32.totalorder %v11216_v10, %v14498_v42  ;;  %vm5409_vm1 = vcmp.eq.s32.totalorder %v10864_v15, %v14510_v40  ;;  %v1577_v17 = vrot.slane %v14526_v2, 2 }
 0x2e6   : > { %10230 = vmatprep.subr.msk.bf16.mxu1 %vm10229_vm4, %v10457_v19  ;;  %vm10293_vm7 = vmpackc.low %vm5454_vm0, %vm5451_vm15  ;;  %vm5506_vm15 = vcmp.eq.s32.totalorder %v14492_v41, %v14498_v42  ;;  %vm5510_vm4 = vcmp.eq.s32.totalorder %v11254_v46, %v14497_v48 }
 0x2e7   : > { %10294 = vmatprep.subr.msk.bf16.mxu0 %vm10293_vm7, %v10457_v19  ;;  %vm10231_vm10 = vmpackc.low %vm5500_vm3, %vm5497_vm2  ;;  %vm5412_vm2 = vcmp.eq.s32.totalorder %v10867_v56, %v14510_v40  ;;  %vm5463_vm7 = vcmp.eq.s32.totalorder %v14504_v16, %v14510_v40 }
 0x2e8   : > { %vm10295_vm13 = vmpackc.low %vm5406_vm6, %vm5403_vm5  ;;  %vm5513_vm5 = vcmp.eq.s32.totalorder %v11257_v5, %v14497_v48 }
 0x2e9   : > { %10232 = vmatpush1.bf16.msk.msra.mxu1 %vm10231_vm10, %v10457_v19  ;;  %10296 = vmatpush3.bf16.msk.msra.mxu0 %vm10295_vm13, %v10457_v19  ;;  %vm10233_vm0 = vmpackc.low %vm5507_vm9, %vm5504_vm8  ;;  %vm5466_vm8 = vcmp.eq.s32.totalorder %v14505_v13, %v14510_v40  ;;  %vm5509_vm10 = vcmp.eq.s32.totalorder %v11254_v46, %v14498_v42  ;;  %vm5415_vm13 = vcmp.eq.s32.totalorder %v14511_v7, %v14510_v40 }
 0x2ea   : > { %10234 = vmatprep.subr.msk.bf16.mxu1 %vm10233_vm0, %v10457_v19  ;;  %vm10297_vm3 = vmpackc.low %vm5460_vm12, %vm5457_vm11  ;;  %vm5512_vm11 = vcmp.eq.s32.totalorder %v11257_v5, %v14498_v42  ;;  %vm5516_vm0 = vcmp.eq.s32.totalorder %v14495_v23, %v14497_v48 }
 0x2eb   : > { %10298 = vmatprep.subr.msk.bf16.mxu0 %vm10297_vm3, %v10457_v19  ;;  %vm10235_vm6 = vmpackc.low %vm5506_vm15, %vm5503_vm14  ;;  %vm5418_vm14 = vcmp.eq.s32.totalorder %v10905_v49, %v14510_v40  ;;  %vm5469_vm3 = vcmp.eq.s32.totalorder %v14508_v57, %v14510_v40  ;;  %v14514_v57 = vld [vmem:[#allocation36_spill] sm:$0xff] }
 0x2ec   : > { %vm10299_vm9 = vmpackc.low %vm5412_vm2, %vm5409_vm1  ;;  %vm5519_vm1 = vcmp.eq.s32.totalorder %v14512_v58, %v14497_v48  ;;  %v14521_v49 = vld [vmem:[#allocation8_spill] sm:$0xff] }
 0x2ed   : > { %10236 = vmatpush1.bf16.msk.msra.mxu1 %vm10235_vm6, %v10457_v19  ;;  %10300 = vmatpush3.bf16.msk.msra.mxu0 %vm10299_vm9, %v10457_v19  ;;  %vm10237_vm12 = vmpackc.low %vm5513_vm5, %vm5510_vm4  ;;  %vm5472_vm4 = vcmp.eq.s32.totalorder %v14509_v55, %v14510_v40  ;;  %vm5515_vm6 = vcmp.eq.s32.totalorder %v14495_v23, %v14498_v42  ;;  %vm5421_vm9 = vcmp.eq.s32.totalorder %v14513_v45, %v14510_v40  ;;  %v1553_v45 = vrot.slane %v1544_v9, 3 }
 0x2ee   : > { %10238 = vmatprep.subr.msk.bf16.mxu1 %vm10237_vm12, %v10457_v19  ;;  %vm10301_vm15 = vmpackc.low %vm5466_vm8, %vm5463_vm7  ;;  %vm5518_vm7 = vcmp.eq.s32.totalorder %v14512_v58, %v14498_v42  ;;  %vm5522_vm12 = vcmp.eq.s32.totalorder %v11330_v0, %v14497_v48  ;;  %v1546_v55 = vsub.f32 %v14527_v43, %v14525_v4 }
 0x2ef   : > { %10302 = vmatprep.subr.msk.bf16.mxu0 %vm10301_vm15, %v10457_v19  ;;  %vm10239_vm2 = vmpackc.low %vm5512_vm11, %vm5509_vm10  ;;  %vm5424_vm10 = vcmp.eq.s32.totalorder %v14514_v57, %v14510_v40  ;;  %vm5475_vm15 = vcmp.eq.s32.totalorder %v14467_v29, %v14510_v40  ;;  %v14519_v29 = vld [vmem:[#allocation59_spill] sm:$0xff] }
 0x2f0   : > { %vm10303_vm5 = vmpackc.low %vm5418_vm14, %vm5415_vm13  ;;  %vm5525_vm13 = vcmp.eq.s32.totalorder %v11333_v60, %v14497_v48  ;;  %v1545_v11 = vsub.f32 1.0, %v14519_v29  ;;  %v1566_v15 = vrot.slane %v14519_v29, 1  ;;  %v1578_v56 = vrot.slane %v14519_v29, 2  ;;  %v14530_v57 = vld [vmem:[#allocation7_spill] sm:$0xff] }
 0x2f1   : > { %10240 = vmatpush1.bf16.msk.msra.mxu1 %vm10239_vm2, %v10457_v19  ;;  %10304 = vmatpush3.bf16.msk.msra.mxu0 %vm10303_vm5, %v10457_v19  ;;  %vm10241_vm8 = vmpackc.low %vm5519_vm1, %vm5516_vm0  ;;  %vm5478_vm0 = vcmp.eq.s32.totalorder %v14468_v8, %v14510_v40  ;;  %vm5521_vm2 = vcmp.eq.s32.totalorder %v11330_v0, %v14498_v42  ;;  %vm5427_vm5 = vcmp.eq.s32.totalorder %v10978_v32, %v14510_v40  ;;  %v14518_v8 = vld [vmem:[#allocation54_spill] sm:$0xff]  ;;  %v14523_v32 = vld [vmem:[#allocation20_spill] sm:$0xff] }
 0x2f2   : > { %10242 = vmatprep.subr.msk.bf16.mxu1 %vm10241_vm8, %v10457_v19  ;;  %vm10305_vm11 = vmpackc.low %vm5472_vm4, %vm5469_vm3  ;;  %vm5524_vm3 = vcmp.eq.s32.totalorder %v11333_v60, %v14498_v42  ;;  %vm5528_vm8 = vcmp.eq.s32.totalorder %v11368_v37, %v14497_v48  ;;  %v1554_v59 = vrot.slane %v1545_v11, 3 }
 0x2f3   : > { %10306 = vmatprep.subr.msk.bf16.mxu0 %vm10305_vm11, %v10457_v19  ;;  %v13857_v20 = vpop.f32.mrb[6].mxu0  ;;  %vm10243_vm14 = vmpackc.low %vm5518_vm7, %vm5515_vm6  ;;  %vm5430_vm6 = vcmp.eq.s32.totalorder %v10981_v33, %v14510_v40  ;;  %vm5481_vm11 = vcmp.eq.s32.totalorder %v11027_v44, %v14510_v40  ;;  %v2482_v33 = vrot.slane %v14523_v32, 7 }
 0x2f4   : > { %v13863_v22 = vpop.f32.mrb[7].mxu0  ;;  %vm10307_vm1 = vmpackc.low %vm5424_vm10, %vm5421_vm9  ;;  %vm5531_vm9 = vcmp.eq.s32.totalorder %v11371_v28, %v14497_v48 }
 0x2f5   : > { %10244 = vmatpush1.bf16.msk.msra.mxu1 %vm10243_vm14, %v10457_v19  ;;  %10308 = vmatpush3.bf16.msk.msra.mxu0 %vm10307_vm1, %v10457_v19  ;;  %vm10245_vm4 = vmpackc.low %vm5525_vm13, %vm5522_vm12  ;;  %vm5484_vm12 = vcmp.eq.s32.totalorder %v11030_v50, %v14510_v40  ;;  %vm5527_vm14 = vcmp.eq.s32.totalorder %v11368_v37, %v14498_v42  ;;  %vm5433_vm1 = vcmp.eq.s32.totalorder %v11016_v52, %v14510_v40  ;;  %v2476_v52 = vsub.f32 1.0, %v14523_v32 }
 0x2f6   : > { %10246 = vmatprep.subr.msk.bf16.mxu1 %vm10245_vm4, %v10457_v19  ;;  %vm10309_vm7 = vmpackc.low %vm5478_vm0, %vm5475_vm15  ;;  %vm5530_vm15 = vcmp.eq.s32.totalorder %v11371_v28, %v14498_v42  ;;  %vm5534_vm4 = vcmp.eq.s32.totalorder %v14487_v24, %v14497_v48 }
 0x2f7   : > { %10310 = vmatprep.subr.msk.bf16.mxu0 %vm10309_vm7, %v10457_v19  ;;  %vm10247_vm10 = vmpackc.low %vm5524_vm3, %vm5521_vm2  ;;  %vm5436_vm2 = vcmp.eq.s32.totalorder %v11019_v54, %v14510_v40  ;;  %vm5535_vm7 = vcmp.eq.s32.totalorder %v14487_v24, %v14510_v40  ;;  %v14524_v54 = vld [vmem:[#allocation21_spill] sm:$0xff] }
 0x2f8   : > { %vm10311_vm13 = vmpackc.low %vm5430_vm6, %vm5427_vm5  ;;  %vm5537_vm5 = vcmp.eq.s32.totalorder %v14472_v27, %v14497_v48  ;;  %v2477_v44 = vsub.f32 1.0, %v14524_v54  ;;  %v2483_v50 = vrot.slane %v14524_v54, 7 }
 0x2f9   : > { %10248 = vmatpush1.bf16.msk.msra.mxu1 %vm10247_vm10, %v10457_v19  ;;  %10312 = vmatpush3.bf16.msk.msra.mxu0 %vm10311_vm13, %v10457_v19  ;;  %vm10249_vm0 = vmpackc.low %vm5531_vm9, %vm5528_vm8  ;;  %vm5538_vm8 = vcmp.eq.s32.totalorder %v14472_v27, %v14510_v40  ;;  %vm5533_vm10 = vcmp.eq.s32.totalorder %v14487_v24, %v14498_v42  ;;  %vm5487_vm13 = vcmp.eq.s32.totalorder %v14488_v26, %v14510_v40  ;;  %v2494_v24 = vrot.slane %v2476_v52, 2  ;;  %v14528_v26 = vld [vmem:[#allocation4_spill] sm:$0xff] }
 0x2fa   : > { %10250 = vmatprep.subr.msk.bf16.mxu1 %vm10249_vm0, %v10457_v19  ;;  %vm10313_vm3 = vmpackc.low %vm5484_vm12, %vm5481_vm11  ;;  %vm5536_vm11 = vcmp.eq.s32.totalorder %v14472_v27, %v14498_v42  ;;  %vm5540_vm0 = vcmp.eq.s32.totalorder %v14473_v53, %v14497_v48  ;;  %v1543_v27 = vsub.f32 1.0, %v14525_v4 }
 0x2fb   : > { %10314 = vmatprep.subr.msk.bf16.mxu0 %vm10313_vm3, %v10457_v19  ;;  %vm10251_vm6 = vmpackc.low %vm5530_vm15, %vm5527_vm14  ;;  %vm5490_vm14 = vcmp.eq.s32.totalorder %v11078_v39, %v14510_v40  ;;  %vm5541_vm3 = vcmp.eq.s32.totalorder %v14473_v53, %v14510_v40  ;;  %v14515_v39 = vld [vmem:[#allocation50_spill] sm:$0xff] }
 0x2fc   : > { %vm10315_vm9 = vmpackc.low %vm5436_vm2, %vm5433_vm1  ;;  %vm5543_vm1 = vcmp.eq.s32.totalorder %v14474_v38, %v14497_v48  ;;  %v1552_v16 = vrot.slane %v1543_v27, 3 }
 0x2fd   : > { %10252 = vmatpush1.bf16.msk.msra.mxu1 %vm10251_vm6, %v10457_v19  ;;  %10316 = vmatpush3.bf16.msk.msra.mxu0 %vm10315_vm9, %v10457_v19  ;;  %vm10253_vm12 = vmpackc.low %vm5537_vm5, %vm5534_vm4  ;;  %vm5544_vm4 = vcmp.eq.s32.totalorder %v14474_v38, %v14510_v40  ;;  %vm5539_vm6 = vcmp.eq.s32.totalorder %v14473_v53, %v14498_v42  ;;  %vm5493_vm9 = vcmp.eq.s32.totalorder %v11117_v63, %v14510_v40  ;;  %v14517_v63 = vld [vmem:[#allocation53_spill] sm:$0xff]  ;;  %v1565_v53 = vrot.slane %v14526_v2, 1 }
 0x2fe   : > { %10254 = vmatprep.subr.msk.bf16.mxu1 %vm10253_vm12, %v10457_v19  ;;  %vm10317_vm15 = vmpackc.low %vm5538_vm8, %vm5535_vm7  ;;  %vm5542_vm7 = vcmp.eq.s32.totalorder %v14474_v38, %v14498_v42  ;;  %vm5546_vm12 = vcmp.eq.s32.totalorder %v14489_v1, %v14497_v48 }
 0x2ff   : > { %10318 = vmatprep.subr.msk.bf16.mxu0 %vm10317_vm15, %v10457_v19  ;;  %vm10255_vm2 = vmpackc.low %vm5536_vm11, %vm5533_vm10  ;;  %vm5496_vm10 = vcmp.eq.s32.totalorder %v11125_v61, %v14510_v40  ;;  %vm5547_vm15 = vcmp.eq.s32.totalorder %v14489_v1, %v14510_v40  ;;  %v14516_v61 = vld [vmem:[#allocation51_spill] sm:$0xff] }
 0x300   : > { %6172 = vmatmul.mubr.f32.vlgmr.msra.gmra.mrb[14].mxu0 %v13756_v51  ;;  %vm10319_vm5 = vmpackc.low %vm5490_vm14, %vm5487_vm13  ;;  %vm5549_vm13 = vcmp.eq.s32.totalorder %v14437_v3, %v14497_v48 }
 0x301   : > { %10256 = vmatpush1.bf16.msk.msra.mxu1 %vm10255_vm2, %v10457_v19  ;;  %10320 = vmatpush3.bf16.msk.msra.mxu0 %vm10319_vm5, %v10457_v19  ;;  %vm10257_vm8 = vmpackc.low %vm5543_vm1, %vm5540_vm0  ;;  %vm5550_vm0 = vcmp.eq.s32.totalorder %v14437_v3, %v14510_v40  ;;  %vm5545_vm2 = vcmp.eq.s32.totalorder %v14489_v1, %v14498_v42  ;;  %vm5499_vm5 = vcmp.eq.s32.totalorder %v11171_v6, %v14510_v40 }
 0x302   : > { %10258 = vmatprep.subr.msk.bf16.mxu1 %vm10257_vm8, %v10457_v19  ;;  %vm10321_vm11 = vmpackc.low %vm5544_vm4, %vm5541_vm3  ;;  %6241 = vmatprep.mubr.f32.mxu0 %v14447_v18  ;;  %vm5548_vm3 = vcmp.eq.s32.totalorder %v14437_v3, %v14498_v42  ;;  %vm5552_vm8 = vcmp.eq.s32.totalorder %v14515_v39, %v14497_v48  ;;  %v2489_v1 = vsub.f32 %v14528_v26, %v2483_v50 }
 0x303   : > { %10322 = vmatprep.subr.msk.bf16.mxu0 %vm10321_vm11, %v10457_v19  ;;  %vm10259_vm14 = vmpackc.low %vm5542_vm7, %vm5539_vm6  ;;  %vm5502_vm6 = vcmp.eq.s32.totalorder %v14490_v25, %v14510_v40  ;;  %vm5553_vm11 = vcmp.eq.s32.totalorder %v14515_v39, %v14510_v40 }
 0x304   : > { %vm10323_vm1 = vmpackc.low %vm5496_vm10, %vm5493_vm9  ;;  %vm5555_vm9 = vcmp.eq.s32.totalorder %v14516_v61, %v14497_v48 }
 0x305   : > { %10260 = vmatpush1.bf16.msk.msra.mxu1 %vm10259_vm14, %v10457_v19  ;;  %10324 = vmatpush3.bf16.msk.msra.mxu0 %vm10323_vm1, %v10457_v19  ;;  %vm10261_vm4 = vmpackc.low %vm5549_vm13, %vm5546_vm12  ;;  %vm5556_vm12 = vcmp.eq.s32.totalorder %v14516_v61, %v14510_v40  ;;  %vm5551_vm14 = vcmp.eq.s32.totalorder %v14515_v39, %v14498_v42  ;;  %vm5505_vm1 = vcmp.eq.s32.totalorder %v11216_v10, %v14510_v40 }
 0x306   : > { %10262 = vmatprep.subr.msk.bf16.mxu1 %vm10261_vm4, %v10457_v19  ;;  %vm10325_vm7 = vmpackc.low %vm5550_vm0, %vm5547_vm15  ;;  %vm5554_vm15 = vcmp.eq.s32.totalorder %v14516_v61, %v14498_v42  ;;  %vm5558_vm4 = vcmp.eq.s32.totalorder %v14517_v63, %v14497_v48  ;;  %v1571_v39 = vsub.f32 %v14530_v57, %v1565_v53  ;;  %v2504_v61 = vsub.f32 %v14530_v57, %v14524_v54 }
 0x307   : > { %10326 = vmatprep.subr.msk.bf16.mxu0 %vm10325_vm7, %v10457_v19  ;;  %vm10263_vm10 = vmpackc.low %vm5548_vm3, %vm5545_vm2  ;;  %vm5508_vm2 = vcmp.eq.s32.totalorder %v14492_v41, %v14510_v40  ;;  %vm5559_vm7 = vcmp.eq.s32.totalorder %v14517_v63, %v14510_v40  ;;  %v2488_v41 = vsub.f32 %v14527_v43, %v2482_v33 }
 0x308   : > { %vm10327_vm13 = vmpackc.low %vm5502_vm6, %vm5499_vm5  ;;  %vm5561_vm5 = vcmp.eq.s32.totalorder %v14518_v8, %v14497_v48 }
 0x309   : > { %10264 = vmatpush1.bf16.msk.msra.mxu1 %vm10263_vm10, %v10457_v19  ;;  %10328 = vmatpush3.bf16.msk.msra.mxu0 %vm10327_vm13, %v10457_v19  ;;  %vm10265_vm0 = vmpackc.low %vm5555_vm9, %vm5552_vm8  ;;  %vm5562_vm8 = vcmp.eq.s32.totalorder %v14518_v8, %v14510_v40  ;;  %vm5557_vm10 = vcmp.eq.s32.totalorder %v14517_v63, %v14498_v42  ;;  %vm5511_vm13 = vcmp.eq.s32.totalorder %v11254_v46, %v14510_v40  ;;  %v2510_v63 = vrot.slane %v14524_v54, 1 }
 0x30a   : > { %10266 = vmatprep.subr.msk.bf16.mxu1 %vm10265_vm0, %v10457_v19  ;;  %vm10329_vm3 = vmpackc.low %vm5556_vm12, %vm5553_vm11  ;;  %vm5560_vm11 = vcmp.eq.s32.totalorder %v14518_v8, %v14498_v42  ;;  %vm5564_vm0 = vcmp.eq.s32.totalorder %v14506_v36, %v14497_v48  ;;  %v14531_v8 = vld [vmem:[#allocation9_spill] sm:$0xff] }
 0x30b   : > { %10330 = vmatprep.subr.msk.bf16.mxu0 %vm10329_vm3, %v10457_v19  ;;  %vm10267_vm6 = vmpackc.low %vm5554_vm15, %vm5551_vm14  ;;  %vm5514_vm14 = vcmp.eq.s32.totalorder %v11257_v5, %v14510_v40  ;;  %vm5565_vm3 = vcmp.eq.s32.totalorder %v14506_v36, %v14510_v40 }
 0x30c   : > { %vm10331_vm9 = vmpackc.low %vm5508_vm2, %vm5505_vm1  ;;  %vm5567_vm1 = vcmp.eq.s32.totalorder %v14507_v62, %v14497_v48 }
 0x30d   : > { %10268 = vmatpush1.bf16.msk.msra.mxu1 %vm10267_vm6, %v10457_v19  ;;  %10332 = vmatpush3.bf16.msk.msra.mxu0 %vm10331_vm9, %v10457_v19  ;;  %vm10269_vm12 = vmpackc.low %vm5561_vm5, %vm5558_vm4  ;;  %vm5568_vm4 = vcmp.eq.s32.totalorder %v14507_v62, %v14510_v40  ;;  %vm5563_vm6 = vcmp.eq.s32.totalorder %v14506_v36, %v14498_v42  ;;  %vm5517_vm9 = vcmp.eq.s32.totalorder %v14495_v23, %v14510_v40 }
 0x30e   : > { %10270 = vmatprep.subr.msk.bf16.mxu1 %vm10269_vm12, %v10457_v19  ;;  %vm10333_vm15 = vmpackc.low %vm5562_vm8, %vm5559_vm7  ;;  %vm5566_vm7 = vcmp.eq.s32.totalorder %v14507_v62, %v14498_v42  ;;  %vm5570_vm12 = vcmp.eq.s32.totalorder %v11311_v21, %v14497_v48 }
 0x30f   : > { %10334 = vmatprep.subr.msk.bf16.mxu0 %vm10333_vm15, %v10457_v19  ;;  %vm10271_vm2 = vmpackc.low %vm5560_vm11, %vm5557_vm10  ;;  %vm5520_vm10 = vcmp.eq.s32.totalorder %v14512_v58, %v14510_v40  ;;  %vm5571_vm15 = vcmp.eq.s32.totalorder %v11311_v21, %v14510_v40  ;;  %v2509_v58 = vrot.slane %v14523_v32, 1 }
 0x310   : > { %vm10335_vm5 = vmpackc.low %vm5514_vm14, %vm5511_vm13  ;;  %vm5573_vm13 = vcmp.eq.s32.totalorder %v14432_v35, %v14497_v48 }
 0x311   : > { %10272 = vmatpush1.bf16.msk.msra.mxu1 %vm10271_vm2, %v10457_v19  ;;  %10336 = vmatpush3.bf16.msk.msra.mxu0 %vm10335_vm5, %v10457_v19  ;;  %vm10273_vm8 = vmpackc.low %vm5567_vm1, %vm5564_vm0  ;;  %vm5574_vm0 = vcmp.eq.s32.totalorder %v14432_v35, %v14510_v40  ;;  %vm5569_vm2 = vcmp.eq.s32.totalorder %v11311_v21, %v14498_v42  ;;  %vm5523_vm5 = vcmp.eq.s32.totalorder %v11330_v0, %v14510_v40  ;;  %v14522_v21 = vld [vmem:[#allocation11_spill] sm:$0xff] }
 0x312   : > { %10274 = vmatprep.subr.msk.bf16.mxu1 %vm10273_vm8, %v10457_v19  ;;  %vm10337_vm11 = vmpackc.low %vm5568_vm4, %vm5565_vm3  ;;  %vm5572_vm3 = vcmp.eq.s32.totalorder %v14432_v35, %v14498_v42  ;;  %vm5576_vm8 = vcmp.eq.s32.totalorder %v11349_v31, %v14497_v48  ;;  %v10427_v35 = vld [vmem:[%s10515_s30 + $0x8] sm:$0xff] }
 0x313   : > { %10338 = vmatprep.subr.msk.bf16.mxu0 %vm10337_vm11, %v10457_v19  ;;  %v9019_v36 = vpop.f32.mrb[8].mxu0  ;;  %vm10275_vm14 = vmpackc.low %vm5566_vm7, %vm5563_vm6  ;;  %vm5526_vm6 = vcmp.eq.s32.totalorder %v11333_v60, %v14510_v40  ;;  %vm5577_vm11 = vcmp.eq.s32.totalorder %v11349_v31, %v14510_v40 }
 0x314   : > { %v9020_v46 = vpop.f32.mrb[9].mxu0  ;;  %vm10339_vm1 = vmpackc.low %vm5520_vm10, %vm5517_vm9  ;;  %vm5579_vm9 = vcmp.eq.s32.totalorder %v11352_v30, %v14497_v48  ;;  %v2495_v48 = vrot.slane %v2477_v44, 2 }
 0x315   : > { %v9021_v5 = vadd.f32 %v9020_v46, %v9019_v36  ;;  %10276 = vmatpush1.bf16.msk.msra.mxu1 %vm10275_vm14, %v10457_v19  ;;  %10340 = vmatpush3.bf16.msk.msra.mxu0 %vm10339_vm1, %v10457_v19  ;;  %vm10277_vm4 = vmpackc.low %vm5573_vm13, %vm5570_vm12  ;;  %vm5580_vm12 = vcmp.eq.s32.totalorder %v11352_v30, %v14510_v40  ;;  %vm5575_vm14 = vcmp.eq.s32.totalorder %v11349_v31, %v14498_v42 }
 0x316   : > { %10278 = vmatprep.subr.msk.bf16.mxu1 %vm10277_vm4, %v10457_v19  ;;  %vm10341_vm7 = vmpackc.low %vm5574_vm0, %vm5571_vm15  ;;  %vm5578_vm15 = vcmp.eq.s32.totalorder %v11352_v30, %v14498_v42  ;;  %vm5529_vm1 = vcmp.eq.s32.totalorder %v11368_v37, %v14510_v40  ;;  %v1572_v37 = vsub.f32 %v14521_v49, %v1566_v15  ;;  %v1584_v30 = vsub.f32 %v14522_v21, %v1578_v56 }
 0x317   : > { %10342 = vmatprep.subr.msk.bf16.mxu0 %vm10341_vm7, %v10457_v19  ;;  %vm10279_vm10 = vmpackc.low %vm5572_vm3, %vm5569_vm2  ;;  %vm5532_vm2 = vcmp.eq.s32.totalorder %v11371_v28, %v14510_v40  ;;  %v14529_v40 = vld [vmem:[#allocation6_spill] sm:$0xff]  ;;  %v1582_v36 = vsub.f32 %v14531_v8, %v1576_v14  ;;  %v2500_v46 = vmul.f32 %v2494_v24, %v2488_v41  ;;  %v1558_v15 = vmul.f32 %v1552_v16, %v1546_v55 }
 0x318   : > { %vm10343_vm13 = vmpackc.low %vm5526_vm6, %vm5523_vm5  ;;  %v1575_v38 = vmul.f32 %v1572_v37, %v1554_v59  ;;  %v1587_v6 = vmul.f32 %v1584_v30, %v1554_v59  ;;  %v1570_v51 = vsub.f32 %v14529_v40, %v1564_v47  ;;  %v2503_v7 = vsub.f32 %v14529_v40, %v14523_v32 }
 0x319   : > { %10280 = vmatpush1.bf16.msk.msra.mxu1 %vm10279_vm10, %v10457_v19  ;;  %10344 = vmatpush3.bf16.msk.msra.mxu0 %vm10343_vm13, %v10457_v19  ;;  %vm10281_vm0 = vmpackc.low %vm5579_vm9, %vm5576_vm8  ;;  %v2515_v37 = vsub.f32 %v14531_v8, %v2509_v58  ;;  %v1574_v32 = vmul.f32 %v1571_v39, %v1553_v45  ;;  %v1585_v52 = vmul.f32 %v1582_v36, %v1552_v16  ;;  %v3445_v55 = vrot.slane %v13857_v20, 7 }
 0x31a   : > { %10282 = vmatprep.subr.msk.bf16.mxu1 %vm10281_vm0, %v10457_v19  ;;  %vm10345_vm3 = vmpackc.low %vm5580_vm12, %vm5577_vm11  ;;  %v1593_v34 = vmul.f32 %v1575_v38, %v1575_v38  ;;  %v14088_v13 = vmul.f32 %v1587_v6, %v1587_v6  ;;  %v1573_v56 = vmul.f32 %v1570_v51, %v1552_v16  ;;  %v2521_v54 = vmul.f32 %v2500_v46, %v2500_v46 }
 0x31b   : > { %10346 = vmatprep.subr.msk.bf16.mxu0 %vm10345_vm3, %v10457_v19  ;;  %vm10283_vm4 = vmpackc.low %vm5578_vm15, %vm5575_vm14  ;;  %v1588_v47 = vmul.f32 %v1558_v15, %v1558_v15  ;;  %v1592_v9 = vmul.f32 %v1574_v32, %v1574_v32  ;;  %vm6325_vm6 = vcmask 1040384   ;;  %vm6342_vm7 = vcmask 0  }
 0x31c   : > { %vm10347_vm5 = vmpackc.low %vm5532_vm2, %vm5529_vm1 }
 0x31d   : > { %10284 = vmatpush1.bf16.msk.msra.mxu1 %vm10283_vm4, %v10457_v19  ;;  %10348 = vmatpush3.bf16.msk.msra.mxu0 %vm10347_vm5, %v10457_v19  ;;  %v14520_v19 = vld [vmem:[#allocation5_spill] sm:$0xff] }
 0x31e   : > { %v1548_v62 = vsub.f32 %v14520_v19, %v14519_v29 }
 0x320   : > { %6101 = vmatmul.mubr.f32.vlgmr.msra.gmra.mrb[16].mxu1 %v10427_v35  ;;  %6242 = vmatmul.mubr.f32.vlgmr.msra.gmra.mrb[16].mxu0 %v10427_v35  ;;  %v1560_v31 = vmul.f32 %v1554_v59, %v1548_v62  ;;  %v2501_v35 = vmul.f32 %v2495_v48, %v2489_v1  ;;  %v14533_v59 = vld [vmem:[#allocation10_spill] sm:$0xff]  ;;  %v3418_v1 = vsub.f32 1.0, %v13857_v20 }
 0x321   : > { %v1583_v62 = vsub.f32 %v14533_v59, %v1577_v17  ;;  %v2516_v33 = vsub.f32 %v14533_v59, %v2510_v63 }
 0x322   : > { %v1590_v3 = vmul.f32 %v1560_v31, %v1560_v31  ;;  %v2522_v50 = vmul.f32 %v2501_v35, %v2501_v35  ;;  %v3436_v35 = vrot.slane %v3418_v1, 1 }
 0x323   : > { %v1586_v14 = vmul.f32 %v1583_v62, %v1553_v45  ;;  %v2519_v53 = vmul.f32 %v2516_v33, %v2495_v48 }
 0x324   : > { %v14108_v30 = vadd.f32 %v1593_v34, %v1590_v3  ;;  %v3424_v34 = vrot.slane %v13857_v20, 6 }
 0x325   : > { %v2531_v36 = vmul.f32 %v2519_v53, %v2519_v53  ;;  %v1598_v15 = vmul.f32 %v1586_v14, %v1586_v14 }
 0x333   : > { %v14062_v60 = vpop.f32.mrb[10].mxu1  ;;  %v9054_v0 = vpop.f32.mrb[10].mxu0 }
 0x334   : > { %v14064_v18 = vpop.f32.mrb[11].mxu1  ;;  %v9055_v28 = vpop.f32.mrb[11].mxu0  ;;  %v4378_v32 = vrot.slane %v14062_v60, 6 }
 0x335   : > { %v9056_v10 = vadd.f32 %v9055_v28, %v9054_v0  ;;  %v1547_v0 = vsub.f32 %v14528_v26, %v14526_v2  ;;  %v2507_v28 = vmul.f32 %v2504_v61, %v2495_v48  ;;  %v2518_v2 = vmul.f32 %v2515_v37, %v2494_v24 }
 0x336   : > { %v3425_v48 = vrot.slane %v13863_v22, 6  ;;  %v1597_v61 = vmul.f32 %v1585_v52, %v1585_v52  ;;  %v4367_v33 = vrot.slane %v14064_v18, 5  ;;  %v4379_v52 = vrot.slane %v14064_v18, 6 }
 0x337   : > { %v14066_v23 = vadd.f32 %v9056_v10, %v9021_v5  ;;  %v2506_v5 = vmul.f32 %v2503_v7, %v2494_v24  ;;  %v14532_v10 = vld [vmem:[#allocation18_spill] sm:$0xff]  ;;  %v1559_v31 = vmul.f32 %v1553_v45, %v1547_v0  ;;  %v2525_v38 = vmul.f32 %v2507_v28, %v2507_v28 }
 0x338   : > { %v2478_v29 = vsub.f32 1.0, %v14532_v10  ;;  %v2484_v11 = vrot.slane %v14532_v10, 7  ;;  %v2511_v27 = vrot.slane %v14532_v10, 1  ;;  %v2505_v41 = vsub.f32 %v14521_v49, %v14532_v10 }
 0x339   : > { %v2524_v44 = vmul.f32 %v2506_v5, %v2506_v5  ;;  %v1589_v3 = vmul.f32 %v1559_v31, %v1559_v31  ;;  %v2528_v17 = vadd.f32 %v2525_v38, %v2522_v50  ;;  %v2530_v58 = vmul.f32 %v2518_v2, %v2518_v2 }
 0x33a   : > { %v2490_v6 = vsub.f32 %v14520_v19, %v2484_v11  ;;  %v2496_v4 = vrot.slane %v2478_v29, 2  ;;  %v2517_v7 = vsub.f32 %v14522_v21, %v2511_v27  ;;  %v3419_v24 = vsub.f32 1.0, %v13863_v22 }
 0x33b   : > { %v3446_v45 = vrot.slane %v13863_v22, 7  ;;  %v1595_v63 = vadd.f32 %v1592_v9, %v1589_v3  ;;  %v3430_v5 = vsub.f32 %v14527_v43, %v3424_v34  ;;  %v3451_v0 = vsub.f32 %v14529_v40, %v3445_v55 }
 0x33c   : > { %v2502_v16 = vmul.f32 %v2496_v4, %v2490_v6  ;;  %v2508_v51 = vmul.f32 %v2505_v41, %v2496_v4  ;;  %v14126_v28 = vadd.f32 %v2531_v36, %v2528_v17  ;;  %v2520_v10 = vmul.f32 %v2517_v7, %v2496_v4 }
 0x33d   : > { %v3437_v62 = vrot.slane %v3419_v24, 1  ;;  %v3452_v37 = vsub.f32 %v14530_v57, %v3446_v45  ;;  %v4366_v31 = vrot.slane %v14062_v60, 5  ;;  %v3442_v50 = vmul.f32 %v3436_v35, %v3430_v5 }
 0x33e   : > { %v2523_v29 = vmul.f32 %v2502_v16, %v2502_v16  ;;  %v2526_v11 = vmul.f32 %v2508_v51, %v2508_v51  ;;  %v3454_v38 = vmul.f32 %v3451_v0, %v3436_v35  ;;  %v2540_v4 = vrot.slane %v14126_v28, 1 }
 0x33f   : > { %v3455_v9 = vmul.f32 %v3452_v37, %v3437_v62  ;;  %v4372_v53 = vsub.f32 %v14527_v43, %v4366_v31  ;;  %v4384_v41 = vsub.f32 %v14529_v40, %v4378_v32  ;;  %v4385_v1 = vsub.f32 %v14530_v57, %v4379_v52 }
 0x340   : > { %v14140_v27 = vadd.f32 %v2526_v11, %v2523_v29  ;;  %v3457_v55 = vsub.f32 %v14531_v8, %v13857_v20  ;;  %v3463_v17 = vmul.f32 %v3442_v50, %v3442_v50  ;;  %v3466_v16 = vmul.f32 %v3454_v38, %v3454_v38 }
 0x341   : > { %v4360_v51 = vsub.f32 1.0, %v14062_v60  ;;  %v4390_v7 = vrot.slane %v14062_v60, 7  ;;  %v4391_v24 = vrot.slane %v14064_v18, 7  ;;  %v3458_v45 = vsub.f32 %v14533_v59, %v13863_v22 }
 0x342   : > { %v3469_v11 = vadd.f32 %v3466_v16, %v3463_v17  ;;  %v4368_v37 = vrot.slane %v14066_v23, 5  ;;  %v4380_v31 = vrot.slane %v14066_v23, 6 }
 0x343   : > { %v4387_v36 = vmul.f32 %v4384_v41, %v4360_v51  ;;  %v4397_v22 = vsub.f32 %v14533_v59, %v4391_v24 }
 0x345   : > { %v4405_v52 = vmul.f32 %v4387_v36, %v4387_v36 }
 0x353   : > { %v9089_v12 = vpop.f32.mrb[12].mxu1 }
 0x354   : > { %v9090_v25 = vpop.f32.mrb[13].mxu1 }
 0x355   : > { %v14086_v42 = vadd.f32 %v9090_v25, %v9089_v12  ;;  %v1591_v12 = vmul.f32 %v1573_v56, %v1573_v56  ;;  %v2527_v25 = vadd.f32 %v2524_v44, %v2521_v54  ;;  %v3431_v56 = vsub.f32 %v14528_v26, %v3425_v48 }
 0x356   : > { %v14136_v44 = vadd.f32 %v1598_v15, %v1595_v63  ;;  %v3460_v48 = vmul.f32 %v3457_v55, %v3436_v35  ;;  %v4375_v63 = vmul.f32 %v4372_v53, %v4360_v51  ;;  %v4396_v35 = vsub.f32 %v14531_v8, %v4390_v7 }
 0x357   : > { %v1594_v39 = vadd.f32 %v1591_v12, %v1588_v47  ;;  %v14122_v46 = vadd.f32 %v2530_v58, %v2527_v25  ;;  %v14142_v47 = vmul.f32 %v2520_v10, %v2520_v10  ;;  %v14534_v12 = vld [vmem:[#allocation46_spill] sm:$0xff]  ;;  %v3443_v3 = vmul.f32 %v3437_v62, %v3431_v56 }
 0x358   : > { %v3420_v14 = vsub.f32 1.0, %v14534_v12  ;;  %v3426_v2 = vrot.slane %v14534_v12, 6  ;;  %v4373_v25 = vsub.f32 %v14528_v26, %v4367_v33  ;;  %v3447_v34 = vrot.slane %v14534_v12, 7 }
 0x359   : > { %v14134_v54 = vadd.f32 %v1597_v61, %v1594_v39  ;;  %v2539_v6 = vrot.slane %v14122_v46, 1  ;;  %v4361_v58 = vsub.f32 1.0, %v14064_v18  ;;  %v3464_v39 = vmul.f32 %v3443_v3, %v3443_v3 }
 0x35a   : > { %v3467_v61 = vmul.f32 %v3455_v9, %v3455_v9  ;;  %v3432_v0 = vsub.f32 %v14520_v19, %v3426_v2  ;;  %v3438_v10 = vrot.slane %v3420_v14, 1  ;;  %v3453_v29 = vsub.f32 %v14521_v49, %v3447_v34 }
 0x35b   : > { %v4376_v5 = vmul.f32 %v4373_v25, %v4361_v58  ;;  %v4388_v20 = vmul.f32 %v4385_v1, %v4361_v58  ;;  %v3459_v60 = vsub.f32 %v14522_v21, %v14534_v12  ;;  %v3461_v18 = vmul.f32 %v3458_v45, %v3437_v62 }
 0x35c   : > { %v3472_v15 = vmul.f32 %v3460_v48, %v3460_v48  ;;  %v3470_v56 = vadd.f32 %v3467_v61, %v3464_v39  ;;  %v4402_v33 = vmul.f32 %v4375_v63, %v4375_v63  ;;  %v3444_v2 = vmul.f32 %v3438_v10, %v3432_v0 }
 0x35d   : > { %v4403_v50 = vmul.f32 %v4376_v5, %v4376_v5  ;;  %v4406_v38 = vmul.f32 %v4388_v20, %v4388_v20  ;;  %v3456_v12 = vmul.f32 %v3453_v29, %v3438_v10  ;;  %v3462_v3 = vmul.f32 %v3459_v60, %v3438_v10 }
 0x35e   : > { %v3475_v9 = vadd.f32 %v3472_v15, %v3469_v11  ;;  %v3473_v53 = vmul.f32 %v3461_v18, %v3461_v18  ;;  %v4399_v41 = vmul.f32 %v4396_v35, %v4360_v51  ;;  %v4400_v25 = vmul.f32 %v4397_v22, %v4361_v58 }
 0x35f   : > { %v4374_v1 = vsub.f32 %v14520_v19, %v4368_v37  ;;  %v4386_v34 = vsub.f32 %v14521_v49, %v4380_v31  ;;  %v4392_v55 = vrot.slane %v14066_v23, 7  ;;  %v4408_v7 = vadd.f32 %v4405_v52, %v4402_v33 }
 0x360   : > { %v3476_v16 = vadd.f32 %v3473_v53, %v3470_v56  ;;  %v4409_v24 = vadd.f32 %v4406_v38, %v4403_v50  ;;  %v4362_v48 = vsub.f32 1.0, %v14066_v23  ;;  %v3465_v36 = vmul.f32 %v3444_v2, %v3444_v2 }
 0x361   : > { %v3468_v51 = vmul.f32 %v3456_v12, %v3456_v12  ;;  %v4411_v58 = vmul.f32 %v4399_v41, %v4399_v41  ;;  %v4412_v5 = vmul.f32 %v4400_v25, %v4400_v25  ;;  %v3474_v20 = vmul.f32 %v3462_v3, %v3462_v3 }
 0x362   : > { %v4377_v0 = vmul.f32 %v4374_v1, %v4362_v48  ;;  %v4389_v10 = vmul.f32 %v4386_v34, %v4362_v48  ;;  %v4398_v29 = vsub.f32 %v14522_v21, %v4392_v55  ;;  %v3481_v60 = vrot.slane %v3475_v9, 2 }
 0x363   : > { %v4414_v11 = vadd.f32 %v4411_v58, %v4408_v7  ;;  %v4415_v18 = vadd.f32 %v4412_v5, %v4409_v24  ;;  %v1602_v56 = vadd.f32 %v14088_v13, %v14108_v30  ;;  %v2535_v37 = vadd.f32 %v14142_v47, %v14140_v27 }
 0x364   : > { %v2545_v31 = vadd.f32 %v2539_v6, %v14134_v54  ;;  %v3471_v33 = vadd.f32 %v3468_v51, %v3465_v36  ;;  %v4401_v52 = vmul.f32 %v4398_v29, %v4362_v48  ;;  %v4404_v50 = vmul.f32 %v4377_v0, %v4377_v0 }
 0x365   : > { %v4407_v38 = vmul.f32 %v4389_v10, %v4389_v10  ;;  %v4420_v3 = vrot.slane %v4414_v11, 3  ;;  %v4421_v27 = vrot.slane %v4415_v18, 3 }
 0x366   : > { %v3487_v2 = vadd.f32 %v3481_v60, %v2545_v31  ;;  %v3477_v13 = vadd.f32 %v3474_v20, %v3471_v33 }
 0x367   : > { %v4410_v30 = vadd.f32 %v4407_v38, %v4404_v50 }
 0x368   : > { %v4426_v9 = vadd.f32 %v4420_v3, %v3487_v2  ;;  %v3483_v6 = vrot.slane %v3477_v13, 2 }
 0x373   : > { %v9124_v32 = vpop.f32.mrb[14].mxu1 }
 0x374   : > { %v9125_v14 = vpop.f32.mrb[15].mxu1 }
 0x375   : > { %v9126_v62 = vadd.f32 %v9125_v14, %v9124_v32  ;;  %v2546_v32 = vadd.f32 %v2540_v4, %v14136_v44  ;;  %v2541_v14 = vrot.slane %v2535_v37, 1 }
 0x377   : > { %v5296_v17 = vadd.f32 %v9126_v62, %v14086_v42  ;;  %v3482_v42 = vrot.slane %v3476_v16, 2  ;;  %v4413_v62 = vmul.f32 %v4401_v52, %v4401_v52  ;;  %v2547_v47 = vadd.f32 %v2541_v14, %v1602_v56 }
 0x379   : > { %v5301_v45 = vsub.f32 1.0, %v5296_v17  ;;  %v5307_v39 = vrot.slane %v5296_v17, 4  ;;  %v5328_v61 = vrot.slane %v5296_v17, 5  ;;  %v5340_v63 = vrot.slane %v5296_v17, 6 }
 0x37a   : > { %v3488_v12 = vadd.f32 %v3482_v42, %v2546_v32  ;;  %v4416_v53 = vadd.f32 %v4413_v62, %v4410_v30  ;;  %v3489_v25 = vadd.f32 %v3483_v6, %v2547_v47 }
 0x37b   : > { %v5313_v35 = vsub.f32 %v14520_v19, %v5307_v39  ;;  %v5319_v23 = vrot.slane %v5301_v45, 7  ;;  %v5334_v22 = vsub.f32 %v14521_v49, %v5328_v61  ;;  %v5346_v15 = vsub.f32 %v14522_v21, %v5340_v63 }
 0x37c   : > { %v4427_v28 = vadd.f32 %v4421_v27, %v3488_v12  ;;  %v4422_v1 = vrot.slane %v4416_v53, 3 }
 0x37d   : > { %v5325_v46 = vmul.f32 %v5319_v23, %v5313_v35  ;;  %v5337_v54 = vmul.f32 %v5334_v22, %v5319_v23  ;;  %v5349_v44 = vmul.f32 %v5346_v15, %v5319_v23 }
 0x37e   : > { %v4428_v17 = vadd.f32 %v4422_v1, %v3489_v25 }
 0x37f   : > { %v5352_v4 = vmul.f32 %v5325_v46, %v5325_v46  ;;  %v5355_v41 = vmul.f32 %v5337_v54, %v5337_v54  ;;  %v5361_v55 = vmul.f32 %v5349_v44, %v5349_v44 }
 0x381   : > { %v5358_v34 = vadd.f32 %v5355_v41, %v5352_v4 }
 0x383   : > { %v5364_v16 = vadd.f32 %v5361_v55, %v5358_v34 }
 0x385   : > { %v5370_v7 = vrot.slane %v5364_v16, 4 }
 0x387   : > { %v14186_v24 = vadd.f32 %v5370_v7, %v4428_v17 }
 0x3b3   : > { %v5154_v48 = vpop.f32.mrb[12].mxu0 }
 0x3b4   : > { %v5299_v45 = vsub.f32 1.0, %v5154_v48  ;;  %v5305_v39 = vrot.slane %v5154_v48, 4  ;;  %v5326_v61 = vrot.slane %v5154_v48, 5  ;;  %v5338_v63 = vrot.slane %v5154_v48, 6  ;;  %v5156_v36 = vpop.f32.mrb[13].mxu0 }
 0x3b5   : > { %v5300_v51 = vsub.f32 1.0, %v5156_v36  ;;  %v5306_v58 = vrot.slane %v5156_v36, 4  ;;  %v5327_v5 = vrot.slane %v5156_v36, 5  ;;  %v5339_v20 = vrot.slane %v5156_v36, 6 }
 0x3b6   : > { %v5311_v0 = vsub.f32 %v14527_v43, %v5305_v39  ;;  %v5317_v10 = vrot.slane %v5299_v45, 7  ;;  %v5332_v29 = vsub.f32 %v14529_v40, %v5326_v61  ;;  %v5344_v60 = vsub.f32 %v14531_v8, %v5338_v63 }
 0x3b7   : > { %v5312_v42 = vsub.f32 %v14528_v26, %v5306_v58  ;;  %v5318_v11 = vrot.slane %v5300_v51, 7  ;;  %v5333_v18 = vsub.f32 %v14530_v57, %v5327_v5  ;;  %v5345_v35 = vsub.f32 %v14533_v59, %v5339_v20 }
 0x3b8   : > { %v5323_v23 = vmul.f32 %v5317_v10, %v5311_v0  ;;  %v5335_v22 = vmul.f32 %v5332_v29, %v5317_v10  ;;  %v5347_v15 = vmul.f32 %v5344_v60, %v5317_v10 }
 0x3b9   : > { %v5324_v56 = vmul.f32 %v5318_v11, %v5312_v42  ;;  %v5336_v37 = vmul.f32 %v5333_v18, %v5318_v11  ;;  %v5348_v31 = vmul.f32 %v5345_v35, %v5318_v11 }
 0x3ba   : > { %v5350_v32 = vmul.f32 %v5323_v23, %v5323_v23  ;;  %v5353_v33 = vmul.f32 %v5335_v22, %v5335_v22  ;;  %v5359_v14 = vmul.f32 %v5347_v15, %v5347_v15 }
 0x3bb   : > { %v5351_v52 = vmul.f32 %v5324_v56, %v5324_v56  ;;  %v5354_v50 = vmul.f32 %v5336_v37, %v5336_v37  ;;  %v5360_v12 = vmul.f32 %v5348_v31, %v5348_v31 }
 0x3bc   : > { %v5356_v38 = vadd.f32 %v5353_v33, %v5350_v32 }
 0x3bd   : > { %v5357_v2 = vadd.f32 %v5354_v50, %v5351_v52 }
 0x3be   : > { %v5362_v3 = vadd.f32 %v5359_v14, %v5356_v38 }
 0x3bf   : > { %v5363_v13 = vadd.f32 %v5360_v12, %v5357_v2 }
 0x3c0   : > { %v5368_v30 = vrot.slane %v5362_v3, 4 }
 0x3c1   : > { %v5369_v62 = vrot.slane %v5363_v13, 4 }
 0x3c2   : > { %v5374_v27 = vadd.f32 %v5368_v30, %v4426_v9 }
 0x3c3   : > { %v5375_v47 = vadd.f32 %v5369_v62, %v4427_v28 }
 0x3d3   : > { %v9159_v46 = vpop.f32.mrb[14].mxu0 }
 0x3d4   : > { %v9160_v54 = vpop.f32.mrb[15].mxu0 }
 0x3d5   : > { %v9161_v6 = vadd.f32 %v9160_v54, %v9159_v46 }
 0x3f3   : > { %v6102_v53 = vpop.f32.mrb[16].mxu1  ;;  %v9194_v44 = vpop.f32.mrb[16].mxu0 }
 0x3f4   : > { %v6247_v4 = vsub.f32 1.0, %v6102_v53  ;;  %v6253_v41 = vrot.slane %v6102_v53, 3  ;;  %v6274_v25 = vrot.slane %v6102_v53, 4  ;;  %v6286_v1 = vrot.slane %v6102_v53, 5  ;;  %v6104_v34 = vpop.f32.mrb[17].mxu1  ;;  %v9195_v55 = vpop.f32.mrb[17].mxu0 }
 0x3f5   : > { %v6248_v17 = vsub.f32 1.0, %v6104_v34  ;;  %v6254_v16 = vrot.slane %v6104_v34, 3  ;;  %v6275_v7 = vrot.slane %v6104_v34, 4  ;;  %v6287_v48 = vrot.slane %v6104_v34, 5 }
 0x3f6   : > { %v6259_v45 = vsub.f32 %v14527_v43, %v6253_v41  ;;  %v6265_v39 = vrot.slane %v6247_v4, 6  ;;  %v6280_v9 = vsub.f32 %v14529_v40, %v6274_v25  ;;  %v6292_v28 = vsub.f32 %v14531_v8, %v6286_v1 }
 0x3f7   : > { %v6260_v61 = vsub.f32 %v14528_v26, %v6254_v16  ;;  %v6266_v63 = vrot.slane %v6248_v17, 6  ;;  %v6281_v36 = vsub.f32 %v14530_v57, %v6275_v7  ;;  %v6293_v51 = vsub.f32 %v14533_v59, %v6287_v48 }
 0x3f8   : > { %v6271_v58 = vmul.f32 %v6265_v39, %v6259_v45  ;;  %v6283_v5 = vmul.f32 %v6280_v9, %v6265_v39  ;;  %v9196_v20 = vadd.f32 %v9195_v55, %v9194_v44  ;;  %v6295_v0 = vmul.f32 %v6292_v28, %v6265_v39 }
 0x3f9   : > { %v6272_v10 = vmul.f32 %v6266_v63, %v6260_v61  ;;  %v6284_v29 = vmul.f32 %v6281_v36, %v6266_v63  ;;  %v6296_v60 = vmul.f32 %v6293_v51, %v6266_v63 }
 0x3fa   : > { %v6298_v43 = vmul.f32 %v6271_v58, %v6271_v58  ;;  %v6301_v42 = vmul.f32 %v6283_v5, %v6283_v5  ;;  %v6244_v11 = vadd.f32 %v9196_v20, %v9161_v6  ;;  %v6307_v22 = vmul.f32 %v6295_v0, %v6295_v0 }
 0x3fb   : > { %v6299_v40 = vmul.f32 %v6272_v10, %v6272_v10  ;;  %v6302_v18 = vmul.f32 %v6284_v29, %v6284_v29  ;;  %v6308_v15 = vmul.f32 %v6296_v60, %v6296_v60 }
 0x3fc   : > { %v6249_v8 = vsub.f32 1.0, %v6244_v11  ;;  %v6255_v35 = vrot.slane %v6244_v11, 3  ;;  %v6276_v26 = vrot.slane %v6244_v11, 4  ;;  %v6288_v23 = vrot.slane %v6244_v11, 5 }
 0x3fd   : > { %v6305_v57 = vadd.f32 %v6302_v18, %v6299_v40  ;;  %v6304_v59 = vadd.f32 %v6301_v42, %v6298_v43 }
 0x3fe   : > { %v6261_v56 = vsub.f32 %v14520_v19, %v6255_v35  ;;  %v6267_v37 = vrot.slane %v6249_v8, 6  ;;  %v6282_v31 = vsub.f32 %v14521_v49, %v6276_v26  ;;  %v6294_v32 = vsub.f32 %v14522_v21, %v6288_v23 }
 0x3ff   : > { %v6310_v33 = vadd.f32 %v6307_v22, %v6304_v59  ;;  %v6311_v52 = vadd.f32 %v6308_v15, %v6305_v57 }
 0x400   : > { %v6273_v50 = vmul.f32 %v6267_v37, %v6261_v56  ;;  %v6285_v38 = vmul.f32 %v6282_v31, %v6267_v37  ;;  %v6297_v14 = vmul.f32 %v6294_v32, %v6267_v37 }
 0x401   : > { %v6316_v2 = vrot.slane %v6310_v33, 5  ;;  %v6317_v12 = vrot.slane %v6311_v52, 5 }
 0x402   : > { %v6300_v3 = vmul.f32 %v6273_v50, %v6273_v50  ;;  %v6303_v13 = vmul.f32 %v6285_v38, %v6285_v38  ;;  %v6309_v54 = vmul.f32 %v6297_v14, %v6297_v14 }
 0x403   : > { %v6322_v30 = vadd.f32 %v6316_v2, %v5374_v27  ;;  %v6323_v62 = vadd.f32 %v6317_v12, %v5375_v47 }
 0x404   : > { %v6306_v46 = vadd.f32 %v6303_v13, %v6300_v3 }
 0x405   : > { %v6326_v19 = vsel %vm6325_vm6, %v6322_v30, 0.0  ;;  %v6327_v6 = vsel %vm6325_vm6, %v6323_v62, 0.0 }
 0x406   : > { %v6312_v49 = vadd.f32 %v6309_v54, %v6306_v46  ;;  %v6328_v53 = vadd.f32 %v6327_v6, %v6326_v19 }
 0x408   : > { %v6318_v21 = vrot.slane %v6312_v49, 5 }
 0x40a   : > { %v6324_v44 = vadd.f32 %v6318_v21, %v14186_v24 }
 0x40c   : > { %v6329_v4 = vsel %vm6325_vm6, %v6324_v44, 0.0 }
 0x40d   : > { %v6330_v41 = vadd.f32 %v6329_v4, %v6328_v53 }
 0x40f   : > { %6331 = vadd.xlane.f32.xlu0 %v6330_v41 }
 0x49c   : > { %v6332_v25 = vpop.xlane.xlu0 %6331 }
 0x49d   : > { %v6333_v1 = vrot.slane %v6332_v25, 4 }
 0x49f   : > { %v6334_v34 = vadd.f32 %v6333_v1, %v6332_v25 }
 0x4a1   : > { %v6335_v55 = vrot.slane %v6334_v34, 2 }
 0x4a3   : > { %v6336_v17 = vadd.f32 %v6335_v55, %v6334_v34 }
 0x4a5   : > { %v6337_v27 = vrot.slane %v6336_v17, 1 }
 0x4a7   : > { %v6338_v47 = vadd.f32 %v6337_v27, %v6336_v17 }
 0x4a9   : > { %10380 = vpush %v6338_v47 }
 0x4da   : > { %s10381_s12 = spop %10380 }
 0x4db   : > { %v6340_v16 = vstv %s10381_s12 }
 0x4dc   : > { %6343 = vst.msk [vmem:[%s283_s11] sm:$0x1] %vm6342_vm7, %v6340_v16 }
 0x4dd PF: > { %s14_s17 = sadd.s32 1, %s10450_s17   ;;  %s14535_s15 = smov %s10446_s16 }
 0x4de   : > { %p11_p5 = scmp.ge.s32.totalorder %s14_s17, 4   ;;  %s14536_s16 = smov %s14538_s18 }
 0x4e0   :  { %13 = sbr.rel (!%p11_p5) target bundleno = 2 (0x2), region = 75 }

</bundles_post_ra>
